<compile_context>
chip_gen: v7x
topology: tpu7x:2x2x1
jax: 0.10.0
libtpu: 0.0.40
codegen_flags: <defaults>
</compile_context>

<pallas_src>
import functools
import math

import jax
import jax.numpy as jnp
import numpy as np
from jax.experimental import pallas as pl
from jax.experimental.pallas import tpu as pltpu

LANE = 128            # lane (last-dim) tiling quantum
SUBLANE = 8           # sublane quantum
TILE_M = 512          # Ahat row-block tile
TILE_K = 512          # Ahat col-block (reduction) tile
N_PAD_QUANTUM = math.lcm(TILE_M, TILE_K)
FUSE_MAX_N_PAD = 1024  # below this, run the fully fused single-call path
# Scoped VMEM limit.  Actual usage of the tiled path is ~3-4 MiB (512x512 bf16
# Ahat tile x2 buffers + resident X + f32 acc), so 32 MiB is safe on every
# generation incl. v7x (64 MiB physical).  Raise to 64-96 MiB on v5e/v6e if
# the tiles are enlarged further or X residency is kept at very large N.
VMEM_LIMIT_BYTES = 32 * 1024 * 1024


def _round_up(x, m):
    return ((x + m - 1) // m) * m


def _pad2(x, rows, cols):
    return jnp.pad(x, ((0, rows - x.shape[0]), (0, cols - x.shape[1])))


# ----------------------------------------------------------------------------
# Kernel 1: one GCN layer    out = relu( (Ahat @ X) @ W + b )
#   - Ahat streamed as (TILE_M, TILE_K) bf16 tiles, only nonzero tiles
#     (block-sparse via scalar-prefetched per-row-block column lists).
#   - X (layer input) VMEM-resident, sliced with pl.ds per nonzero tile.
#   - f32 accumulation; tiny resident-weight matmul + bias + relu in the
#     k==last epilogue (Ahat @ (X@W) == (Ahat@X) @ W).
# ----------------------------------------------------------------------------
def _gcn_layer_kernel(kids_ref, kcnt_ref, a_ref, x_ref, w_ref, b_ref,
                      o_ref, acc_ref, *, tile_k):
    i = pl.program_id(0)
    k = pl.program_id(1)

    @pl.when(k == 0)
    def _init():
        acc_ref[...] = jnp.zeros_like(acc_ref)

    # Only accumulate for genuinely nonzero Ahat tiles of this row block.
    @pl.when(k < kcnt_ref[i])
    def _accumulate():
        kb = kids_ref[i, k]                       # column block id (SMEM scalar)
        off = pl.multiple_of(kb * tile_k, tile_k)
        acc_ref[...] += jnp.dot(a_ref[...], x_ref[pl.ds(off, tile_k), :],
                                preferred_element_type=jnp.float32)

    @pl.when(k == pl.num_programs(1) - 1)
    def _finalize():
        # Tiny resident-weight matmul + bias + relu ride in the epilogue.
        # NOTE: padded rows end up holding relu(bias); nullified downstream by
        # zero padded columns of Ahat / P.
        h = jnp.dot(acc_ref[...], w_ref[...],
                    preferred_element_type=jnp.float32) + b_ref[...]
        o_ref[...] = jnp.maximum(h, 0.0).astype(o_ref.dtype)


def _gcn_layer(kids, kcnt, a, x, w, b, *, tile_m=TILE_M, tile_k=TILE_K,
               out_dtype=jnp.bfloat16):
    n = a.shape[0]
    f = x.shape[1]
    h = w.shape[1]
    nbm = n // tile_m
    max_nnz = kids.shape[1]
    assert kids.shape[0] == nbm and kcnt.shape[0] == nbm
    grid = (nbm, max_nnz)

    # Cost estimate: Ahat traffic / flops counted per visited tile (upper
    # bound: padded repeats of the last tile are not re-DMA'd nor multiplied).
    a_bytes = nbm * max_nnz * tile_m * tile_k * a.dtype.itemsize
    flops = int(2 * nbm * max_nnz * tile_m * tile_k * f + 2 * n * f * h)
    bytes_accessed = int(a_bytes
                         + x.size * x.dtype.itemsize          # resident: once
                         + w.size * w.dtype.itemsize
                         + b.size * b.dtype.itemsize
                         + n * h * np.dtype(out_dtype).itemsize)

    kernel = functools.partial(_gcn_layer_kernel, tile_k=tile_k)
    return pl.pallas_call(
        kernel,
        out_shape=jax.ShapeDtypeStruct((n, h), out_dtype),
        grid_spec=pltpu.PrefetchScalarGridSpec(
            num_scalar_prefetch=2,       # kids, kcnt -> SMEM, fed to index_maps
            grid=grid,
            in_specs=[
                # Ahat tile: data-dependent column block (block-sparse walk).
                pl.BlockSpec((tile_m, tile_k),
                             lambda i, k, kids, kcnt: (i, kids[i, k])),
                # Layer input: VMEM-resident (constant index_map -> one DMA).
                pl.BlockSpec((n, f), lambda i, k, kids, kcnt: (0, 0)),
                pl.BlockSpec((f, h), lambda i, k, kids, kcnt: (0, 0)),   # W
                pl.BlockSpec((1, h), lambda i, k, kids, kcnt: (0, 0)),   # bias
            ],
            out_specs=pl.BlockSpec((tile_m, h), lambda i, k, kids, kcnt: (i, 0)),
            scratch_shapes=[pltpu.VMEM((tile_m, f), jnp.float32)],
        ),
        compiler_params=pltpu.CompilerParams(
            dimension_semantics=("parallel", "arbitrary"),
            vmem_limit_bytes=VMEM_LIMIT_BYTES,
        ),
        cost_estimate=pl.CostEstimate(flops=flops, transcendentals=0,
                                      bytes_accessed=bytes_accessed),
    )(kids, kcnt, a, x, w, b)


# ----------------------------------------------------------------------------
# Kernel 2: global_mean_pool + final Linear    out = (P @ h2) @ W3 + b3
#   P and h2 streamed as bf16; f32 accumulator / weights.
# ----------------------------------------------------------------------------
def _pool_linear_kernel(p_ref, h_ref, w_ref, b_ref, o_ref, acc_ref):
    k = pl.program_id(0)

    @pl.when(k == 0)
    def _init():
        acc_ref[...] = jnp.zeros_like(acc_ref)

    acc_ref[...] += jnp.dot(p_ref[...], h_ref[...],
                            preferred_element_type=jnp.float32)

    @pl.when(k == pl.num_programs(0) - 1)
    def _finalize():
        o_ref[...] = (jnp.dot(acc_ref[...], w_ref[...],
                              preferred_element_type=jnp.float32)
                      + b_ref[...]).astype(o_ref.dtype)


def _pool_linear(p, h2, w, b, *, tile_k=TILE_K):
    g, n = p.shape
    h = h2.shape[1]
    o = w.shape[1]
    grid = (n // tile_k,)

    flops = int(2 * g * n * h + 2 * g * h * o)
    bytes_accessed = int(p.size * p.dtype.itemsize + h2.size * h2.dtype.itemsize
                         + w.size * w.dtype.itemsize + b.size * b.dtype.itemsize
                         + g * o * 4)

    return pl.pallas_call(
        _pool_linear_kernel,
        out_shape=jax.ShapeDtypeStruct((g, o), jnp.float32),
        grid_spec=pltpu.PrefetchScalarGridSpec(
            num_scalar_prefetch=0,
            grid=grid,
            in_specs=[
                pl.BlockSpec((g, tile_k), lambda k: (0, k)),
                pl.BlockSpec((tile_k, h), lambda k: (k, 0)),
                pl.BlockSpec((h, o), lambda k: (0, 0)),
                pl.BlockSpec((1, o), lambda k: (0, 0)),
            ],
            out_specs=pl.BlockSpec((g, o), lambda k: (0, 0)),
            scratch_shapes=[pltpu.VMEM((g, h), jnp.float32)],
        ),
        compiler_params=pltpu.CompilerParams(
            dimension_semantics=("arbitrary",),
            vmem_limit_bytes=VMEM_LIMIT_BYTES,
        ),
        cost_estimate=pl.CostEstimate(flops=flops, transcendentals=0,
                                      bytes_accessed=bytes_accessed),
    )(p, h2, w, b)


# ----------------------------------------------------------------------------
# Kernel 3 (small/medium graphs): fully fused conv1+conv2+pool+linear.
# Everything VMEM-resident -> Ahat read once, h1/h2 never hit HBM, one launch.
# ----------------------------------------------------------------------------
def _gcn_fused_kernel(a_ref, x_ref, w1_ref, b1_ref, w2_ref, b2_ref,
                      p_ref, w3_ref, b3_ref, o_ref):
    ax = jnp.dot(a_ref[...], x_ref[...], preferred_element_type=jnp.float32)
    h1 = jnp.maximum(jnp.dot(ax, w1_ref[...],
                             preferred_element_type=jnp.float32) + b1_ref[...], 0.0)
    h1 = h1.astype(jnp.bfloat16)
    ah1 = jnp.dot(a_ref[...], h1, preferred_element_type=jnp.float32)
    h2 = jnp.maximum(jnp.dot(ah1, w2_ref[...],
                             preferred_element_type=jnp.float32) + b2_ref[...], 0.0)
    h2 = h2.astype(jnp.bfloat16)
    pooled = jnp.dot(p_ref[...], h2, preferred_element_type=jnp.float32)
    o_ref[...] = (jnp.dot(pooled, w3_ref[...],
                          preferred_element_type=jnp.float32)
                  + b3_ref[...]).astype(o_ref.dtype)


def _gcn_fused(a, x, w1, b1, w2, b2, p, w3, b3):
    n = a.shape[0]
    f = x.shape[1]
    h = w1.shape[1]
    g, _ = p.shape
    o = w3.shape[1]

    operands = (a, x, w1, b1, w2, b2, p, w3, b3)
    flops = int(2 * (n * n * f + n * f * h + n * n * h + n * h * h
                     + g * n * h + g * h * o))
    bytes_accessed = int(sum(t.size * t.dtype.itemsize for t in operands)
                         + g * o * 4)

    return pl.pallas_call(
        _gcn_fused_kernel,
        out_shape=jax.ShapeDtypeStruct((g, o), jnp.float32),
        in_specs=[pl.BlockSpec(memory_space=pltpu.MemorySpace.VMEM)] * 9,
        out_specs=pl.BlockSpec(memory_space=pltpu.MemorySpace.VMEM),
        compiler_params=pltpu.CompilerParams(
            vmem_limit_bytes=VMEM_LIMIT_BYTES),
        cost_estimate=pl.CostEstimate(flops=flops, transcendentals=0,
                                      bytes_accessed=bytes_accessed),
    )(*operands)


# ----------------------------------------------------------------------------
# Full forward wrapper: pad to TPU-friendly shapes, run the kernels, slice.
# ----------------------------------------------------------------------------
def gcn_forward(a_hat, x, w1, b1, w2, b2, pool_mat, w3, b3, kids, kcnt):
    n, f = x.shape
    h = w1.shape[1]
    o = w3.shape[1]
    g = pool_mat.shape[0]

    n_pad = _round_up(max(n, 1), N_PAD_QUANTUM)
    f_pad = _round_up(f, LANE)
    h_pad = _round_up(h, LANE)
    o_pad = _round_up(o, LANE)
    g_pad = _round_up(g, SUBLANE)

    # bf16 for the big streamed operands (Ahat, X, P); f32 for tiny resident
    # weights / biases.
    a_p = _pad2(a_hat, n_pad, n_pad).astype(jnp.bfloat16)
    x_p = _pad2(x, n_pad, f_pad).astype(jnp.bfloat16)
    w1_p = _pad2(w1, f_pad, h_pad).astype(jnp.float32)
    b1_p = _pad2(b1, 1, h_pad).astype(jnp.float32)
    w2_p = _pad2(w2, h_pad, h_pad).astype(jnp.float32)
    b2_p = _pad2(b2, 1, h_pad).astype(jnp.float32)
    p_p = _pad2(pool_mat, g_pad, n_pad).astype(jnp.bfloat16)
    w3_p = _pad2(w3, h_pad, o_pad).astype(jnp.float32)
    b3_p = _pad2(b3, 1, o_pad).astype(jnp.float32)

    if n_pad <= FUSE_MAX_N_PAD:
        # Everything fits comfortably in VMEM: one fused call.
        out = _gcn_fused(a_p, x_p, w1_p, b1_p, w2_p, b2_p, p_p, w3_p, b3_p)
    else:
        # conv1 (+relu) -> bf16; conv2 (+relu) -> bf16 so pooling streams bf16.
        h1 = _gcn_layer(kids, kcnt, a_p, x_p, w1_p, b1_p, out_dtype=jnp.bfloat16)
        h2 = _gcn_layer(kids, kcnt, a_p, h1, w2_p, b2_p, out_dtype=jnp.bfloat16)
        out = _pool_linear(p_p, h2, w3_p, b3_p)
    return out[:g, :o]


gcn_forward_jit = jax.jit(gcn_forward)


# ----------------------------------------------------------------------------
# Glue: dense normalized adjacency, mean-pool matrix, block-sparsity tables.
# ----------------------------------------------------------------------------
def build_normalized_adjacency(edge_index, num_nodes):
    """Ahat = D^{-1/2} (A + I) D^{-1/2}  (PyG GCNConv default normalization).
    Duplicate edges are counted additively, matching PyG with edge weights."""
    src = jnp.asarray(edge_index[0])
    dst = jnp.asarray(edge_index[1])
    a = jnp.zeros((num_nodes, num_nodes), jnp.float32).at[dst, src].add(1.0)
    a = a + jnp.eye(num_nodes, dtype=jnp.float32)            # add self loops
    deg = a.sum(axis=1)
    d_inv_sqrt = jnp.where(deg > 0, 1.0 / jnp.sqrt(deg), 0.0)
    return d_inv_sqrt[:, None] * a * d_inv_sqrt[None, :]


def build_pool_matrix(batch, num_graphs):
    """P[g, n] = 1/|V_g| if batch[n] == g else 0  (global_mean_pool)."""
    batch = jnp.asarray(batch)
    onehot = (batch[None, :] == jnp.arange(num_graphs)[:, None]).astype(jnp.float32)
    counts = jnp.maximum(onehot.sum(axis=1, keepdims=True), 1.0)
    return onehot / counts


def build_block_sparsity(edge_index_np, num_nodes, n_pad,
                         tile_m=TILE_M, tile_k=TILE_K):
    """Per-row-block compacted list of nonzero Ahat column blocks (+ counts).
    Entries past the count repeat the last valid block id so the pipelined DMA
    does not re-fetch and the matmul is pl.when-skipped."""
    nbm = n_pad // tile_m
    nbk = n_pad // tile_k
    mask = np.zeros((nbm, nbk), dtype=bool)
    src = np.asarray(edge_index_np[0])
    dst = np.asarray(edge_index_np[1])
    mask[dst // tile_m, src // tile_k] = True          # A[dst, src] != 0
    diag = np.arange(num_nodes)
    mask[diag // tile_m, diag // tile_k] = True        # self loops
    counts = mask.sum(axis=1).astype(np.int32)
    max_nnz = max(int(counts.max()) if counts.size else 1, 1)
    kids = np.zeros((nbm, max_nnz), dtype=np.int32)
    for i in range(nbm):
        nz = np.nonzero(mask[i])[0]
        if nz.size:
            kids[i, :nz.size] = nz
            kids[i, nz.size:] = nz[-1]
    return jnp.asarray(kids), jnp.asarray(counts)


def make_ring_batch(num_graphs, nodes_per_graph):
    src, dst = [], []
    for g_i in range(num_graphs):
        base = g_i * nodes_per_graph
        for i in range(nodes_per_graph):
            s, d = base + i, base + (i + 1) % nodes_per_graph
            src += [s, d]
            dst += [d, s]
    edge_index = np.array([src, dst], dtype=np.int32)
    batch = np.repeat(np.arange(num_graphs, dtype=np.int32), nodes_per_graph)
    return edge_index, batch


# ----------------------------------------------------------------------------
# Pure-JAX reference emulating the kernel's bf16 casts on Ahat / X / h1 / h2 / P.
# ----------------------------------------------------------------------------
def gcn_reference(a_hat, x, w1, b1, w2, b2, pool_mat, w3, b3):
    a = a_hat.astype(jnp.bfloat16).astype(jnp.float32)
    xb = x.astype(jnp.bfloat16).astype(jnp.float32)
    h1 = jnp.maximum((a @ xb) @ w1 + b1, 0.0)
    h1 = h1.astype(jnp.bfloat16).astype(jnp.float32)
    h2 = jnp.maximum((a @ h1) @ w2 + b2, 0.0)
    h2 = h2.astype(jnp.bfloat16).astype(jnp.float32)
    p = pool_mat.astype(jnp.bfloat16).astype(jnp.float32)
    pooled = p @ h2
    return pooled @ w3 + b3


if __name__ == "__main__":
    # Shapes consistent with the module (edge_feat_dim = 0 -> GCNConv path).
    in_channels = 8
    hidden_channels = 32
    output_channels = 2

    key = jax.random.PRNGKey(0)
    k_params, k_x1, k_x2 = jax.random.split(key, 3)
    kw1, kb1, kw2, kb2, kw3, kb3 = jax.random.split(k_params, 6)

    def glorot(k, shape):
        fan_in, fan_out = shape
        lim = jnp.sqrt(6.0 / (fan_in + fan_out))
        return jax.random.uniform(k, shape, jnp.float32, -lim, lim)

    w1 = glorot(kw1, (in_channels, hidden_channels))
    b1 = jax.random.normal(kb1, (1, hidden_channels), jnp.float32) * 0.01
    w2 = glorot(kw2, (hidden_channels, hidden_channels))
    b2 = jax.random.normal(kb2, (1, hidden_channels), jnp.float32) * 0.01
    w3 = glorot(kw3, (hidden_channels, output_channels))
    b3 = jax.random.normal(kb3, (1, output_channels), jnp.float32) * 0.01

    def run_case(k_x, num_graphs, nodes_per_graph):
        num_nodes = num_graphs * nodes_per_graph
        x = jax.random.normal(k_x, (num_nodes, in_channels), jnp.float32)
        edge_index, batch = make_ring_batch(num_graphs, nodes_per_graph)
        a_hat = build_normalized_adjacency(edge_index, num_nodes)
        pool_mat = build_pool_matrix(batch, num_graphs)
        n_pad = _round_up(max(num_nodes, 1), N_PAD_QUANTUM)
        kids, kcnt = build_block_sparsity(edge_index, num_nodes, n_pad)

        out = gcn_forward_jit(a_hat, x, w1, b1, w2, b2, pool_mat, w3, b3,
                              kids, kcnt)
        out = jax.block_until_ready(out)

        ref = gcn_reference(a_hat, x, w1, b1, w2, b2, pool_mat, w3, b3)
        np.testing.assert_allclose(np.asarray(out), np.asarray(ref),
                                   rtol=1e-2, atol=1e-2)

    # Small case from the module spec: 2 graphs of 8 nodes -> fused VMEM path.
    run_case(k_x1, num_graphs=2, nodes_per_graph=8)
    # Larger batched case: 40 graphs x 48 nodes -> N=1920, padded to 2048.
    # Exercises the tiled block-sparse path: 4 row blocks ("parallel" axis
    # feeds both v7x TensorCores), variable per-row-block nonzero-tile counts
    # (some graphs straddle 512 tile boundaries), pl.when skip, and the
    # bf16 pooling kernel.
    run_case(k_x2, num_graphs=40, nodes_per_graph=48)

    print("KERNEL_OK")
</pallas_src>

<mosaic_0001>
module attributes {stable_mosaic.version = 11 : i64} {
  func.func @_gcn_fused_kernel(%arg0: memref<512x512xbf16, #tpu.memory_space<vmem>>, %arg1: memref<512x128xbf16, #tpu.memory_space<vmem>>, %arg2: memref<128x128xf32, #tpu.memory_space<vmem>>, %arg3: memref<1x128xf32, #tpu.memory_space<vmem>>, %arg4: memref<128x128xf32, #tpu.memory_space<vmem>>, %arg5: memref<1x128xf32, #tpu.memory_space<vmem>>, %arg6: memref<8x512xbf16, #tpu.memory_space<vmem>>, %arg7: memref<128x128xf32, #tpu.memory_space<vmem>>, %arg8: memref<1x128xf32, #tpu.memory_space<vmem>>, %arg9: memref<8x128xf32, #tpu.memory_space<vmem>>) attributes {dimension_semantics = [], scalar_prefetch = 0 : i64, scratch_operands = 0 : i64, tpu.core_type = #tpu.core_type<tc>} {
    %c0 = arith.constant 0 : index
    %c0_0 = arith.constant 0 : index
    %0 = vector.load %arg0[%c0, %c0_0] : memref<512x512xbf16, #tpu.memory_space<vmem>>, vector<512x512xbf16>
    %c0_1 = arith.constant 0 : index
    %c0_2 = arith.constant 0 : index
    %1 = vector.load %arg1[%c0_1, %c0_2] : memref<512x128xbf16, #tpu.memory_space<vmem>>, vector<512x128xbf16>
    %cst = arith.constant dense<0.000000e+00> : vector<512x128xf32>
    %2 = tpu.matmul %0, %1, %cst {dimension_numbers = #tpu.dot_dimension_numbers<[1], [0], [0], [1], [0, 0, 1, 1], [], []>} : vector<512x512xbf16>, vector<512x128xbf16>, vector<512x128xf32> -> vector<512x128xf32>
    %c0_3 = arith.constant 0 : index
    %c0_4 = arith.constant 0 : index
    %3 = vector.load %arg2[%c0_3, %c0_4] : memref<128x128xf32, #tpu.memory_space<vmem>>, vector<128x128xf32>
    %cst_5 = arith.constant dense<0.000000e+00> : vector<512x128xf32>
    %4 = tpu.matmul %2, %3, %cst_5 {dimension_numbers = #tpu.dot_dimension_numbers<[1], [0], [0], [1], [0, 0, 1, 1], [], []>} : vector<512x128xf32>, vector<128x128xf32>, vector<512x128xf32> -> vector<512x128xf32>
    %c0_6 = arith.constant 0 : index
    %c0_7 = arith.constant 0 : index
    %5 = vector.load %arg3[%c0_6, %c0_7] : memref<1x128xf32, #tpu.memory_space<vmem>>, vector<1x128xf32>
    %6 = vector.broadcast %5 : vector<1x128xf32> to vector<512x128xf32>
    %7 = arith.addf %4, %6 : vector<512x128xf32>
    %cst_8 = arith.constant 0.000000e+00 : f32
    %8 = vector.broadcast %cst_8 : f32 to vector<512x128xf32>
    %9 = arith.maximumf %7, %8 : vector<512x128xf32>
    %10 = arith.truncf %9 : vector<512x128xf32> to vector<512x128xbf16>
    %c0_9 = arith.constant 0 : index
    %c0_10 = arith.constant 0 : index
    %11 = vector.load %arg0[%c0_9, %c0_10] : memref<512x512xbf16, #tpu.memory_space<vmem>>, vector<512x512xbf16>
    %cst_11 = arith.constant dense<0.000000e+00> : vector<512x128xf32>
    %12 = tpu.matmul %11, %10, %cst_11 {dimension_numbers = #tpu.dot_dimension_numbers<[1], [0], [0], [1], [0, 0, 1, 1], [], []>} : vector<512x512xbf16>, vector<512x128xbf16>, vector<512x128xf32> -> vector<512x128xf32>
    %c0_12 = arith.constant 0 : index
    %c0_13 = arith.constant 0 : index
    %13 = vector.load %arg4[%c0_12, %c0_13] : memref<128x128xf32, #tpu.memory_space<vmem>>, vector<128x128xf32>
    %cst_14 = arith.constant dense<0.000000e+00> : vector<512x128xf32>
    %14 = tpu.matmul %12, %13, %cst_14 {dimension_numbers = #tpu.dot_dimension_numbers<[1], [0], [0], [1], [0, 0, 1, 1], [], []>} : vector<512x128xf32>, vector<128x128xf32>, vector<512x128xf32> -> vector<512x128xf32>
    %c0_15 = arith.constant 0 : index
    %c0_16 = arith.constant 0 : index
    %15 = vector.load %arg5[%c0_15, %c0_16] : memref<1x128xf32, #tpu.memory_space<vmem>>, vector<1x128xf32>
    %16 = vector.broadcast %15 : vector<1x128xf32> to vector<512x128xf32>
    %17 = arith.addf %14, %16 : vector<512x128xf32>
    %cst_17 = arith.constant 0.000000e+00 : f32
    %18 = vector.broadcast %cst_17 : f32 to vector<512x128xf32>
    %19 = arith.maximumf %17, %18 : vector<512x128xf32>
    %20 = arith.truncf %19 : vector<512x128xf32> to vector<512x128xbf16>
    %c0_18 = arith.constant 0 : index
    %c0_19 = arith.constant 0 : index
    %21 = vector.load %arg6[%c0_18, %c0_19] : memref<8x512xbf16, #tpu.memory_space<vmem>>, vector<8x512xbf16>
    %cst_20 = arith.constant dense<0.000000e+00> : vector<8x128xf32>
    %22 = tpu.matmul %21, %20, %cst_20 {dimension_numbers = #tpu.dot_dimension_numbers<[1], [0], [0], [1], [0, 0, 1, 1], [], []>} : vector<8x512xbf16>, vector<512x128xbf16>, vector<8x128xf32> -> vector<8x128xf32>
    %c0_21 = arith.constant 0 : index
    %c0_22 = arith.constant 0 : index
    %23 = vector.load %arg7[%c0_21, %c0_22] : memref<128x128xf32, #tpu.memory_space<vmem>>, vector<128x128xf32>
    %cst_23 = arith.constant dense<0.000000e+00> : vector<8x128xf32>
    %24 = tpu.matmul %22, %23, %cst_23 {dimension_numbers = #tpu.dot_dimension_numbers<[1], [0], [0], [1], [0, 0, 1, 1], [], []>} : vector<8x128xf32>, vector<128x128xf32>, vector<8x128xf32> -> vector<8x128xf32>
    %c0_24 = arith.constant 0 : index
    %c0_25 = arith.constant 0 : index
    %25 = vector.load %arg8[%c0_24, %c0_25] : memref<1x128xf32, #tpu.memory_space<vmem>>, vector<1x128xf32>
    %26 = vector.broadcast %25 : vector<1x128xf32> to vector<8x128xf32>
    %27 = arith.addf %24, %26 : vector<8x128xf32>
    %c0_26 = arith.constant 0 : index
    %c0_27 = arith.constant 0 : index
    %28 = vector.load %arg9[%c0_26, %c0_27] : memref<8x128xf32, #tpu.memory_space<vmem>>, vector<8x128xf32>
    tpu.vector_store %arg9[%c0_26, %c0_27], %27 {strides = array<i32>} : memref<8x128xf32, #tpu.memory_space<vmem>>, vector<8x128xf32>,
    return
  }
}

</mosaic_0001>

<bundles_post_ra>
// kernel: gcn_forward.1
= control target key start
LH: loop header
LB: loop body
LE: loop exit
PB: predicated region body
PF: predicated region fallthrough
CT: control target
= control target key end

     0   :  { %v4798_v0 = vmov 0   ;;  %vm4800_vm0 = vmmov 0   ;;  %s6136_s1 = inlined_call_operand.vmem [shape: bf16[512,128], index: 1, kind: input, shape index: {}]   ;;  %s6137_s0 = inlined_call_operand.vmem [shape: bf16[512,512], index: 0, kind: input, shape index: {}]   ;;  %s6138_s2 = inlined_call_operand.vmem [shape: f32[128,128], index: 2, kind: input, shape index: {}]   ;;  %s6139_s3 = inlined_call_operand.vmem [shape: f32[1,128], index: 3, kind: input, shape index: {}]   ;;  %s6140_s4 = inlined_call_operand.vmem [shape: f32[128,128], index: 4, kind: input, shape index: {}]   ;;  %s6141_s5 = inlined_call_operand.vmem [shape: f32[1,128], index: 5, kind: input, shape index: {}]   ;;  %s6142_s6 = inlined_call_operand.vmem [shape: bf16[8,512], index: 6, kind: input, shape index: {}]   ;;  %s6143_s7 = inlined_call_operand.vmem [shape: f32[128,128], index: 7, kind: input, shape index: {}]   ;;  %s6144_s8 = inlined_call_operand.vmem [shape: f32[1,128], index: 8, kind: input, shape index: {}]   ;;  %s6145_s9 = inlined_call_operand.vmem [shape: f32[8,128], index: 9, kind: output, shape index: {}]  }
   0x1   :  { %1057 = vmatprep.subr.bf16.mxu0 %v4798_v0  ;;  %v4442_v1 = vld [vmem:[%s6136_s1] sm:$0xff]   ;;  %v4443_v2 = vld [vmem:[%s6136_s1 + $0x8] sm:$0xff]   ;;  %v4444_v3 = vld [vmem:[%s6136_s1 + $0x10] sm:$0xff]  }
   0x2   :  { %1058 = vmatpush1.bf16.msra.mxu0 %v4442_v1  ;;  %v4445_v4 = vld [vmem:[%s6136_s1 + $0x18] sm:$0xff]   ;;  %v4446_v5 = vld [vmem:[%s6136_s1 + $0x20] sm:$0xff]   ;;  %v4447_v7 = vld [vmem:[%s6136_s1 + $0x28] sm:$0xff]  }
   0x3   :  { %1059 = vmatprep.subr.bf16.mxu0 %v4798_v0  ;;  %v4460_v6 = vld [vmem:[%s6137_s0 + $0x4] ss:$16 sps:$4 sm:$0xff]   ;;  %v4449_v9 = vld [vmem:[%s6136_s1 + $0x38] sm:$0xff]   ;;  %v4451_v11 = vld [vmem:[%s6136_s1 + $0x48] sm:$0xff]  }
   0x4   :  { %1089 = vmatprep.mubr.bf16.mxu0 %v4460_v6  ;;  %v4448_v8 = vld [vmem:[%s6136_s1 + $0x30] sm:$0xff]   ;;  %v4450_v10 = vld [vmem:[%s6136_s1 + $0x40] sm:$0xff]   ;;  %v4453_v13 = vld [vmem:[%s6136_s1 + $0x58] sm:$0xff]  }
   0x5   :  { %v4452_v12 = vld [vmem:[%s6136_s1 + $0x50] sm:$0xff]   ;;  %v4454_v14 = vld [vmem:[%s6136_s1 + $0x60] sm:$0xff]   ;;  %v4455_v15 = vld [vmem:[%s6136_s1 + $0x68] sm:$0xff]  }
   0x6   :  { %1060 = vmatpush1.bf16.msra.mxu0 %v4443_v2  ;;  %v4456_v16 = vld [vmem:[%s6136_s1 + $0x70] sm:$0xff]   ;;  %v4457_v17 = vld [vmem:[%s6136_s1 + $0x78] sm:$0xff]   ;;  %v4485_v20 = vld [vmem:[%s6136_s1 + $0x80] sm:$0xff]  }
   0x7   :  { %1061 = vmatprep.subr.bf16.mxu0 %v4798_v0  ;;  %v4458_v18 = vld [vmem:[%s6137_s0] ss:$16 sps:$4 sm:$0xff]   ;;  %v4461_v19 = vld [vmem:[%s6137_s0 + $0x24] ss:$16 sps:$4 sm:$0xff]   ;;  %v4492_v21 = vld [vmem:[%s6136_s1 + $0x88] sm:$0xff]  }
   0x8   :  { %v4463_v22 = vld [vmem:[%s6137_s0 + $0x20] ss:$16 sps:$4 sm:$0xff]   ;;  %v4464_v23 = vld [vmem:[%s6137_s0 + $0x44] ss:$16 sps:$4 sm:$0xff]   ;;  %v4506_v25 = vld [vmem:[%s6136_s1 + $0x98] sm:$0xff]  }
   0x9   :  { %v4499_v24 = vld [vmem:[%s6136_s1 + $0x90] sm:$0xff]   ;;  %v4513_v28 = vld [vmem:[%s6136_s1 + $0xa0] sm:$0xff]   ;;  %v4520_v29 = vld [vmem:[%s6136_s1 + $0xa8] sm:$0xff]  }
   0xa   :  { %1062 = vmatpush1.bf16.msra.mxu0 %v4444_v3  ;;  %v4466_v26 = vld [vmem:[%s6137_s0 + $0x40] ss:$16 sps:$4 sm:$0xff]   ;;  %v4467_v27 = vld [vmem:[%s6137_s0 + $0x64] ss:$16 sps:$4 sm:$0xff]   ;;  %v4534_v39 = vld [vmem:[%s6136_s1 + $0xb8] sm:$0xff]  }
   0xb   :  { %1063 = vmatprep.subr.bf16.mxu0 %v4798_v0  ;;  %v4469_v30 = vld [vmem:[%s6137_s0 + $0x60] ss:$16 sps:$4 sm:$0xff]   ;;  %v4470_v31 = vld [vmem:[%s6137_s0 + $0x84] ss:$16 sps:$4 sm:$0xff]   ;;  %v4548_v49 = vld [vmem:[%s6136_s1 + $0xc8] sm:$0xff]  }
   0xc   :  { %v4472_v32 = vld [vmem:[%s6137_s0 + $0x80] ss:$16 sps:$4 sm:$0xff]   ;;  %v4473_v33 = vld [vmem:[%s6137_s0 + $0xa4] ss:$16 sps:$4 sm:$0xff]   ;;  %v4559_v57 = vld [vmem:[%s6136_s1 + $0xd8] sm:$0xff]  }
   0xd   :  { %v4527_v34 = vld [vmem:[%s6136_s1 + $0xb0] sm:$0xff]   ;;  %v4541_v44 = vld [vmem:[%s6136_s1 + $0xc0] sm:$0xff]   ;;  %v4564_v61 = vld [vmem:[%s6136_s1 + $0xe8] sm:$0xff]  }
   0xe   :  { %1064 = vmatpush1.bf16.msra.mxu0 %v4445_v4  ;;  %v4475_v35 = vld [vmem:[%s6137_s0 + $0xa0] ss:$16 sps:$4 sm:$0xff]   ;;  %v4476_v36 = vld [vmem:[%s6137_s0 + $0xc4] ss:$16 sps:$4 sm:$0xff]   ;;  %v4569_v2 = vld [vmem:[%s6136_s1 + $0xf8] sm:$0xff]  }
   0xf   :  { %1065 = vmatprep.subr.bf16.mxu0 %v4798_v0  ;;  %v4478_v37 = vld [vmem:[%s6137_s0 + $0xc0] ss:$16 sps:$4 sm:$0xff]   ;;  %v4479_v38 = vld [vmem:[%s6137_s0 + $0xe4] ss:$16 sps:$4 sm:$0xff]  }
  0x10   :  { %v4481_v40 = vld [vmem:[%s6137_s0 + $0xe0] ss:$16 sps:$4 sm:$0xff]   ;;  %v4482_v41 = vld [vmem:[%s6137_s0 + $0x104] ss:$16 sps:$4 sm:$0xff]  }
  0x11   :  { %v4484_v42 = vld [vmem:[%s6137_s0 + $0x100] ss:$16 sps:$4 sm:$0xff]   ;;  %v4486_v43 = vld [vmem:[%s6137_s0 + $0x124] ss:$16 sps:$4 sm:$0xff]  }
  0x12   :  { %1066 = vmatpush1.bf16.msra.mxu0 %v4446_v5  ;;  %v4488_v45 = vld [vmem:[%s6137_s0 + $0x120] ss:$16 sps:$4 sm:$0xff]   ;;  %v4489_v46 = vld [vmem:[%s6137_s0 + $0x144] ss:$16 sps:$4 sm:$0xff]  }
  0x13   :  { %1067 = vmatprep.subr.bf16.mxu0 %v4798_v0  ;;  %v4491_v47 = vld [vmem:[%s6137_s0 + $0x140] ss:$16 sps:$4 sm:$0xff]   ;;  %v4493_v48 = vld [vmem:[%s6137_s0 + $0x164] ss:$16 sps:$4 sm:$0xff]  }
  0x14   :  { %v4495_v50 = vld [vmem:[%s6137_s0 + $0x160] ss:$16 sps:$4 sm:$0xff]   ;;  %v4496_v51 = vld [vmem:[%s6137_s0 + $0x184] ss:$16 sps:$4 sm:$0xff]  }
  0x15   :  { %v4498_v52 = vld [vmem:[%s6137_s0 + $0x180] ss:$16 sps:$4 sm:$0xff]   ;;  %v4500_v53 = vld [vmem:[%s6137_s0 + $0x1a4] ss:$16 sps:$4 sm:$0xff]  }
  0x16   :  { %1068 = vmatpush1.bf16.msra.mxu0 %v4447_v7  ;;  %v4555_v54 = vld [vmem:[%s6136_s1 + $0xd0] sm:$0xff]   ;;  %v4563_v60 = vld [vmem:[%s6136_s1 + $0xe0] sm:$0xff]  }
  0x17   :  { %1069 = vmatprep.subr.bf16.mxu0 %v4798_v0  ;;  %v4502_v55 = vld [vmem:[%s6137_s0 + $0x1a0] ss:$16 sps:$4 sm:$0xff]   ;;  %v4503_v56 = vld [vmem:[%s6137_s0 + $0x1c4] ss:$16 sps:$4 sm:$0xff]  }
  0x18   :  { %v4505_v58 = vld [vmem:[%s6137_s0 + $0x1c0] ss:$16 sps:$4 sm:$0xff]   ;;  %v4507_v59 = vld [vmem:[%s6137_s0 + $0x1e4] ss:$16 sps:$4 sm:$0xff]  }
  0x19   :  { %v4509_v62 = vld [vmem:[%s6137_s0 + $0x1e0] ss:$16 sps:$4 sm:$0xff]   ;;  %v4510_v63 = vld [vmem:[%s6137_s0 + $0x204] ss:$16 sps:$4 sm:$0xff]  }
  0x1a   :  { %1070 = vmatpush1.bf16.msra.mxu0 %v4448_v8  ;;  %v4568_v1 = vld [vmem:[%s6136_s1 + $0xf0] sm:$0xff]  }
  0x1b   :  { %1071 = vmatprep.subr.bf16.mxu0 %v4798_v0  ;;  %v4512_v3 = vld [vmem:[%s6137_s0 + $0x200] ss:$16 sps:$4 sm:$0xff]   ;;  %v4514_v4 = vld [vmem:[%s6137_s0 + $0x224] ss:$16 sps:$4 sm:$0xff]  }
  0x1c   :  { %v4516_v5 = vld [vmem:[%s6137_s0 + $0x220] ss:$16 sps:$4 sm:$0xff]   ;;  %v4517_v6 = vld [vmem:[%s6137_s0 + $0x244] ss:$16 sps:$4 sm:$0xff]  }
  0x1d   :  { %v4519_v7 = vld [vmem:[%s6137_s0 + $0x240] ss:$16 sps:$4 sm:$0xff]   ;;  %v4521_v8 = vld [vmem:[%s6137_s0 + $0x264] ss:$16 sps:$4 sm:$0xff]  }
  0x1e   :  { %1072 = vmatpush1.bf16.msra.mxu0 %v4449_v9  ;;  %v4523_v9 = vld [vmem:[%s6137_s0 + $0x260] ss:$16 sps:$4 sm:$0xff]  }
  0x1f   :  { %1073 = vmatprep.subr.bf16.mxu0 %v4798_v0 }
  0x22   :  { %1074 = vmatpush1.bf16.msra.mxu0 %v4450_v10  ;;  %v4524_v10 = vld [vmem:[%s6137_s0 + $0x284] ss:$16 sps:$4 sm:$0xff]  }
  0x23   :  { %1075 = vmatprep.subr.bf16.mxu0 %v4798_v0 }
  0x26   :  { %1076 = vmatpush1.bf16.msra.mxu0 %v4451_v11  ;;  %v4526_v11 = vld [vmem:[%s6137_s0 + $0x280] ss:$16 sps:$4 sm:$0xff]  }
  0x27   :  { %1077 = vmatprep.subr.bf16.mxu0 %v4798_v0 }
  0x2a   :  { %1078 = vmatpush1.bf16.msra.mxu0 %v4452_v12  ;;  %v4528_v12 = vld [vmem:[%s6137_s0 + $0x2a4] ss:$16 sps:$4 sm:$0xff]  }
  0x2b   :  { %1079 = vmatprep.subr.bf16.mxu0 %v4798_v0 }
  0x2e   :  { %1080 = vmatpush1.bf16.msra.mxu0 %v4453_v13  ;;  %v4530_v13 = vld [vmem:[%s6137_s0 + $0x2a0] ss:$16 sps:$4 sm:$0xff]  }
  0x2f   :  { %1081 = vmatprep.subr.bf16.mxu0 %v4798_v0 }
  0x32   :  { %1082 = vmatpush1.bf16.msra.mxu0 %v4454_v14  ;;  %v4531_v14 = vld [vmem:[%s6137_s0 + $0x2c4] ss:$16 sps:$4 sm:$0xff]  }
  0x33   :  { %1083 = vmatprep.subr.bf16.mxu0 %v4798_v0 }
  0x36   :  { %1084 = vmatpush1.bf16.msra.mxu0 %v4455_v15  ;;  %v4533_v15 = vld [vmem:[%s6137_s0 + $0x2c0] ss:$16 sps:$4 sm:$0xff]  }
  0x37   :  { %1085 = vmatprep.subr.bf16.mxu0 %v4798_v0 }
  0x3a   :  { %1086 = vmatpush1.bf16.msra.mxu0 %v4456_v16  ;;  %v4535_v16 = vld [vmem:[%s6137_s0 + $0x2e4] ss:$16 sps:$4 sm:$0xff]  }
  0x3b   :  { %1087 = vmatprep.subr.bf16.mxu0 %v4798_v0 }
  0x3e   :  { %1088 = vmatpush1.bf16.msra.mxu0 %v4457_v17  ;;  %v4537_v17 = vld [vmem:[%s6137_s0 + $0x2e0] ss:$16 sps:$4 sm:$0xff]  }
  0x3f   :  { %1346 = vmatprep.subr.bf16.mxu0 %v4798_v0 }
  0x41   :  { %1090 = vmatmul.mubr.bf16.vlgmr.msra.gmra.mrb[0].mxu0 %v4458_v18  ;;  %v4538_v18 = vld [vmem:[%s6137_s0 + $0x304] ss:$16 sps:$4 sm:$0xff]  }
  0x42   :  { %1097 = vmatprep.mubr.bf16.mxu0 %v4461_v19  ;;  %1347 = vmatpush1.bf16.msra.mxu0 %v4485_v20  ;;  %v4540_v19 = vld [vmem:[%s6137_s0 + $0x300] ss:$16 sps:$4 sm:$0xff]   ;;  %v4542_v20 = vld [vmem:[%s6137_s0 + $0x324] ss:$16 sps:$4 sm:$0xff]  }
  0x43   :  { %1348 = vmatprep.subr.bf16.mxu0 %v4798_v0 }
  0x46   :  { %1349 = vmatpush1.bf16.msra.mxu0 %v4492_v21  ;;  %v4544_v21 = vld [vmem:[%s6137_s0 + $0x320] ss:$16 sps:$4 sm:$0xff]  }
  0x47   :  { %1350 = vmatprep.subr.bf16.mxu0 %v4798_v0 }
  0x49   :  { %1098 = vmatmul.mubr.bf16.gmra.mrb[4].mxu0 %v4463_v22  ;;  %v4545_v22 = vld [vmem:[%s6137_s0 + $0x344] ss:$16 sps:$4 sm:$0xff]  }
  0x4a   :  { %1105 = vmatprep.mubr.bf16.mxu0 %v4464_v23  ;;  %1351 = vmatpush1.bf16.msra.mxu0 %v4499_v24  ;;  %v4547_v23 = vld [vmem:[%s6137_s0 + $0x340] ss:$16 sps:$4 sm:$0xff]   ;;  %v4549_v24 = vld [vmem:[%s6137_s0 + $0x364] ss:$16 sps:$4 sm:$0xff]  }
  0x4b   :  { %1352 = vmatprep.subr.bf16.mxu0 %v4798_v0 }
  0x4e   :  { %1353 = vmatpush1.bf16.msra.mxu0 %v4506_v25  ;;  %v4551_v25 = vld [vmem:[%s6137_s0 + $0x360] ss:$16 sps:$4 sm:$0xff]  }
  0x4f   :  { %1354 = vmatprep.subr.bf16.mxu0 %v4798_v0 }
  0x51   :  { %1106 = vmatmul.mubr.bf16.gmra.mrb[8].mxu0 %v4466_v26  ;;  %v4552_v26 = vld [vmem:[%s6137_s0 + $0x384] ss:$16 sps:$4 sm:$0xff]  }
  0x52   :  { %1113 = vmatprep.mubr.bf16.mxu0 %v4467_v27  ;;  %1355 = vmatpush1.bf16.msra.mxu0 %v4513_v28  ;;  %v4554_v27 = vld [vmem:[%s6137_s0 + $0x380] ss:$16 sps:$4 sm:$0xff]   ;;  %v4556_v28 = vld [vmem:[%s6137_s0 + $0x3a4] ss:$16 sps:$4 sm:$0xff]  }
  0x53   :  { %1356 = vmatprep.subr.bf16.mxu0 %v4798_v0 }
  0x56   :  { %1357 = vmatpush1.bf16.msra.mxu0 %v4520_v29  ;;  %v4558_v29 = vld [vmem:[%s6137_s0 + $0x3a0] ss:$16 sps:$4 sm:$0xff]  }
  0x57   :  { %1358 = vmatprep.subr.bf16.mxu0 %v4798_v0 }
  0x59   :  { %1114 = vmatmul.mubr.bf16.gmra.mrb[12].mxu0 %v4469_v30  ;;  %v4560_v30 = vld [vmem:[%s6137_s0 + $0x3c4] ss:$16 sps:$4 sm:$0xff]  }
  0x5a   :  { %1121 = vmatprep.mubr.bf16.mxu0 %v4470_v31  ;;  %1359 = vmatpush1.bf16.msra.mxu0 %v4527_v34  ;;  %v4562_v31 = vld [vmem:[%s6137_s0 + $0x3c0] ss:$16 sps:$4 sm:$0xff]   ;;  %v4572_v34 = vld [vmem:[%s6137_s0 + $0xc] ss:$16 sps:$4 sm:$0xff]  }
  0x5b   :  { %1360 = vmatprep.subr.bf16.mxu0 %v4798_v0 }
  0x5e   :  { %1361 = vmatpush1.bf16.msra.mxu0 %v4534_v39  ;;  %v4578_v39 = vld [vmem:[%s6137_s0 + $0x48] ss:$16 sps:$4 sm:$0xff]  }
  0x5f   :  { %1362 = vmatprep.subr.bf16.mxu0 %v4798_v0 }
  0x61   :  { %1122 = vmatmul.mubr.bf16.gmra.mrb[16].mxu0 %v4472_v32  ;;  %v4565_v32 = vld [vmem:[%s6137_s0 + $0x3e4] ss:$16 sps:$4 sm:$0xff]  }
  0x62   :  { %1129 = vmatprep.mubr.bf16.mxu0 %v4473_v33  ;;  %1363 = vmatpush1.bf16.msra.mxu0 %v4541_v44  ;;  %v4567_v33 = vld [vmem:[%s6137_s0 + $0x3e0] ss:$16 sps:$4 sm:$0xff]   ;;  %v4585_v44 = vld [vmem:[%s6137_s0 + $0xac] ss:$16 sps:$4 sm:$0xff]  }
  0x63   :  { %1364 = vmatprep.subr.bf16.mxu0 %v4798_v0 }
  0x66   :  { %1365 = vmatpush1.bf16.msra.mxu0 %v4548_v49  ;;  %v1635_v49 = vld [vmem:[%s6138_s2] sm:$0xff] }
  0x67   :  { %1366 = vmatprep.subr.bf16.mxu0 %v4798_v0 }
  0x69   :  { %1130 = vmatmul.mubr.bf16.gmra.mrb[20].mxu0 %v4475_v35  ;;  %v4570_v35 = vld [vmem:[%s6137_s0 + $0x8] ss:$16 sps:$4 sm:$0xff]  }
  0x6a   :  { %1137 = vmatprep.mubr.bf16.mxu0 %v4476_v36  ;;  %1367 = vmatpush1.bf16.msra.mxu0 %v4555_v54  ;;  %v4573_v36 = vld [vmem:[%s6137_s0 + $0x2c] ss:$16 sps:$4 sm:$0xff]   ;;  %v1637_v54 = vld [vmem:[%s6138_s2 + $0x10] sm:$0xff] }
  0x6b   :  { %1368 = vmatprep.subr.bf16.mxu0 %v4798_v0 }
  0x6e   :  { %1369 = vmatpush1.bf16.msra.mxu0 %v4559_v57  ;;  %v1639_v57 = vld [vmem:[%s6138_s2 + $0x20] sm:$0xff] }
  0x6f   :  { %1370 = vmatprep.subr.bf16.mxu0 %v4798_v0 }
  0x71   :  { %1138 = vmatmul.mubr.bf16.gmra.mrb[24].mxu0 %v4478_v37  ;;  %v4575_v37 = vld [vmem:[%s6137_s0 + $0x28] ss:$16 sps:$4 sm:$0xff]  }
  0x72   :  { %1145 = vmatprep.mubr.bf16.mxu0 %v4479_v38  ;;  %1371 = vmatpush1.bf16.msra.mxu0 %v4563_v60  ;;  %v4576_v38 = vld [vmem:[%s6137_s0 + $0x4c] ss:$16 sps:$4 sm:$0xff]   ;;  %v4596_v60 = vld [vmem:[%s6137_s0 + $0x108] ss:$16 sps:$4 sm:$0xff]  }
  0x73   :  { %1372 = vmatprep.subr.bf16.mxu0 %v4798_v0 }
  0x76   :  { %1373 = vmatpush1.bf16.msra.mxu0 %v4564_v61  ;;  %v4597_v61 = vld [vmem:[%s6137_s0 + $0x12c] ss:$16 sps:$4 sm:$0xff]  }
  0x77   :  { %1374 = vmatprep.subr.bf16.mxu0 %v4798_v0 }
  0x79   :  { %1146 = vmatmul.mubr.bf16.gmra.mrb[28].mxu0 %v4481_v40  ;;  %v4579_v40 = vld [vmem:[%s6137_s0 + $0x6c] ss:$16 sps:$4 sm:$0xff]  }
  0x7a   :  { %1153 = vmatprep.mubr.bf16.mxu0 %v4482_v41  ;;  %1375 = vmatpush1.bf16.msra.mxu0 %v4568_v1  ;;  %v4581_v41 = vld [vmem:[%s6137_s0 + $0x68] ss:$16 sps:$4 sm:$0xff]  }
  0x7b   :  { %1376 = vmatprep.subr.bf16.mxu0 %v4798_v0 }
  0x7e   :  { %1377 = vmatpush1.bf16.msra.mxu0 %v4569_v2  ;;  %v1643_v2 = vld [vmem:[%s6138_s2 + $0x40] sm:$0xff] }
  0x81   :  { %1154 = vmatmul.mubr.bf16.gmra.mrb[32].mxu0 %v4484_v42  ;;  %v4582_v42 = vld [vmem:[%s6137_s0 + $0x8c] ss:$16 sps:$4 sm:$0xff]  }
  0x82   :  { %1161 = vmatprep.mubr.bf16.mxu0 %v4486_v43  ;;  %v4584_v43 = vld [vmem:[%s6137_s0 + $0x88] ss:$16 sps:$4 sm:$0xff]  }
  0x89   :  { %1162 = vmatmul.mubr.bf16.gmra.mrb[36].mxu0 %v4488_v45  ;;  %v4587_v45 = vld [vmem:[%s6137_s0 + $0xa8] ss:$16 sps:$4 sm:$0xff]  }
  0x8a   :  { %1169 = vmatprep.mubr.bf16.mxu0 %v4489_v46  ;;  %v4588_v46 = vld [vmem:[%s6137_s0 + $0xcc] ss:$16 sps:$4 sm:$0xff]  }
  0x91   :  { %1170 = vmatmul.mubr.bf16.gmra.mrb[40].mxu0 %v4491_v47  ;;  %v4590_v47 = vld [vmem:[%s6137_s0 + $0xc8] ss:$16 sps:$4 sm:$0xff]  }
  0x92   :  { %1177 = vmatprep.mubr.bf16.mxu0 %v4493_v48  ;;  %v4591_v48 = vld [vmem:[%s6137_s0 + $0xec] ss:$16 sps:$4 sm:$0xff]  }
  0x99   :  { %1178 = vmatmul.mubr.bf16.gmra.mrb[44].mxu0 %v4495_v50  ;;  %v1636_v50 = vld [vmem:[%s6138_s2 + $0x8] sm:$0xff] }
  0x9a   :  { %1185 = vmatprep.mubr.bf16.mxu0 %v4496_v51  ;;  %v4094_v51 = vpack.c.bf16 %v1636_v50, %v1635_v49  ;;  %v4651_v49 = vld [vmem:[%s6137_s0 + $0x36c] ss:$16 sps:$4 sm:$0xff]  }
  0x9c   :  { %4095 = vmatprep.subr.bf16.mxu1 %v4094_v51 }
  0x9d   :  { %4097 = vmatpush3.bf16.msra.mxu1 %v4094_v51 }
  0xa1   :  { %1186 = vmatmul.mubr.bf16.gmra.mrb[48].mxu0 %v4498_v52  ;;  %v4593_v52 = vld [vmem:[%s6137_s0 + $0xe8] ss:$16 sps:$4 sm:$0xff]  }
  0xa2   :  { %1193 = vmatprep.mubr.bf16.mxu0 %v4500_v53  ;;  %v4594_v53 = vld [vmem:[%s6137_s0 + $0x10c] ss:$16 sps:$4 sm:$0xff]  }
  0xa9   :  { %1194 = vmatmul.mubr.bf16.gmra.mrb[52].mxu0 %v4502_v55  ;;  %v1638_v55 = vld [vmem:[%s6138_s2 + $0x18] sm:$0xff] }
  0xaa   :  { %1201 = vmatprep.mubr.bf16.mxu0 %v4503_v56  ;;  %v4098_v56 = vpack.c.bf16 %v1638_v55, %v1637_v54  ;;  %v4654_v54 = vld [vmem:[%s6137_s0 + $0x38c] ss:$16 sps:$4 sm:$0xff]  }
  0xac   :  { %4099 = vmatprep.subr.bf16.mxu1 %v4098_v56 }
  0xad   :  { %4101 = vmatpush3.bf16.msra.mxu1 %v4098_v56 }
  0xb1   :  { %1202 = vmatmul.mubr.bf16.gmra.mrb[56].mxu0 %v4505_v58  ;;  %v1640_v58 = vld [vmem:[%s6138_s2 + $0x28] sm:$0xff] }
  0xb2   :  { %1209 = vmatprep.mubr.bf16.mxu0 %v4507_v59  ;;  %v4102_v59 = vpack.c.bf16 %v1640_v58, %v1639_v57  ;;  %v4656_v58 = vld [vmem:[%s6137_s0 + $0x388] ss:$16 sps:$4 sm:$0xff]  }
  0xb4   :  { %4103 = vmatprep.subr.bf16.mxu1 %v4102_v59 }
  0xb5   :  { %4105 = vmatpush3.bf16.msra.mxu1 %v4102_v59 }
  0xb9   :  { %1210 = vmatmul.mubr.bf16.gmra.mrb[60].mxu0 %v4509_v62  ;;  %v1641_v62 = vld [vmem:[%s6138_s2 + $0x30] sm:$0xff] }
  0xba   :  { %1217 = vmatprep.mubr.bf16.mxu0 %v4510_v63  ;;  %v1642_v63 = vld [vmem:[%s6138_s2 + $0x38] sm:$0xff] }
  0xbb   :  { %v4106_v1 = vpack.c.bf16 %v1642_v63, %v1641_v62 }
  0xbd   :  { %4107 = vmatprep.subr.bf16.mxu1 %v4106_v1 }
  0xbe   :  { %4109 = vmatpush3.bf16.msra.mxu1 %v4106_v1  ;;  %v4659_v1 = vld [vmem:[%s6137_s0 + $0x3a8] ss:$16 sps:$4 sm:$0xff]  }
  0xc1   :  { %1218 = vmatmul.mubr.bf16.gmra.mrb[64].mxu0 %v4512_v3  ;;  %v1644_v3 = vld [vmem:[%s6138_s2 + $0x48] sm:$0xff] }
  0xc2   :  { %1225 = vmatprep.mubr.bf16.mxu0 %v4514_v4  ;;  %v4110_v4 = vpack.c.bf16 %v1644_v3, %v1643_v2  ;;  %v4660_v3 = vld [vmem:[%s6137_s0 + $0x3cc] ss:$16 sps:$4 sm:$0xff]  }
  0xc4   :  { %4111 = vmatprep.subr.bf16.mxu1 %v4110_v4 }
  0xc5   :  { %4113 = vmatpush3.bf16.msra.mxu1 %v4110_v4 }
  0xc9   :  { %1226 = vmatmul.mubr.bf16.gmra.mrb[68].mxu0 %v4516_v5  ;;  %v4599_v5 = vld [vmem:[%s6137_s0 + $0x128] ss:$16 sps:$4 sm:$0xff]  }
  0xca   :  { %1233 = vmatprep.mubr.bf16.mxu0 %v4517_v6  ;;  %v4600_v6 = vld [vmem:[%s6137_s0 + $0x14c] ss:$16 sps:$4 sm:$0xff]  }
  0xd1   :  { %1234 = vmatmul.mubr.bf16.gmra.mrb[72].mxu0 %v4519_v7  ;;  %v1645_v7 = vld [vmem:[%s6138_s2 + $0x50] sm:$0xff] }
  0xd2   :  { %1241 = vmatprep.mubr.bf16.mxu0 %v4521_v8  ;;  %v1646_v8 = vld [vmem:[%s6138_s2 + $0x58] sm:$0xff] }
  0xd9   :  { %1242 = vmatmul.mubr.bf16.gmra.mrb[76].mxu0 %v4523_v9  ;;  %v4114_v9 = vpack.c.bf16 %v1646_v8, %v1645_v7  ;;  %v4662_v7 = vld [vmem:[%s6137_s0 + $0x3c8] ss:$16 sps:$4 sm:$0xff]  }
  0xda   :  { %1249 = vmatprep.mubr.bf16.mxu0 %v4524_v10  ;;  %v1647_v10 = vld [vmem:[%s6138_s2 + $0x60] sm:$0xff] }
  0xdb   :  { %4115 = vmatprep.subr.bf16.mxu1 %v4114_v9 }
  0xdc   :  { %4117 = vmatpush3.bf16.msra.mxu1 %v4114_v9  ;;  %v4663_v9 = vld [vmem:[%s6137_s0 + $0x3ec] ss:$16 sps:$4 sm:$0xff]  }
  0xe1   :  { %1250 = vmatmul.mubr.bf16.gmra.mrb[80].mxu0 %v4526_v11  ;;  %v1648_v11 = vld [vmem:[%s6138_s2 + $0x68] sm:$0xff] }
  0xe2   :  { %1257 = vmatprep.mubr.bf16.mxu0 %v4528_v12  ;;  %v4118_v12 = vpack.c.bf16 %v1648_v11, %v1647_v10 }
  0xe4   :  { %4119 = vmatprep.subr.bf16.mxu1 %v4118_v12 }
  0xe5   :  { %4121 = vmatpush3.bf16.msra.mxu1 %v4118_v12 }
  0xe9   :  { %1258 = vmatmul.mubr.bf16.gmra.mrb[84].mxu0 %v4530_v13  ;;  %v4602_v13 = vld [vmem:[%s6137_s0 + $0x148] ss:$16 sps:$4 sm:$0xff]  }
  0xea   :  { %1265 = vmatprep.mubr.bf16.mxu0 %v4531_v14  ;;  %v4603_v14 = vld [vmem:[%s6137_s0 + $0x16c] ss:$16 sps:$4 sm:$0xff]  }
  0xf1   :  { %1266 = vmatmul.mubr.bf16.gmra.mrb[88].mxu0 %v4533_v15  ;;  %v1649_v15 = vld [vmem:[%s6138_s2 + $0x70] sm:$0xff] }
  0xf2   :  { %1273 = vmatprep.mubr.bf16.mxu0 %v4535_v16  ;;  %v1650_v16 = vld [vmem:[%s6138_s2 + $0x78] sm:$0xff] }
  0xf9   :  { %1274 = vmatmul.mubr.bf16.gmra.mrb[92].mxu0 %v4537_v17  ;;  %v4122_v17 = vpack.c.bf16 %v1650_v16, %v1649_v15 }
  0xfa   :  { %1281 = vmatprep.mubr.bf16.mxu0 %v4538_v18  ;;  %v4605_v18 = vld [vmem:[%s6137_s0 + $0x168] ss:$16 sps:$4 sm:$0xff]  }
  0xfb   :  { %4123 = vmatprep.subr.bf16.mxu1 %v4122_v17 }
  0xfc   :  { %4125 = vmatpush3.bf16.msra.mxu1 %v4122_v17 }
  0xfd   :  { %2139 = vmatprep.subr.bf16.mxu1 %v4798_v0 }
 0x101   :  { %1282 = vmatmul.mubr.bf16.gmra.mrb[96].mxu0 %v4540_v19  ;;  %v4606_v19 = vld [vmem:[%s6137_s0 + $0x18c] ss:$16 sps:$4 sm:$0xff]  }
 0x102   :  { %1289 = vmatprep.mubr.bf16.mxu0 %v4542_v20  ;;  %v4608_v20 = vld [vmem:[%s6137_s0 + $0x188] ss:$16 sps:$4 sm:$0xff]  }
 0x109   :  { %1290 = vmatmul.mubr.bf16.gmra.mrb[100].mxu0 %v4544_v21  ;;  %v4609_v21 = vld [vmem:[%s6137_s0 + $0x1ac] ss:$16 sps:$4 sm:$0xff]  }
 0x10a   :  { %1297 = vmatprep.mubr.bf16.mxu0 %v4545_v22  ;;  %v4611_v22 = vld [vmem:[%s6137_s0 + $0x1a8] ss:$16 sps:$4 sm:$0xff]  }
 0x111   :  { %1298 = vmatmul.mubr.bf16.gmra.mrb[104].mxu0 %v4547_v23  ;;  %v4612_v23 = vld [vmem:[%s6137_s0 + $0x1cc] ss:$16 sps:$4 sm:$0xff]  }
 0x112   :  { %1305 = vmatprep.mubr.bf16.mxu0 %v4549_v24  ;;  %v4614_v24 = vld [vmem:[%s6137_s0 + $0x1c8] ss:$16 sps:$4 sm:$0xff]  }
 0x119   :  { %1306 = vmatmul.mubr.bf16.gmra.mrb[108].mxu0 %v4551_v25  ;;  %v4615_v25 = vld [vmem:[%s6137_s0 + $0x1ec] ss:$16 sps:$4 sm:$0xff]  }
 0x11a   :  { %1313 = vmatprep.mubr.bf16.mxu0 %v4552_v26  ;;  %v4617_v26 = vld [vmem:[%s6137_s0 + $0x1e8] ss:$16 sps:$4 sm:$0xff]  }
 0x121   :  { %1314 = vmatmul.mubr.bf16.gmra.mrb[112].mxu0 %v4554_v27  ;;  %v4618_v27 = vld [vmem:[%s6137_s0 + $0x20c] ss:$16 sps:$4 sm:$0xff]  }
 0x122   :  { %1321 = vmatprep.mubr.bf16.mxu0 %v4556_v28  ;;  %v4620_v28 = vld [vmem:[%s6137_s0 + $0x208] ss:$16 sps:$4 sm:$0xff]  }
 0x129   :  { %1322 = vmatmul.mubr.bf16.gmra.mrb[116].mxu0 %v4558_v29  ;;  %v4621_v29 = vld [vmem:[%s6137_s0 + $0x22c] ss:$16 sps:$4 sm:$0xff]  }
 0x12a   :  { %1329 = vmatprep.mubr.bf16.mxu0 %v4560_v30  ;;  %v4623_v30 = vld [vmem:[%s6137_s0 + $0x228] ss:$16 sps:$4 sm:$0xff]  }
 0x131   :  { %1330 = vmatmul.mubr.bf16.gmra.mrb[120].mxu0 %v4562_v31  ;;  %v4624_v31 = vld [vmem:[%s6137_s0 + $0x24c] ss:$16 sps:$4 sm:$0xff]  }
 0x132   :  { %1337 = vmatprep.mubr.bf16.mxu0 %v4565_v32  ;;  %v4626_v32 = vld [vmem:[%s6137_s0 + $0x248] ss:$16 sps:$4 sm:$0xff]  }
 0x139   :  { %1338 = vmatmul.mubr.bf16.gmra.mrb[124].mxu0 %v4567_v33  ;;  %v4627_v33 = vld [vmem:[%s6137_s0 + $0x26c] ss:$16 sps:$4 sm:$0xff]  }
 0x13a   :  { %1378 = vmatprep.mubr.bf16.mxu0 %v4572_v34  ;;  %v4629_v34 = vld [vmem:[%s6137_s0 + $0x268] ss:$16 sps:$4 sm:$0xff]  }
 0x141   :  { %1379 = vmatmul.mubr.bf16.vlgmr.msra.gmra.mrb[0].mxu0 %v4570_v35  ;;  %v4630_v35 = vld [vmem:[%s6137_s0 + $0x28c] ss:$16 sps:$4 sm:$0xff]  }
 0x142   :  { %1386 = vmatprep.mubr.bf16.mxu0 %v4573_v36  ;;  %v4632_v36 = vld [vmem:[%s6137_s0 + $0x288] ss:$16 sps:$4 sm:$0xff]  }
 0x149   :  { %1387 = vmatmul.mubr.bf16.gmra.mrb[4].mxu0 %v4575_v37  ;;  %v4633_v37 = vld [vmem:[%s6137_s0 + $0x2ac] ss:$16 sps:$4 sm:$0xff]  }
 0x14a   :  { %1394 = vmatprep.mubr.bf16.mxu0 %v4576_v38  ;;  %v4635_v38 = vld [vmem:[%s6137_s0 + $0x2a8] ss:$16 sps:$4 sm:$0xff]  }
 0x151   :  { %1395 = vmatmul.mubr.bf16.gmra.mrb[8].mxu0 %v4578_v39  ;;  %v4636_v39 = vld [vmem:[%s6137_s0 + $0x2cc] ss:$16 sps:$4 sm:$0xff]  }
 0x152   :  { %1402 = vmatprep.mubr.bf16.mxu0 %v4579_v40  ;;  %v4638_v40 = vld [vmem:[%s6137_s0 + $0x2c8] ss:$16 sps:$4 sm:$0xff]  }
 0x159   :  { %1403 = vmatmul.mubr.bf16.gmra.mrb[12].mxu0 %v4581_v41  ;;  %v4639_v41 = vld [vmem:[%s6137_s0 + $0x2ec] ss:$16 sps:$4 sm:$0xff]  }
 0x15a   :  { %1410 = vmatprep.mubr.bf16.mxu0 %v4582_v42  ;;  %v4641_v42 = vld [vmem:[%s6137_s0 + $0x2e8] ss:$16 sps:$4 sm:$0xff]  }
 0x161   :  { %1411 = vmatmul.mubr.bf16.gmra.mrb[16].mxu0 %v4584_v43  ;;  %v4642_v43 = vld [vmem:[%s6137_s0 + $0x30c] ss:$16 sps:$4 sm:$0xff]  }
 0x162   :  { %1418 = vmatprep.mubr.bf16.mxu0 %v4585_v44  ;;  %v4644_v44 = vld [vmem:[%s6137_s0 + $0x308] ss:$16 sps:$4 sm:$0xff]  }
 0x169   :  { %1419 = vmatmul.mubr.bf16.gmra.mrb[20].mxu0 %v4587_v45  ;;  %v4645_v45 = vld [vmem:[%s6137_s0 + $0x32c] ss:$16 sps:$4 sm:$0xff]  }
 0x16a   :  { %1426 = vmatprep.mubr.bf16.mxu0 %v4588_v46  ;;  %v4647_v46 = vld [vmem:[%s6137_s0 + $0x328] ss:$16 sps:$4 sm:$0xff]  }
 0x171   :  { %1427 = vmatmul.mubr.bf16.gmra.mrb[24].mxu0 %v4590_v47  ;;  %v4648_v47 = vld [vmem:[%s6137_s0 + $0x34c] ss:$16 sps:$4 sm:$0xff]  }
 0x172   :  { %1434 = vmatprep.mubr.bf16.mxu0 %v4591_v48  ;;  %v4650_v48 = vld [vmem:[%s6137_s0 + $0x348] ss:$16 sps:$4 sm:$0xff]  }
 0x179   :  { %1435 = vmatmul.mubr.bf16.gmra.mrb[28].mxu0 %v4593_v52  ;;  %v4653_v52 = vld [vmem:[%s6137_s0 + $0x368] ss:$16 sps:$4 sm:$0xff]  }
 0x17a   :  { %1442 = vmatprep.mubr.bf16.mxu0 %v4594_v53 }
 0x181   :  { %1443 = vmatmul.mubr.bf16.gmra.mrb[32].mxu0 %v4596_v60  ;;  %v4657_v60 = vld [vmem:[%s6137_s0 + $0x3ac] ss:$16 sps:$4 sm:$0xff]  }
 0x182   :  { %1450 = vmatprep.mubr.bf16.mxu0 %v4597_v61 }
 0x189   :  { %1451 = vmatmul.mubr.bf16.gmra.mrb[36].mxu0 %v4599_v5 }
 0x18a   :  { %1458 = vmatprep.mubr.bf16.mxu0 %v4600_v6 }
 0x191   :  { %1459 = vmatmul.mubr.bf16.gmra.mrb[40].mxu0 %v4602_v13  ;;  %v4665_v13 = vld [vmem:[%s6137_s0 + $0x3e8] ss:$16 sps:$4 sm:$0xff]  }
 0x192   :  { %1466 = vmatprep.mubr.bf16.mxu0 %v4603_v14 }
 0x199   :  { %1467 = vmatmul.mubr.bf16.gmra.mrb[44].mxu0 %v4605_v18 }
 0x19a   :  { %1474 = vmatprep.mubr.bf16.mxu0 %v4606_v19 }
 0x1a1   :  { %1475 = vmatmul.mubr.bf16.gmra.mrb[48].mxu0 %v4608_v20 }
 0x1a2   :  { %1482 = vmatprep.mubr.bf16.mxu0 %v4609_v21 }
 0x1a9   :  { %1483 = vmatmul.mubr.bf16.gmra.mrb[52].mxu0 %v4611_v22 }
 0x1aa   :  { %1490 = vmatprep.mubr.bf16.mxu0 %v4612_v23 }
 0x1b1   :  { %1491 = vmatmul.mubr.bf16.gmra.mrb[56].mxu0 %v4614_v24 }
 0x1b2   :  { %1498 = vmatprep.mubr.bf16.mxu0 %v4615_v25 }
 0x1b9   :  { %1499 = vmatmul.mubr.bf16.gmra.mrb[60].mxu0 %v4617_v26 }
 0x1ba   :  { %1506 = vmatprep.mubr.bf16.mxu0 %v4618_v27 }
 0x1c1   :  { %1507 = vmatmul.mubr.bf16.gmra.mrb[64].mxu0 %v4620_v28 }
 0x1c2   :  { %1514 = vmatprep.mubr.bf16.mxu0 %v4621_v29 }
 0x1c9   :  { %1515 = vmatmul.mubr.bf16.gmra.mrb[68].mxu0 %v4623_v30 }
 0x1ca   :  { %1522 = vmatprep.mubr.bf16.mxu0 %v4624_v31 }
 0x1d1   :  { %1523 = vmatmul.mubr.bf16.gmra.mrb[72].mxu0 %v4626_v32 }
 0x1d2   :  { %1530 = vmatprep.mubr.bf16.mxu0 %v4627_v33 }
 0x1d9   :  { %1531 = vmatmul.mubr.bf16.gmra.mrb[76].mxu0 %v4629_v34 }
 0x1da   :  { %1538 = vmatprep.mubr.bf16.mxu0 %v4630_v35 }
 0x1e1   :  { %1539 = vmatmul.mubr.bf16.gmra.mrb[80].mxu0 %v4632_v36 }
 0x1e2   :  { %1546 = vmatprep.mubr.bf16.mxu0 %v4633_v37 }
 0x1e9   :  { %1547 = vmatmul.mubr.bf16.gmra.mrb[84].mxu0 %v4635_v38 }
 0x1ea   :  { %1554 = vmatprep.mubr.bf16.mxu0 %v4636_v39 }
 0x1f1   :  { %1555 = vmatmul.mubr.bf16.gmra.mrb[88].mxu0 %v4638_v40 }
 0x1f2   :  { %1562 = vmatprep.mubr.bf16.mxu0 %v4639_v41 }
 0x1f9   :  { %1563 = vmatmul.mubr.bf16.gmra.mrb[92].mxu0 %v4641_v42 }
 0x1fa   :  { %1570 = vmatprep.mubr.bf16.mxu0 %v4642_v43 }
 0x201   :  { %1571 = vmatmul.mubr.bf16.gmra.mrb[96].mxu0 %v4644_v44 }
 0x202   :  { %1578 = vmatprep.mubr.bf16.mxu0 %v4645_v45 }
 0x209   :  { %1579 = vmatmul.mubr.bf16.gmra.mrb[100].mxu0 %v4647_v46 }
 0x20a   :  { %1586 = vmatprep.mubr.bf16.mxu0 %v4648_v47 }
 0x211   :  { %1587 = vmatmul.mubr.bf16.gmra.mrb[104].mxu0 %v4650_v48 }
 0x212   :  { %1594 = vmatprep.mubr.bf16.mxu0 %v4651_v49 }
 0x214   :  { %v1380_v50 = vpop.f32.mrb[0].mxu0 }
 0x215   :  { %v1382_v51 = vpop.f32.mrb[1].mxu0  ;;  %3835 = vmatprep.mubr.f32.mxu1 %v1380_v50 }
 0x216   :  { %v1383_v53 = vpop.f32.mrb[2].mxu0 }
 0x217   :  { %v1385_v55 = vpop.f32.mrb[3].mxu0  ;;  %3836 = vmatmul.mubr.f32.vlgmr.msra.gmra.mrb[0].mxu1 %v1383_v53 }
 0x219   :  { %1595 = vmatmul.mubr.bf16.gmra.mrb[108].mxu0 %v4653_v52 }
 0x21a   :  { %1602 = vmatprep.mubr.bf16.mxu0 %v4654_v54 }
 0x21c   :  { %v1388_v56 = vpop.f32.mrb[4].mxu0 }
 0x21d   :  { %v1390_v57 = vpop.f32.mrb[5].mxu0  ;;  %3838 = vmatprep.mubr.f32.mxu1 %v1388_v56 }
 0x21e   :  { %v1391_v59 = vpop.f32.mrb[6].mxu0 }
 0x21f   :  { %v1393_v61 = vpop.f32.mrb[7].mxu0  ;;  %3839 = vmatmul.mubr.f32.gmra.mrb[2].mxu1 %v1391_v59 }
 0x221   :  { %1603 = vmatmul.mubr.bf16.gmra.mrb[112].mxu0 %v4656_v58 }
 0x222   :  { %1610 = vmatprep.mubr.bf16.mxu0 %v4657_v60 }
 0x224   :  { %v1396_v62 = vpop.f32.mrb[8].mxu0 }
 0x225   :  { %v1398_v63 = vpop.f32.mrb[9].mxu0  ;;  %3841 = vmatprep.mubr.f32.mxu1 %v1396_v62 }
 0x226   :  { %v1399_v2 = vpop.f32.mrb[10].mxu0 }
 0x227   :  { %v1401_v4 = vpop.f32.mrb[11].mxu0  ;;  %3842 = vmatmul.mubr.f32.gmra.mrb[4].mxu1 %v1399_v2 }
 0x229   :  { %1611 = vmatmul.mubr.bf16.gmra.mrb[116].mxu0 %v4659_v1 }
 0x22a   :  { %1618 = vmatprep.mubr.bf16.mxu0 %v4660_v3 }
 0x22c   :  { %v1404_v5 = vpop.f32.mrb[12].mxu0 }
 0x22d   :  { %v1406_v6 = vpop.f32.mrb[13].mxu0  ;;  %3844 = vmatprep.mubr.f32.mxu1 %v1404_v5 }
 0x22e   :  { %v1407_v8 = vpop.f32.mrb[14].mxu0 }
 0x22f   :  { %v1409_v10 = vpop.f32.mrb[15].mxu0  ;;  %3845 = vmatmul.mubr.f32.gmra.mrb[6].mxu1 %v1407_v8 }
 0x231   :  { %1619 = vmatmul.mubr.bf16.gmra.mrb[120].mxu0 %v4662_v7 }
 0x232   :  { %1626 = vmatprep.mubr.bf16.mxu0 %v4663_v9 }
 0x234   :  { %v1412_v11 = vpop.f32.mrb[16].mxu0 }
 0x235   :  { %v1414_v12 = vpop.f32.mrb[17].mxu0  ;;  %3847 = vmatprep.mubr.f32.mxu1 %v1412_v11 }
 0x236   :  { %v1415_v14 = vpop.f32.mrb[18].mxu0 }
 0x237   :  { %v1417_v15 = vpop.f32.mrb[19].mxu0  ;;  %3848 = vmatmul.mubr.f32.gmra.mrb[8].mxu1 %v1415_v14 }
 0x239   :  { %1627 = vmatmul.mubr.bf16.gmra.mrb[124].mxu0 %v4665_v13 }
 0x23c   :  { %v1420_v16 = vpop.f32.mrb[20].mxu0 }
 0x23d   :  { %v1422_v17 = vpop.f32.mrb[21].mxu0  ;;  %3850 = vmatprep.mubr.f32.mxu1 %v1420_v16 }
 0x23e   :  { %v1423_v18 = vpop.f32.mrb[22].mxu0 }
 0x23f   :  { %v1425_v19 = vpop.f32.mrb[23].mxu0  ;;  %3851 = vmatmul.mubr.f32.gmra.mrb[10].mxu1 %v1423_v18 }
 0x244   :  { %v1428_v20 = vpop.f32.mrb[24].mxu0 }
 0x245   :  { %v1430_v21 = vpop.f32.mrb[25].mxu0  ;;  %3853 = vmatprep.mubr.f32.mxu1 %v1428_v20 }
 0x246   :  { %v1431_v22 = vpop.f32.mrb[26].mxu0 }
 0x247   :  { %v1433_v23 = vpop.f32.mrb[27].mxu0  ;;  %3854 = vmatmul.mubr.f32.gmra.mrb[12].mxu1 %v1431_v22 }
 0x24c   :  { %v1436_v24 = vpop.f32.mrb[28].mxu0 }
 0x24d   :  { %v1438_v25 = vpop.f32.mrb[29].mxu0  ;;  %3856 = vmatprep.mubr.f32.mxu1 %v1436_v24 }
 0x24e   :  { %v1439_v26 = vpop.f32.mrb[30].mxu0 }
 0x24f   :  { %v1441_v27 = vpop.f32.mrb[31].mxu0  ;;  %3857 = vmatmul.mubr.f32.gmra.mrb[14].mxu1 %v1439_v26 }
 0x254   :  { %v1444_v28 = vpop.f32.mrb[32].mxu0 }
 0x255   :  { %v1446_v29 = vpop.f32.mrb[33].mxu0  ;;  %3859 = vmatprep.mubr.f32.mxu1 %v1444_v28 }
 0x256   :  { %v1447_v30 = vpop.f32.mrb[34].mxu0 }
 0x257   :  { %v1449_v31 = vpop.f32.mrb[35].mxu0  ;;  %3860 = vmatmul.mubr.f32.gmra.mrb[16].mxu1 %v1447_v30 }
 0x25c   :  { %v1452_v32 = vpop.f32.mrb[36].mxu0 }
 0x25d   :  { %v1454_v33 = vpop.f32.mrb[37].mxu0  ;;  %3862 = vmatprep.mubr.f32.mxu1 %v1452_v32 }
 0x25e   :  { %v1455_v34 = vpop.f32.mrb[38].mxu0 }
 0x25f   :  { %v1457_v35 = vpop.f32.mrb[39].mxu0  ;;  %3863 = vmatmul.mubr.f32.gmra.mrb[18].mxu1 %v1455_v34 }
 0x264   :  { %v1460_v36 = vpop.f32.mrb[40].mxu0 }
 0x265   :  { %v1462_v37 = vpop.f32.mrb[41].mxu0  ;;  %3865 = vmatprep.mubr.f32.mxu1 %v1460_v36 }
 0x266   :  { %v1463_v38 = vpop.f32.mrb[42].mxu0 }
 0x267   :  { %v1465_v39 = vpop.f32.mrb[43].mxu0  ;;  %3866 = vmatmul.mubr.f32.gmra.mrb[20].mxu1 %v1463_v38 }
 0x26c   :  { %v1468_v40 = vpop.f32.mrb[44].mxu0 }
 0x26d   :  { %v1470_v41 = vpop.f32.mrb[45].mxu0  ;;  %3868 = vmatprep.mubr.f32.mxu1 %v1468_v40 }
 0x26e   :  { %v1471_v42 = vpop.f32.mrb[46].mxu0  ;;  %v5416_v41 = vld [vmem:[%s6139_s3] ss:$0 sm:$0xff] }
 0x26f   :  { %v1473_v43 = vpop.f32.mrb[47].mxu0  ;;  %3869 = vmatmul.mubr.f32.gmra.mrb[22].mxu1 %v1471_v42 }
 0x274   :  { %v1476_v44 = vpop.f32.mrb[48].mxu0 }
 0x275   :  { %v1478_v45 = vpop.f32.mrb[49].mxu0  ;;  %3871 = vmatprep.mubr.f32.mxu1 %v1476_v44 }
 0x276   :  { %v1479_v46 = vpop.f32.mrb[50].mxu0 }
 0x277   :  { %v1481_v47 = vpop.f32.mrb[51].mxu0  ;;  %3872 = vmatmul.mubr.f32.gmra.mrb[24].mxu1 %v1479_v46 }
 0x27c   :  { %v1484_v48 = vpop.f32.mrb[52].mxu0 }
 0x27d   :  { %v1486_v49 = vpop.f32.mrb[53].mxu0  ;;  %3874 = vmatprep.mubr.f32.mxu1 %v1484_v48 }
 0x27e   :  { %v1487_v50 = vpop.f32.mrb[54].mxu0 }
 0x27f   :  { %v1489_v51 = vpop.f32.mrb[55].mxu0  ;;  %3875 = vmatmul.mubr.f32.gmra.mrb[26].mxu1 %v1487_v50 }
 0x284   :  { %v1492_v52 = vpop.f32.mrb[56].mxu0 }
 0x285   :  { %v1494_v53 = vpop.f32.mrb[57].mxu0  ;;  %3877 = vmatprep.mubr.f32.mxu1 %v1492_v52 }
 0x286   :  { %v1495_v54 = vpop.f32.mrb[58].mxu0 }
 0x287   :  { %v1497_v55 = vpop.f32.mrb[59].mxu0  ;;  %3878 = vmatmul.mubr.f32.gmra.mrb[28].mxu1 %v1495_v54 }
 0x28c   :  { %v1500_v56 = vpop.f32.mrb[60].mxu0 }
 0x28d   :  { %v1502_v57 = vpop.f32.mrb[61].mxu0  ;;  %3880 = vmatprep.mubr.f32.mxu1 %v1500_v56 }
 0x28e   :  { %v1503_v58 = vpop.f32.mrb[62].mxu0 }
 0x28f   :  { %v1505_v59 = vpop.f32.mrb[63].mxu0  ;;  %3881 = vmatmul.mubr.f32.gmra.mrb[30].mxu1 %v1503_v58 }
 0x294   :  { %v1508_v60 = vpop.f32.mrb[64].mxu0 }
 0x295   :  { %v1510_v61 = vpop.f32.mrb[65].mxu0  ;;  %3883 = vmatprep.mubr.f32.mxu1 %v1508_v60 }
 0x296   :  { %v1511_v62 = vpop.f32.mrb[66].mxu0 }
 0x297   :  { %v1513_v63 = vpop.f32.mrb[67].mxu0  ;;  %3884 = vmatmul.mubr.f32.gmra.mrb[32].mxu1 %v1511_v62 }
 0x29c   :  { %v1516_v1 = vpop.f32.mrb[68].mxu0 }
 0x29d   :  { %v1518_v2 = vpop.f32.mrb[69].mxu0  ;;  %3886 = vmatprep.mubr.f32.mxu1 %v1516_v1 }
 0x29e   :  { %v1519_v3 = vpop.f32.mrb[70].mxu0 }
 0x29f   :  { %v1521_v4 = vpop.f32.mrb[71].mxu0  ;;  %3887 = vmatmul.mubr.f32.gmra.mrb[34].mxu1 %v1519_v3 }
 0x2a4   :  { %v1524_v5 = vpop.f32.mrb[72].mxu0 }
 0x2a5   :  { %v1526_v6 = vpop.f32.mrb[73].mxu0  ;;  %3889 = vmatprep.mubr.f32.mxu1 %v1524_v5 }
 0x2a6   :  { %v1527_v7 = vpop.f32.mrb[74].mxu0 }
 0x2a7   :  { %v1529_v8 = vpop.f32.mrb[75].mxu0  ;;  %3890 = vmatmul.mubr.f32.gmra.mrb[36].mxu1 %v1527_v7 }
 0x2ac   :  { %v1532_v9 = vpop.f32.mrb[76].mxu0 }
 0x2ad   :  { %v1534_v10 = vpop.f32.mrb[77].mxu0  ;;  %3892 = vmatprep.mubr.f32.mxu1 %v1532_v9 }
 0x2ae   :  { %v1535_v11 = vpop.f32.mrb[78].mxu0 }
 0x2af   :  { %v1537_v12 = vpop.f32.mrb[79].mxu0  ;;  %3893 = vmatmul.mubr.f32.gmra.mrb[38].mxu1 %v1535_v11 }
 0x2b4   :  { %v1540_v13 = vpop.f32.mrb[80].mxu0 }
 0x2b5   :  { %v1542_v14 = vpop.f32.mrb[81].mxu0  ;;  %3895 = vmatprep.mubr.f32.mxu1 %v1540_v13 }
 0x2b6   :  { %v1543_v15 = vpop.f32.mrb[82].mxu0 }
 0x2b7   :  { %v1545_v16 = vpop.f32.mrb[83].mxu0  ;;  %3896 = vmatmul.mubr.f32.gmra.mrb[40].mxu1 %v1543_v15 }
 0x2bc   :  { %v1548_v17 = vpop.f32.mrb[84].mxu0 }
 0x2bd   :  { %v1550_v18 = vpop.f32.mrb[85].mxu0  ;;  %3898 = vmatprep.mubr.f32.mxu1 %v1548_v17 }
 0x2be   :  { %v1551_v19 = vpop.f32.mrb[86].mxu0 }
 0x2bf   :  { %v1553_v20 = vpop.f32.mrb[87].mxu0  ;;  %3899 = vmatmul.mubr.f32.gmra.mrb[42].mxu1 %v1551_v19 }
 0x2c4   :  { %v1556_v21 = vpop.f32.mrb[88].mxu0 }
 0x2c5   :  { %v1558_v22 = vpop.f32.mrb[89].mxu0  ;;  %3901 = vmatprep.mubr.f32.mxu1 %v1556_v21 }
 0x2c6   :  { %v1559_v23 = vpop.f32.mrb[90].mxu0 }
 0x2c7   :  { %v1561_v24 = vpop.f32.mrb[91].mxu0  ;;  %3902 = vmatmul.mubr.f32.gmra.mrb[44].mxu1 %v1559_v23 }
 0x2cc   :  { %v1564_v25 = vpop.f32.mrb[92].mxu0 }
 0x2cd   :  { %v1566_v26 = vpop.f32.mrb[93].mxu0  ;;  %3904 = vmatprep.mubr.f32.mxu1 %v1564_v25 }
 0x2ce   :  { %v1567_v27 = vpop.f32.mrb[94].mxu0 }
 0x2cf   :  { %v1569_v28 = vpop.f32.mrb[95].mxu0  ;;  %3905 = vmatmul.mubr.f32.gmra.mrb[46].mxu1 %v1567_v27 }
 0x2d4   :  { %v1572_v29 = vpop.f32.mrb[96].mxu0 }
 0x2d5   :  { %v1574_v30 = vpop.f32.mrb[97].mxu0  ;;  %3907 = vmatprep.mubr.f32.mxu1 %v1572_v29 }
 0x2d6   :  { %v1575_v31 = vpop.f32.mrb[98].mxu0 }
 0x2d7   :  { %v1577_v32 = vpop.f32.mrb[99].mxu0  ;;  %3908 = vmatmul.mubr.f32.gmra.mrb[48].mxu1 %v1575_v31 }
 0x2dc   :  { %v1580_v33 = vpop.f32.mrb[100].mxu0 }
 0x2dd   :  { %v1582_v34 = vpop.f32.mrb[101].mxu0  ;;  %3910 = vmatprep.mubr.f32.mxu1 %v1580_v33 }
 0x2de   :  { %v1583_v35 = vpop.f32.mrb[102].mxu0  ;;  %v4670_v34 = vld [vmem:[%s6137_s0 + $0x4] ss:$16 sps:$4 sm:$0xff]  }
 0x2df   :  { %v1585_v36 = vpop.f32.mrb[103].mxu0  ;;  %3911 = vmatmul.mubr.f32.gmra.mrb[50].mxu1 %v1583_v35 }
 0x2e4   :  { %v1588_v37 = vpop.f32.mrb[104].mxu0 }
 0x2e5   :  { %v1590_v38 = vpop.f32.mrb[105].mxu0  ;;  %3913 = vmatprep.mubr.f32.mxu1 %v1588_v37 }
 0x2e6   :  { %v1591_v39 = vpop.f32.mrb[106].mxu0 }
 0x2e7   :  { %v1593_v40 = vpop.f32.mrb[107].mxu0  ;;  %3914 = vmatmul.mubr.f32.gmra.mrb[52].mxu1 %v1591_v39 }
 0x2ea   :  { %v3837_v42 = vpop.f32.mrb[0].mxu1 }
 0x2eb   :  { %v1730_v43 = vadd.f32 %v3837_v42, %v5416_v41  ;;  %v1724_v44 = vpop.f32.mrb[1].mxu1 }
 0x2ec   :  { %v1725_v45 = vadd.f32 %v5416_v41, %v1724_v44  ;;  %v1596_v46 = vpop.f32.mrb[108].mxu0 }
 0x2ed   :  { %v2044_v47 = vmax.f32 %v1730_v43, 0.0  ;;  %v1598_v48 = vpop.f32.mrb[109].mxu0  ;;  %3916 = vmatprep.mubr.f32.mxu1 %v1596_v46 }
 0x2ee   :  { %v2043_v49 = vmax.f32 %v1725_v45, 0.0  ;;  %v1599_v50 = vpop.f32.mrb[110].mxu0 }
 0x2ef   :  { %v1601_v51 = vpop.f32.mrb[111].mxu0  ;;  %3917 = vmatmul.mubr.f32.gmra.mrb[54].mxu1 %v1599_v50 }
 0x2f0   :  { %v2107_v52 = vpack.c.bf16 %v2044_v47, %v2043_v49 }
 0x2f2   :  { %v3840_v53 = vpop.f32.mrb[2].mxu1  ;;  %2140 = vmatpush1.bf16.msra.mxu1 %v2107_v52 }
 0x2f3   :  { %v1740_v54 = vadd.f32 %v3840_v53, %v5416_v41  ;;  %v1734_v55 = vpop.f32.mrb[3].mxu1  ;;  %2141 = vmatprep.subr.bf16.mxu1 %v4798_v0 }
 0x2f4   :  { %v1735_v56 = vadd.f32 %v5416_v41, %v1734_v55  ;;  %v1604_v57 = vpop.f32.mrb[112].mxu0 }
 0x2f5   :  { %v2046_v58 = vmax.f32 %v1740_v54, 0.0  ;;  %v1606_v59 = vpop.f32.mrb[113].mxu0  ;;  %3919 = vmatprep.mubr.f32.mxu1 %v1604_v57 }
 0x2f6   :  { %v2045_v60 = vmax.f32 %v1735_v56, 0.0  ;;  %v1607_v61 = vpop.f32.mrb[114].mxu0 }
 0x2f7   :  { %v1609_v62 = vpop.f32.mrb[115].mxu0  ;;  %3920 = vmatmul.mubr.f32.gmra.mrb[56].mxu1 %v1607_v61 }
 0x2f8   :  { %v2108_v63 = vpack.c.bf16 %v2046_v58, %v2045_v60 }
 0x2fa   :  { %v3843_v1 = vpop.f32.mrb[4].mxu1  ;;  %2142 = vmatpush1.bf16.msra.mxu1 %v2108_v63 }
 0x2fb   :  { %v1750_v2 = vadd.f32 %v3843_v1, %v5416_v41  ;;  %v1744_v3 = vpop.f32.mrb[5].mxu1  ;;  %2143 = vmatprep.subr.bf16.mxu1 %v4798_v0 }
 0x2fc   :  { %v1745_v4 = vadd.f32 %v5416_v41, %v1744_v3  ;;  %v1612_v5 = vpop.f32.mrb[116].mxu0 }
 0x2fd   :  { %v2048_v6 = vmax.f32 %v1750_v2, 0.0  ;;  %v1614_v7 = vpop.f32.mrb[117].mxu0  ;;  %3922 = vmatprep.mubr.f32.mxu1 %v1612_v5 }
 0x2fe   :  { %v2047_v8 = vmax.f32 %v1745_v4, 0.0  ;;  %v1615_v9 = vpop.f32.mrb[118].mxu0 }
 0x2ff   :  { %v1617_v10 = vpop.f32.mrb[119].mxu0  ;;  %3923 = vmatmul.mubr.f32.gmra.mrb[58].mxu1 %v1615_v9 }
 0x300   :  { %v2109_v11 = vpack.c.bf16 %v2048_v6, %v2047_v8 }
 0x302   :  { %v3846_v12 = vpop.f32.mrb[6].mxu1  ;;  %2144 = vmatpush1.bf16.msra.mxu1 %v2109_v11 }
 0x303   :  { %v1760_v13 = vadd.f32 %v3846_v12, %v5416_v41  ;;  %v1754_v14 = vpop.f32.mrb[7].mxu1  ;;  %2145 = vmatprep.subr.bf16.mxu1 %v4798_v0 }
 0x304   :  { %v1755_v15 = vadd.f32 %v5416_v41, %v1754_v14  ;;  %v1620_v16 = vpop.f32.mrb[120].mxu0 }
 0x305   :  { %v2050_v17 = vmax.f32 %v1760_v13, 0.0  ;;  %v1622_v18 = vpop.f32.mrb[121].mxu0  ;;  %3925 = vmatprep.mubr.f32.mxu1 %v1620_v16 }
 0x306   :  { %v2049_v19 = vmax.f32 %v1755_v15, 0.0  ;;  %v1623_v20 = vpop.f32.mrb[122].mxu0 }
 0x307   :  { %v1625_v21 = vpop.f32.mrb[123].mxu0  ;;  %3926 = vmatmul.mubr.f32.gmra.mrb[60].mxu1 %v1623_v20 }
 0x308   :  { %v2110_v22 = vpack.c.bf16 %v2050_v17, %v2049_v19 }
 0x30a   :  { %v3849_v23 = vpop.f32.mrb[8].mxu1  ;;  %2146 = vmatpush1.bf16.msra.mxu1 %v2110_v22 }
 0x30b   :  { %v1770_v24 = vadd.f32 %v3849_v23, %v5416_v41  ;;  %v1764_v25 = vpop.f32.mrb[9].mxu1  ;;  %2147 = vmatprep.subr.bf16.mxu1 %v4798_v0 }
 0x30c   :  { %v1765_v26 = vadd.f32 %v5416_v41, %v1764_v25  ;;  %v1628_v27 = vpop.f32.mrb[124].mxu0 }
 0x30d   :  { %v2052_v28 = vmax.f32 %v1770_v24, 0.0  ;;  %v1630_v29 = vpop.f32.mrb[125].mxu0  ;;  %3928 = vmatprep.mubr.f32.mxu1 %v1628_v27 }
 0x30e   :  { %v2051_v30 = vmax.f32 %v1765_v26, 0.0  ;;  %v1631_v31 = vpop.f32.mrb[126].mxu0 }
 0x30f   :  { %v1633_v32 = vpop.f32.mrb[127].mxu0  ;;  %3929 = vmatmul.mubr.f32.gmra.mrb[62].mxu1 %v1631_v31 }
 0x310   :  { %v2111_v33 = vpack.c.bf16 %v2052_v28, %v2051_v30  ;;  %2171 = vmatprep.mubr.bf16.mxu1 %v4670_v34 }
 0x312   :  { %v3852_v35 = vpop.f32.mrb[10].mxu1  ;;  %2148 = vmatpush1.bf16.msra.mxu1 %v2111_v33 }
 0x313   :  { %v1780_v36 = vadd.f32 %v3852_v35, %v5416_v41  ;;  %v1774_v37 = vpop.f32.mrb[11].mxu1  ;;  %2149 = vmatprep.subr.bf16.mxu1 %v4798_v0 }
 0x314   :  { %v1775_v38 = vadd.f32 %v5416_v41, %v1774_v37 }
 0x315   :  { %v2054_v39 = vmax.f32 %v1780_v36, 0.0 }
 0x316   :  { %v2053_v40 = vmax.f32 %v1775_v38, 0.0 }
 0x318   :  { %v2112_v42 = vpack.c.bf16 %v2054_v39, %v2053_v40 }
 0x31a   :  { %v3855_v43 = vpop.f32.mrb[12].mxu1  ;;  %2150 = vmatpush1.bf16.msra.mxu1 %v2112_v42 }
 0x31b   :  { %v1790_v44 = vadd.f32 %v3855_v43, %v5416_v41  ;;  %v1784_v45 = vpop.f32.mrb[13].mxu1  ;;  %2151 = vmatprep.subr.bf16.mxu1 %v4798_v0 }
 0x31c   :  { %v1785_v46 = vadd.f32 %v5416_v41, %v1784_v45 }
 0x31d   :  { %v2056_v47 = vmax.f32 %v1790_v44, 0.0 }
 0x31e   :  { %v2055_v48 = vmax.f32 %v1785_v46, 0.0 }
 0x320   :  { %v2113_v49 = vpack.c.bf16 %v2056_v47, %v2055_v48 }
 0x322   :  { %v3858_v50 = vpop.f32.mrb[14].mxu1  ;;  %2152 = vmatpush1.bf16.msra.mxu1 %v2113_v49 }
 0x323   :  { %v1800_v51 = vadd.f32 %v3858_v50, %v5416_v41  ;;  %v1794_v52 = vpop.f32.mrb[15].mxu1  ;;  %2153 = vmatprep.subr.bf16.mxu1 %v4798_v0 }
 0x324   :  { %v1795_v53 = vadd.f32 %v5416_v41, %v1794_v52 }
 0x325   :  { %v2058_v54 = vmax.f32 %v1800_v51, 0.0 }
 0x326   :  { %v2057_v55 = vmax.f32 %v1795_v53, 0.0 }
 0x328   :  { %v2114_v56 = vpack.c.bf16 %v2058_v54, %v2057_v55 }
 0x32a   :  { %v3861_v57 = vpop.f32.mrb[16].mxu1  ;;  %2154 = vmatpush1.bf16.msra.mxu1 %v2114_v56  ;;  %v4671_v56 = vld [vmem:[%s6137_s0] ss:$16 sps:$4 sm:$0xff]  }
 0x32b   :  { %v1810_v58 = vadd.f32 %v3861_v57, %v5416_v41  ;;  %v1804_v59 = vpop.f32.mrb[17].mxu1  ;;  %2155 = vmatprep.subr.bf16.mxu1 %v4798_v0 }
 0x32c   :  { %v1805_v60 = vadd.f32 %v5416_v41, %v1804_v59 }
 0x32d   :  { %v2060_v61 = vmax.f32 %v1810_v58, 0.0  ;;  %v4672_v58 = vld [vmem:[%s6137_s0 + $0x24] ss:$16 sps:$4 sm:$0xff]  }
 0x32e   :  { %v2059_v62 = vmax.f32 %v1805_v60, 0.0 }
 0x330   :  { %v2115_v63 = vpack.c.bf16 %v2060_v61, %v2059_v62 }
 0x332   :  { %v3864_v1 = vpop.f32.mrb[18].mxu1  ;;  %2156 = vmatpush1.bf16.msra.mxu1 %v2115_v63 }
 0x333   :  { %v1820_v2 = vadd.f32 %v3864_v1, %v5416_v41  ;;  %v1814_v3 = vpop.f32.mrb[19].mxu1  ;;  %2157 = vmatprep.subr.bf16.mxu1 %v4798_v0 }
 0x334   :  { %v1815_v4 = vadd.f32 %v5416_v41, %v1814_v3 }
 0x335   :  { %v2062_v5 = vmax.f32 %v1820_v2, 0.0  ;;  %v4673_v2 = vld [vmem:[%s6137_s0 + $0x20] ss:$16 sps:$4 sm:$0xff]  }
 0x336   :  { %v2061_v6 = vmax.f32 %v1815_v4, 0.0  ;;  %v4674_v4 = vld [vmem:[%s6137_s0 + $0x44] ss:$16 sps:$4 sm:$0xff]  }
 0x338   :  { %v2116_v7 = vpack.c.bf16 %v2062_v5, %v2061_v6 }
 0x33a   :  { %v3867_v8 = vpop.f32.mrb[20].mxu1  ;;  %2158 = vmatpush1.bf16.msra.mxu1 %v2116_v7 }
 0x33b   :  { %v1830_v9 = vadd.f32 %v3867_v8, %v5416_v41  ;;  %v1824_v10 = vpop.f32.mrb[21].mxu1  ;;  %2159 = vmatprep.subr.bf16.mxu1 %v4798_v0 }
 0x33c   :  { %v1825_v11 = vadd.f32 %v5416_v41, %v1824_v10 }
 0x33d   :  { %v2064_v12 = vmax.f32 %v1830_v9, 0.0 }
 0x33e   :  { %v2063_v13 = vmax.f32 %v1825_v11, 0.0  ;;  %v4675_v11 = vld [vmem:[%s6137_s0 + $0x40] ss:$16 sps:$4 sm:$0xff]  }
 0x340   :  { %v2117_v14 = vpack.c.bf16 %v2064_v12, %v2063_v13  ;;  %v4676_v13 = vld [vmem:[%s6137_s0 + $0x64] ss:$16 sps:$4 sm:$0xff]  }
 0x342   :  { %v3870_v15 = vpop.f32.mrb[22].mxu1  ;;  %2160 = vmatpush1.bf16.msra.mxu1 %v2117_v14 }
 0x343   :  { %v1840_v16 = vadd.f32 %v3870_v15, %v5416_v41  ;;  %v1834_v17 = vpop.f32.mrb[23].mxu1  ;;  %2161 = vmatprep.subr.bf16.mxu1 %v4798_v0 }
 0x344   :  { %v1835_v18 = vadd.f32 %v5416_v41, %v1834_v17 }
 0x345   :  { %v2066_v19 = vmax.f32 %v1840_v16, 0.0 }
 0x346   :  { %v2065_v20 = vmax.f32 %v1835_v18, 0.0 }
 0x348   :  { %v2118_v21 = vpack.c.bf16 %v2066_v19, %v2065_v20  ;;  %v4677_v20 = vld [vmem:[%s6137_s0 + $0x60] ss:$16 sps:$4 sm:$0xff]  }
 0x34a   :  { %v3873_v22 = vpop.f32.mrb[24].mxu1  ;;  %2162 = vmatpush1.bf16.msra.mxu1 %v2118_v21 }
 0x34b   :  { %v1850_v23 = vadd.f32 %v3873_v22, %v5416_v41  ;;  %v1844_v24 = vpop.f32.mrb[25].mxu1  ;;  %2163 = vmatprep.subr.bf16.mxu1 %v4798_v0  ;;  %v4678_v22 = vld [vmem:[%s6137_s0 + $0x84] ss:$16 sps:$4 sm:$0xff]  }
 0x34c   :  { %v1845_v25 = vadd.f32 %v5416_v41, %v1844_v24 }
 0x34d   :  { %v2068_v26 = vmax.f32 %v1850_v23, 0.0 }
 0x34e   :  { %v2067_v27 = vmax.f32 %v1845_v25, 0.0 }
 0x350   :  { %v2119_v28 = vpack.c.bf16 %v2068_v26, %v2067_v27 }
 0x352   :  { %v3876_v29 = vpop.f32.mrb[26].mxu1  ;;  %2164 = vmatpush1.bf16.msra.mxu1 %v2119_v28 }
 0x353   :  { %v1860_v30 = vadd.f32 %v3876_v29, %v5416_v41  ;;  %v1854_v31 = vpop.f32.mrb[27].mxu1  ;;  %2165 = vmatprep.subr.bf16.mxu1 %v4798_v0  ;;  %v4679_v29 = vld [vmem:[%s6137_s0 + $0x80] ss:$16 sps:$4 sm:$0xff]  }
 0x354   :  { %v1855_v32 = vadd.f32 %v5416_v41, %v1854_v31  ;;  %v4680_v31 = vld [vmem:[%s6137_s0 + $0xa4] ss:$16 sps:$4 sm:$0xff]  }
 0x355   :  { %v2070_v33 = vmax.f32 %v1860_v30, 0.0 }
 0x356   :  { %v2069_v34 = vmax.f32 %v1855_v32, 0.0 }
 0x358   :  { %v2120_v35 = vpack.c.bf16 %v2070_v33, %v2069_v34 }
 0x35a   :  { %v3879_v36 = vpop.f32.mrb[28].mxu1  ;;  %2166 = vmatpush1.bf16.msra.mxu1 %v2120_v35 }
 0x35b   :  { %v1870_v37 = vadd.f32 %v3879_v36, %v5416_v41  ;;  %v1864_v38 = vpop.f32.mrb[29].mxu1  ;;  %2167 = vmatprep.subr.bf16.mxu1 %v4798_v0 }
 0x35c   :  { %v1865_v39 = vadd.f32 %v5416_v41, %v1864_v38  ;;  %v4681_v38 = vld [vmem:[%s6137_s0 + $0xa0] ss:$16 sps:$4 sm:$0xff]  }
 0x35d   :  { %v2072_v40 = vmax.f32 %v1870_v37, 0.0 }
 0x35e   :  { %v2071_v42 = vmax.f32 %v1865_v39, 0.0 }
 0x360   :  { %v2121_v43 = vpack.c.bf16 %v2072_v40, %v2071_v42  ;;  %v4682_v40 = vld [vmem:[%s6137_s0 + $0xc4] ss:$16 sps:$4 sm:$0xff]  }
 0x362   :  { %v3882_v44 = vpop.f32.mrb[30].mxu1  ;;  %2168 = vmatpush1.bf16.msra.mxu1 %v2121_v43 }
 0x363   :  { %v1880_v45 = vadd.f32 %v3882_v44, %v5416_v41  ;;  %v1874_v46 = vpop.f32.mrb[31].mxu1  ;;  %2169 = vmatprep.subr.bf16.mxu1 %v4798_v0 }
 0x364   :  { %v1875_v47 = vadd.f32 %v5416_v41, %v1874_v46 }
 0x365   :  { %v2074_v48 = vmax.f32 %v1880_v45, 0.0 }
 0x366   :  { %v2073_v49 = vmax.f32 %v1875_v47, 0.0 }
 0x368   :  { %v2122_v50 = vpack.c.bf16 %v2074_v48, %v2073_v49  ;;  %v4683_v48 = vld [vmem:[%s6137_s0 + $0xc0] ss:$16 sps:$4 sm:$0xff]  }
 0x36a   :  { %v3885_v51 = vpop.f32.mrb[32].mxu1  ;;  %2170 = vmatpush1.bf16.msra.mxu1 %v2122_v50  ;;  %v4684_v50 = vld [vmem:[%s6137_s0 + $0xe4] ss:$16 sps:$4 sm:$0xff]  }
 0x36b   :  { %v1890_v52 = vadd.f32 %v3885_v51, %v5416_v41  ;;  %v1884_v53 = vpop.f32.mrb[33].mxu1  ;;  %2428 = vmatprep.subr.bf16.mxu1 %v4798_v0 }
 0x36c   :  { %v1885_v54 = vadd.f32 %v5416_v41, %v1884_v53 }
 0x36d   :  { %v2076_v55 = vmax.f32 %v1890_v52, 0.0  ;;  %2172 = vmatmul.mubr.bf16.vlgmr.msra.gmra.mrb[64].mxu1 %v4671_v56 }
 0x36e   :  { %v2075_v57 = vmax.f32 %v1885_v54, 0.0  ;;  %2179 = vmatprep.mubr.bf16.mxu1 %v4672_v58 }
 0x370   :  { %v2123_v59 = vpack.c.bf16 %v2076_v55, %v2075_v57  ;;  %v4685_v57 = vld [vmem:[%s6137_s0 + $0xe0] ss:$16 sps:$4 sm:$0xff]  }
 0x372   :  { %v3888_v60 = vpop.f32.mrb[34].mxu1  ;;  %2429 = vmatpush1.bf16.msra.mxu1 %v2123_v59  ;;  %v4686_v59 = vld [vmem:[%s6137_s0 + $0x104] ss:$16 sps:$4 sm:$0xff]  }
 0x373   :  { %v1900_v61 = vadd.f32 %v3888_v60, %v5416_v41  ;;  %v1894_v62 = vpop.f32.mrb[35].mxu1  ;;  %2430 = vmatprep.subr.bf16.mxu1 %v4798_v0 }
 0x374   :  { %v1895_v63 = vadd.f32 %v5416_v41, %v1894_v62 }
 0x375   :  { %v2078_v1 = vmax.f32 %v1900_v61, 0.0  ;;  %2180 = vmatmul.mubr.bf16.gmra.mrb[68].mxu1 %v4673_v2 }
 0x376   :  { %v2077_v3 = vmax.f32 %v1895_v63, 0.0  ;;  %2187 = vmatprep.mubr.bf16.mxu1 %v4674_v4 }
 0x378   :  { %v2124_v5 = vpack.c.bf16 %v2078_v1, %v2077_v3  ;;  %v4687_v3 = vld [vmem:[%s6137_s0 + $0x100] ss:$16 sps:$4 sm:$0xff]  }
 0x37a   :  { %v3891_v6 = vpop.f32.mrb[36].mxu1  ;;  %2431 = vmatpush1.bf16.msra.mxu1 %v2124_v5  ;;  %v4688_v5 = vld [vmem:[%s6137_s0 + $0x124] ss:$16 sps:$4 sm:$0xff]  }
 0x37b   :  { %v1910_v7 = vadd.f32 %v3891_v6, %v5416_v41  ;;  %v1904_v8 = vpop.f32.mrb[37].mxu1  ;;  %2432 = vmatprep.subr.bf16.mxu1 %v4798_v0 }
 0x37c   :  { %v1905_v9 = vadd.f32 %v5416_v41, %v1904_v8 }
 0x37d   :  { %v2080_v10 = vmax.f32 %v1910_v7, 0.0  ;;  %2188 = vmatmul.mubr.bf16.gmra.mrb[72].mxu1 %v4675_v11 }
 0x37e   :  { %v2079_v12 = vmax.f32 %v1905_v9, 0.0  ;;  %2195 = vmatprep.mubr.bf16.mxu1 %v4676_v13 }
 0x380   :  { %v2125_v14 = vpack.c.bf16 %v2080_v10, %v2079_v12  ;;  %v4689_v12 = vld [vmem:[%s6137_s0 + $0x120] ss:$16 sps:$4 sm:$0xff]  }
 0x382   :  { %v3894_v15 = vpop.f32.mrb[38].mxu1  ;;  %2433 = vmatpush1.bf16.msra.mxu1 %v2125_v14  ;;  %v4690_v14 = vld [vmem:[%s6137_s0 + $0x144] ss:$16 sps:$4 sm:$0xff]  }
 0x383   :  { %v1920_v16 = vadd.f32 %v3894_v15, %v5416_v41  ;;  %v1914_v17 = vpop.f32.mrb[39].mxu1  ;;  %2434 = vmatprep.subr.bf16.mxu1 %v4798_v0 }
 0x384   :  { %v1915_v18 = vadd.f32 %v5416_v41, %v1914_v17 }
 0x385   :  { %v2082_v19 = vmax.f32 %v1920_v16, 0.0  ;;  %2196 = vmatmul.mubr.bf16.gmra.mrb[76].mxu1 %v4677_v20 }
 0x386   :  { %v2081_v21 = vmax.f32 %v1915_v18, 0.0  ;;  %2203 = vmatprep.mubr.bf16.mxu1 %v4678_v22 }
 0x388   :  { %v2126_v23 = vpack.c.bf16 %v2082_v19, %v2081_v21  ;;  %v4691_v21 = vld [vmem:[%s6137_s0 + $0x140] ss:$16 sps:$4 sm:$0xff]  }
 0x38a   :  { %v3897_v24 = vpop.f32.mrb[40].mxu1  ;;  %2435 = vmatpush1.bf16.msra.mxu1 %v2126_v23  ;;  %v4692_v23 = vld [vmem:[%s6137_s0 + $0x164] ss:$16 sps:$4 sm:$0xff]  }
 0x38b   :  { %v1930_v25 = vadd.f32 %v3897_v24, %v5416_v41  ;;  %v1924_v26 = vpop.f32.mrb[41].mxu1  ;;  %2436 = vmatprep.subr.bf16.mxu1 %v4798_v0 }
 0x38c   :  { %v1925_v27 = vadd.f32 %v5416_v41, %v1924_v26 }
 0x38d   :  { %v2084_v28 = vmax.f32 %v1930_v25, 0.0  ;;  %2204 = vmatmul.mubr.bf16.gmra.mrb[80].mxu1 %v4679_v29 }
 0x38e   :  { %v2083_v30 = vmax.f32 %v1925_v27, 0.0  ;;  %2211 = vmatprep.mubr.bf16.mxu1 %v4680_v31 }
 0x390   :  { %v2127_v32 = vpack.c.bf16 %v2084_v28, %v2083_v30  ;;  %v4693_v30 = vld [vmem:[%s6137_s0 + $0x160] ss:$16 sps:$4 sm:$0xff]  }
 0x392   :  { %v3900_v33 = vpop.f32.mrb[42].mxu1  ;;  %2437 = vmatpush1.bf16.msra.mxu1 %v2127_v32  ;;  %v4694_v32 = vld [vmem:[%s6137_s0 + $0x184] ss:$16 sps:$4 sm:$0xff]  }
 0x393   :  { %v1940_v34 = vadd.f32 %v3900_v33, %v5416_v41  ;;  %v1934_v35 = vpop.f32.mrb[43].mxu1  ;;  %2438 = vmatprep.subr.bf16.mxu1 %v4798_v0 }
 0x394   :  { %v1935_v36 = vadd.f32 %v5416_v41, %v1934_v35 }
 0x395   :  { %v2086_v37 = vmax.f32 %v1940_v34, 0.0  ;;  %2212 = vmatmul.mubr.bf16.gmra.mrb[84].mxu1 %v4681_v38 }
 0x396   :  { %v2085_v39 = vmax.f32 %v1935_v36, 0.0  ;;  %2219 = vmatprep.mubr.bf16.mxu1 %v4682_v40 }
 0x398   :  { %v2128_v42 = vpack.c.bf16 %v2086_v37, %v2085_v39  ;;  %v4695_v39 = vld [vmem:[%s6137_s0 + $0x180] ss:$16 sps:$4 sm:$0xff]  }
 0x39a   :  { %v3903_v43 = vpop.f32.mrb[44].mxu1  ;;  %2439 = vmatpush1.bf16.msra.mxu1 %v2128_v42  ;;  %v4696_v42 = vld [vmem:[%s6137_s0 + $0x1a4] ss:$16 sps:$4 sm:$0xff]  }
 0x39b   :  { %v1950_v44 = vadd.f32 %v3903_v43, %v5416_v41  ;;  %v1944_v45 = vpop.f32.mrb[45].mxu1  ;;  %2440 = vmatprep.subr.bf16.mxu1 %v4798_v0 }
 0x39c   :  { %v1945_v46 = vadd.f32 %v5416_v41, %v1944_v45 }
 0x39d   :  { %v2088_v47 = vmax.f32 %v1950_v44, 0.0  ;;  %2220 = vmatmul.mubr.bf16.gmra.mrb[88].mxu1 %v4683_v48 }
 0x39e   :  { %v2087_v49 = vmax.f32 %v1945_v46, 0.0  ;;  %2227 = vmatprep.mubr.bf16.mxu1 %v4684_v50 }
 0x3a0   :  { %v2129_v51 = vpack.c.bf16 %v2088_v47, %v2087_v49  ;;  %v4697_v49 = vld [vmem:[%s6137_s0 + $0x1a0] ss:$16 sps:$4 sm:$0xff]  }
 0x3a2   :  { %v3906_v52 = vpop.f32.mrb[46].mxu1  ;;  %2441 = vmatpush1.bf16.msra.mxu1 %v2129_v51  ;;  %v4698_v51 = vld [vmem:[%s6137_s0 + $0x1c4] ss:$16 sps:$4 sm:$0xff]  }
 0x3a3   :  { %v1960_v53 = vadd.f32 %v3906_v52, %v5416_v41  ;;  %v1954_v54 = vpop.f32.mrb[47].mxu1  ;;  %2442 = vmatprep.subr.bf16.mxu1 %v4798_v0 }
 0x3a4   :  { %v1955_v55 = vadd.f32 %v5416_v41, %v1954_v54 }
 0x3a5   :  { %v2090_v56 = vmax.f32 %v1960_v53, 0.0  ;;  %2228 = vmatmul.mubr.bf16.gmra.mrb[92].mxu1 %v4685_v57 }
 0x3a6   :  { %v2089_v58 = vmax.f32 %v1955_v55, 0.0  ;;  %2235 = vmatprep.mubr.bf16.mxu1 %v4686_v59 }
 0x3a8   :  { %v2130_v60 = vpack.c.bf16 %v2090_v56, %v2089_v58  ;;  %v4699_v58 = vld [vmem:[%s6137_s0 + $0x1c0] ss:$16 sps:$4 sm:$0xff]  }
 0x3aa   :  { %v3909_v61 = vpop.f32.mrb[48].mxu1  ;;  %2443 = vmatpush1.bf16.msra.mxu1 %v2130_v60  ;;  %v4700_v60 = vld [vmem:[%s6137_s0 + $0x1e4] ss:$16 sps:$4 sm:$0xff]  }
 0x3ab   :  { %v1970_v62 = vadd.f32 %v3909_v61, %v5416_v41  ;;  %v1964_v63 = vpop.f32.mrb[49].mxu1  ;;  %2444 = vmatprep.subr.bf16.mxu1 %v4798_v0 }
 0x3ac   :  { %v1965_v1 = vadd.f32 %v5416_v41, %v1964_v63 }
 0x3ad   :  { %v2092_v2 = vmax.f32 %v1970_v62, 0.0  ;;  %2236 = vmatmul.mubr.bf16.gmra.mrb[96].mxu1 %v4687_v3 }
 0x3ae   :  { %v2091_v4 = vmax.f32 %v1965_v1, 0.0  ;;  %2243 = vmatprep.mubr.bf16.mxu1 %v4688_v5 }
 0x3b0   :  { %v2131_v6 = vpack.c.bf16 %v2092_v2, %v2091_v4  ;;  %v4701_v4 = vld [vmem:[%s6137_s0 + $0x1e0] ss:$16 sps:$4 sm:$0xff]  }
 0x3b2   :  { %v3912_v7 = vpop.f32.mrb[50].mxu1  ;;  %2445 = vmatpush1.bf16.msra.mxu1 %v2131_v6  ;;  %v4702_v6 = vld [vmem:[%s6137_s0 + $0x204] ss:$16 sps:$4 sm:$0xff]  }
 0x3b3   :  { %v1980_v8 = vadd.f32 %v3912_v7, %v5416_v41  ;;  %v1974_v9 = vpop.f32.mrb[51].mxu1  ;;  %2446 = vmatprep.subr.bf16.mxu1 %v4798_v0 }
 0x3b4   :  { %v1975_v10 = vadd.f32 %v5416_v41, %v1974_v9  ;;  %v4706_v9 = vld [vmem:[%s6137_s0 + $0x244] ss:$16 sps:$4 sm:$0xff]  }
 0x3b5   :  { %v2094_v11 = vmax.f32 %v1980_v8, 0.0  ;;  %2244 = vmatmul.mubr.bf16.gmra.mrb[100].mxu1 %v4689_v12  ;;  %v4705_v8 = vld [vmem:[%s6137_s0 + $0x220] ss:$16 sps:$4 sm:$0xff]  }
 0x3b6   :  { %v2093_v13 = vmax.f32 %v1975_v10, 0.0  ;;  %2251 = vmatprep.mubr.bf16.mxu1 %v4690_v14  ;;  %v4707_v10 = vld [vmem:[%s6137_s0 + $0x240] ss:$16 sps:$4 sm:$0xff]  }
 0x3b7   :  { %v4709_v12 = vld [vmem:[%s6137_s0 + $0x260] ss:$16 sps:$4 sm:$0xff]  }
 0x3b8   :  { %v2132_v15 = vpack.c.bf16 %v2094_v11, %v2093_v13  ;;  %v4708_v11 = vld [vmem:[%s6137_s0 + $0x264] ss:$16 sps:$4 sm:$0xff]   ;;  %v4711_v14 = vld [vmem:[%s6137_s0 + $0x280] ss:$16 sps:$4 sm:$0xff]  }
 0x3b9   :  { %v4710_v13 = vld [vmem:[%s6137_s0 + $0x284] ss:$16 sps:$4 sm:$0xff]  }
 0x3ba   :  { %v3915_v16 = vpop.f32.mrb[52].mxu1  ;;  %2447 = vmatpush1.bf16.msra.mxu1 %v2132_v15  ;;  %v4712_v15 = vld [vmem:[%s6137_s0 + $0x2a4] ss:$16 sps:$4 sm:$0xff]  }
 0x3bb   :  { %v1990_v17 = vadd.f32 %v3915_v16, %v5416_v41  ;;  %v1984_v18 = vpop.f32.mrb[53].mxu1  ;;  %2448 = vmatprep.subr.bf16.mxu1 %v4798_v0  ;;  %v4713_v16 = vld [vmem:[%s6137_s0 + $0x2a0] ss:$16 sps:$4 sm:$0xff]  }
 0x3bc   :  { %v1985_v19 = vadd.f32 %v5416_v41, %v1984_v18  ;;  %v4715_v18 = vld [vmem:[%s6137_s0 + $0x2c0] ss:$16 sps:$4 sm:$0xff]  }
 0x3bd   :  { %v2096_v20 = vmax.f32 %v1990_v17, 0.0  ;;  %2252 = vmatmul.mubr.bf16.gmra.mrb[104].mxu1 %v4691_v21  ;;  %v4714_v17 = vld [vmem:[%s6137_s0 + $0x2c4] ss:$16 sps:$4 sm:$0xff]  }
 0x3be   :  { %v2095_v22 = vmax.f32 %v1985_v19, 0.0  ;;  %2259 = vmatprep.mubr.bf16.mxu1 %v4692_v23  ;;  %v4716_v19 = vld [vmem:[%s6137_s0 + $0x2e4] ss:$16 sps:$4 sm:$0xff]  }
 0x3bf   :  { %v4718_v21 = vld [vmem:[%s6137_s0 + $0x304] ss:$16 sps:$4 sm:$0xff]  }
 0x3c0   :  { %v2133_v24 = vpack.c.bf16 %v2096_v20, %v2095_v22  ;;  %v4717_v20 = vld [vmem:[%s6137_s0 + $0x2e0] ss:$16 sps:$4 sm:$0xff]   ;;  %v4720_v23 = vld [vmem:[%s6137_s0 + $0x324] ss:$16 sps:$4 sm:$0xff]  }
 0x3c1   :  { %v4719_v22 = vld [vmem:[%s6137_s0 + $0x300] ss:$16 sps:$4 sm:$0xff]  }
 0x3c2   :  { %v3918_v25 = vpop.f32.mrb[54].mxu1  ;;  %2449 = vmatpush1.bf16.msra.mxu1 %v2133_v24  ;;  %v4721_v24 = vld [vmem:[%s6137_s0 + $0x320] ss:$16 sps:$4 sm:$0xff]  }
 0x3c3   :  { %v2000_v26 = vadd.f32 %v3918_v25, %v5416_v41  ;;  %v1994_v27 = vpop.f32.mrb[55].mxu1  ;;  %2450 = vmatprep.subr.bf16.mxu1 %v4798_v0  ;;  %v4722_v25 = vld [vmem:[%s6137_s0 + $0x344] ss:$16 sps:$4 sm:$0xff]  }
 0x3c4   :  { %v1995_v28 = vadd.f32 %v5416_v41, %v1994_v27  ;;  %v4724_v27 = vld [vmem:[%s6137_s0 + $0x364] ss:$16 sps:$4 sm:$0xff]  }
 0x3c5   :  { %v2098_v29 = vmax.f32 %v2000_v26, 0.0  ;;  %2260 = vmatmul.mubr.bf16.gmra.mrb[108].mxu1 %v4693_v30  ;;  %v4723_v26 = vld [vmem:[%s6137_s0 + $0x340] ss:$16 sps:$4 sm:$0xff]  }
 0x3c6   :  { %v2097_v31 = vmax.f32 %v1995_v28, 0.0  ;;  %2267 = vmatprep.mubr.bf16.mxu1 %v4694_v32  ;;  %v4725_v28 = vld [vmem:[%s6137_s0 + $0x360] ss:$16 sps:$4 sm:$0xff]  }
 0x3c7   :  { %v4727_v30 = vld [vmem:[%s6137_s0 + $0x380] ss:$16 sps:$4 sm:$0xff]  }
 0x3c8   :  { %v2134_v33 = vpack.c.bf16 %v2098_v29, %v2097_v31  ;;  %v4726_v29 = vld [vmem:[%s6137_s0 + $0x384] ss:$16 sps:$4 sm:$0xff]   ;;  %v4729_v32 = vld [vmem:[%s6137_s0 + $0x3a0] ss:$16 sps:$4 sm:$0xff]  }
 0x3c9   :  { %v4728_v31 = vld [vmem:[%s6137_s0 + $0x3a4] ss:$16 sps:$4 sm:$0xff]  }
 0x3ca   :  { %v3921_v34 = vpop.f32.mrb[56].mxu1  ;;  %2451 = vmatpush1.bf16.msra.mxu1 %v2134_v33  ;;  %v4730_v33 = vld [vmem:[%s6137_s0 + $0x3c4] ss:$16 sps:$4 sm:$0xff]  }
 0x3cb   :  { %v2010_v35 = vadd.f32 %v3921_v34, %v5416_v41  ;;  %v2004_v36 = vpop.f32.mrb[57].mxu1  ;;  %2452 = vmatprep.subr.bf16.mxu1 %v4798_v0  ;;  %v4731_v34 = vld [vmem:[%s6137_s0 + $0x3c0] ss:$16 sps:$4 sm:$0xff]  }
 0x3cc   :  { %v2005_v37 = vadd.f32 %v5416_v41, %v2004_v36  ;;  %v4733_v36 = vld [vmem:[%s6137_s0 + $0x3e0] ss:$16 sps:$4 sm:$0xff]  }
 0x3cd   :  { %v2100_v38 = vmax.f32 %v2010_v35, 0.0  ;;  %2268 = vmatmul.mubr.bf16.gmra.mrb[112].mxu1 %v4695_v39  ;;  %v4732_v35 = vld [vmem:[%s6137_s0 + $0x3e4] ss:$16 sps:$4 sm:$0xff]   ;;  %v4736_v39 = vld [vmem:[%s6137_s0 + $0x2c] ss:$16 sps:$4 sm:$0xff]  }
 0x3ce   :  { %v2099_v40 = vmax.f32 %v2005_v37, 0.0  ;;  %2275 = vmatprep.mubr.bf16.mxu1 %v4696_v42  ;;  %v4734_v37 = vld [vmem:[%s6137_s0 + $0xc] ss:$16 sps:$4 sm:$0xff]  }
 0x3cf   :  { %v4738_v42 = vld [vmem:[%s6137_s0 + $0x4c] ss:$16 sps:$4 sm:$0xff]  }
 0x3d0   :  { %v2135_v43 = vpack.c.bf16 %v2100_v38, %v2099_v40  ;;  %v4735_v38 = vld [vmem:[%s6137_s0 + $0x8] ss:$16 sps:$4 sm:$0xff]  }
 0x3d1   :  { %v4737_v40 = vld [vmem:[%s6137_s0 + $0x28] ss:$16 sps:$4 sm:$0xff]  }
 0x3d2   :  { %v3924_v44 = vpop.f32.mrb[58].mxu1  ;;  %2453 = vmatpush1.bf16.msra.mxu1 %v2135_v43  ;;  %v4739_v43 = vld [vmem:[%s6137_s0 + $0x48] ss:$16 sps:$4 sm:$0xff]  }
 0x3d3   :  { %v2020_v45 = vadd.f32 %v3924_v44, %v5416_v41  ;;  %v2014_v46 = vpop.f32.mrb[59].mxu1  ;;  %2454 = vmatprep.subr.bf16.mxu1 %v4798_v0  ;;  %v4740_v44 = vld [vmem:[%s6137_s0 + $0x6c] ss:$16 sps:$4 sm:$0xff]  }
 0x3d4   :  { %v2015_v47 = vadd.f32 %v5416_v41, %v2014_v46  ;;  %v2718_v46 = vld [vmem:[%s6140_s4 + $0x8] sm:$0xff] }
 0x3d5   :  { %v2102_v48 = vmax.f32 %v2020_v45, 0.0  ;;  %2276 = vmatmul.mubr.bf16.gmra.mrb[116].mxu1 %v4697_v49  ;;  %v2717_v45 = vld [vmem:[%s6140_s4] sm:$0xff]  ;;  %v4742_v49 = vld [vmem:[%s6137_s0 + $0x8c] ss:$16 sps:$4 sm:$0xff]  }
 0x3d6   :  { %v2101_v50 = vmax.f32 %v2015_v47, 0.0  ;;  %2283 = vmatprep.mubr.bf16.mxu1 %v4698_v51  ;;  %v4126_v47 = vpack.c.bf16 %v2718_v46, %v2717_v45  ;;  %v4744_v51 = vld [vmem:[%s6137_s0 + $0xac] ss:$16 sps:$4 sm:$0xff]   ;;  %v4781_v45 = vld [vmem:[%s6137_s0 + $0x2e8] ss:$16 sps:$4 sm:$0xff]  }
 0x3d7   :  { %v4782_v46 = vld [vmem:[%s6137_s0 + $0x30c] ss:$16 sps:$4 sm:$0xff]  }
 0x3d8   :  { %v2136_v52 = vpack.c.bf16 %v2102_v48, %v2101_v50  ;;  %4127 = vmatprep.subr.bf16.mxu0 %v4126_v47  ;;  %v4741_v48 = vld [vmem:[%s6137_s0 + $0x68] ss:$16 sps:$4 sm:$0xff]  }
 0x3d9   :  { %4129 = vmatpush3.bf16.msra.mxu0 %v4126_v47  ;;  %v4743_v50 = vld [vmem:[%s6137_s0 + $0x88] ss:$16 sps:$4 sm:$0xff]  }
 0x3da   :  { %v3927_v53 = vpop.f32.mrb[60].mxu1  ;;  %2455 = vmatpush1.bf16.msra.mxu1 %v2136_v52  ;;  %v4745_v52 = vld [vmem:[%s6137_s0 + $0xa8] ss:$16 sps:$4 sm:$0xff]  }
 0x3db   :  { %v2030_v54 = vadd.f32 %v3927_v53, %v5416_v41  ;;  %v2024_v55 = vpop.f32.mrb[61].mxu1  ;;  %2456 = vmatprep.subr.bf16.mxu1 %v4798_v0  ;;  %v4746_v53 = vld [vmem:[%s6137_s0 + $0xcc] ss:$16 sps:$4 sm:$0xff]   ;;  %v4783_v47 = vld [vmem:[%s6137_s0 + $0x308] ss:$16 sps:$4 sm:$0xff]  }
 0x3dc   :  { %v2025_v56 = vadd.f32 %v5416_v41, %v2024_v55  ;;  %v2719_v55 = vld [vmem:[%s6140_s4 + $0x10] sm:$0xff] }
 0x3dd   :  { %v2104_v57 = vmax.f32 %v2030_v54, 0.0  ;;  %2284 = vmatmul.mubr.bf16.gmra.mrb[120].mxu1 %v4699_v58  ;;  %v4747_v54 = vld [vmem:[%s6137_s0 + $0xc8] ss:$16 sps:$4 sm:$0xff]  }
 0x3de   :  { %v2103_v59 = vmax.f32 %v2025_v56, 0.0  ;;  %2291 = vmatprep.mubr.bf16.mxu1 %v4700_v60  ;;  %v2720_v56 = vld [vmem:[%s6140_s4 + $0x18] sm:$0xff]  ;;  %v2721_v60 = vld [vmem:[%s6140_s4 + $0x20] sm:$0xff] }
 0x3df   :  { %v4130_v58 = vpack.c.bf16 %v2720_v56, %v2719_v55 }
 0x3e0   :  { %v2137_v61 = vpack.c.bf16 %v2104_v57, %v2103_v59  ;;  %v4748_v57 = vld [vmem:[%s6137_s0 + $0xec] ss:$16 sps:$4 sm:$0xff]   ;;  %v4749_v59 = vld [vmem:[%s6137_s0 + $0xe8] ss:$16 sps:$4 sm:$0xff]  }
 0x3e1   :  { %4131 = vmatprep.subr.bf16.mxu0 %v4130_v58 }
 0x3e2   :  { %v3930_v62 = vpop.f32.mrb[62].mxu1  ;;  %2457 = vmatpush1.bf16.msra.mxu1 %v2137_v61  ;;  %4133 = vmatpush3.bf16.msra.mxu0 %v4130_v58  ;;  %v2722_v61 = vld [vmem:[%s6140_s4 + $0x28] sm:$0xff] }
 0x3e3   :  { %v2040_v63 = vadd.f32 %v3930_v62, %v5416_v41  ;;  %v2034_v1 = vpop.f32.mrb[63].mxu1  ;;  %2458 = vmatprep.subr.bf16.mxu1 %v4798_v0  ;;  %v4703_v0 = vld [vmem:[%s6137_s0 + $0x200] ss:$16 sps:$4 sm:$0xff]   ;;  %v4750_v62 = vld [vmem:[%s6137_s0 + $0x10c] ss:$16 sps:$4 sm:$0xff]  }
 0x3e4   :  { %v2035_v2 = vadd.f32 %v5416_v41, %v2034_v1  ;;  %v4704_v41 = vld [vmem:[%s6137_s0 + $0x224] ss:$16 sps:$4 sm:$0xff]   ;;  %v4790_v58 = vld [vmem:[%s6137_s0 + $0x38c] ss:$16 sps:$4 sm:$0xff]  }
 0x3e5   :  { %v2106_v3 = vmax.f32 %v2040_v63, 0.0  ;;  %2292 = vmatmul.mubr.bf16.gmra.mrb[124].mxu1 %v4701_v4  ;;  %v4134_v63 = vpack.c.bf16 %v2722_v61, %v2721_v60  ;;  %v2723_v1 = vld [vmem:[%s6140_s4 + $0x30] sm:$0xff] }
 0x3e6   :  { %v2105_v5 = vmax.f32 %v2035_v2, 0.0  ;;  %2299 = vmatprep.mubr.bf16.mxu1 %v4702_v6  ;;  %v2724_v2 = vld [vmem:[%s6140_s4 + $0x38] sm:$0xff]  ;;  %v2726_v6 = vld [vmem:[%s6140_s4 + $0x48] sm:$0xff] }
 0x3e7   :  { %4135 = vmatprep.subr.bf16.mxu0 %v4134_v63  ;;  %v4138_v4 = vpack.c.bf16 %v2724_v2, %v2723_v1  ;;  %v4792_v1 = vld [vmem:[%s6137_s0 + $0x3ac] ss:$16 sps:$4 sm:$0xff]  }
 0x3e8   :  { %v2138_v7 = vpack.c.bf16 %v2106_v3, %v2105_v5  ;;  %4137 = vmatpush3.bf16.msra.mxu0 %v4134_v63  ;;  %v4751_v3 = vld [vmem:[%s6137_s0 + $0x108] ss:$16 sps:$4 sm:$0xff]   ;;  %v2725_v5 = vld [vmem:[%s6140_s4 + $0x40] sm:$0xff] }
 0x3e9   :  { %4139 = vmatprep.subr.bf16.mxu0 %v4138_v4  ;;  %v4791_v63 = vld [vmem:[%s6137_s0 + $0x388] ss:$16 sps:$4 sm:$0xff]  }
 0x3ea   :  { %2459 = vmatpush1.bf16.msra.mxu1 %v2138_v7  ;;  %v4752_v7 = vld [vmem:[%s6137_s0 + $0x12c] ss:$16 sps:$4 sm:$0xff]  }
 0x3ec   :  { %4141 = vmatpush3.bf16.msra.mxu0 %v4138_v4 }
 0x3ed   :  { %2300 = vmatmul.mubr.bf16.gmra.mrb[128].mxu1 %v4703_v0  ;;  %v4142_v0 = vpack.c.bf16 %v2726_v6, %v2725_v5  ;;  %v4793_v6 = vld [vmem:[%s6137_s0 + $0x3a8] ss:$16 sps:$4 sm:$0xff]  }
 0x3ee   :  { %2307 = vmatprep.mubr.bf16.mxu1 %v4704_v41  ;;  %v2727_v41 = vld [vmem:[%s6140_s4 + $0x50] sm:$0xff] }
 0x3ef   :  { %4143 = vmatprep.subr.bf16.mxu0 %v4142_v0 }
 0x3f0   :  { %4145 = vmatpush3.bf16.msra.mxu0 %v4142_v0 }
 0x3f5   :  { %2308 = vmatmul.mubr.bf16.gmra.mrb[132].mxu1 %v4705_v8  ;;  %v2728_v8 = vld [vmem:[%s6140_s4 + $0x58] sm:$0xff] }
 0x3f6   :  { %2315 = vmatprep.mubr.bf16.mxu1 %v4706_v9  ;;  %v4753_v9 = vld [vmem:[%s6137_s0 + $0x128] ss:$16 sps:$4 sm:$0xff]  }
 0x3fd   :  { %2316 = vmatmul.mubr.bf16.gmra.mrb[136].mxu1 %v4707_v10  ;;  %v4146_v10 = vpack.c.bf16 %v2728_v8, %v2727_v41 }
 0x3fe   :  { %2323 = vmatprep.mubr.bf16.mxu1 %v4708_v11  ;;  %v2729_v11 = vld [vmem:[%s6140_s4 + $0x60] sm:$0xff] }
 0x3ff   :  { %4147 = vmatprep.subr.bf16.mxu0 %v4146_v10 }
 0x400   :  { %4149 = vmatpush3.bf16.msra.mxu0 %v4146_v10  ;;  %v4795_v10 = vld [vmem:[%s6137_s0 + $0x3c8] ss:$16 sps:$4 sm:$0xff]  }
 0x405   :  { %2324 = vmatmul.mubr.bf16.gmra.mrb[140].mxu1 %v4709_v12  ;;  %v2730_v12 = vld [vmem:[%s6140_s4 + $0x68] sm:$0xff] }
 0x406   :  { %2331 = vmatprep.mubr.bf16.mxu1 %v4710_v13  ;;  %v4754_v13 = vld [vmem:[%s6137_s0 + $0x14c] ss:$16 sps:$4 sm:$0xff]  }
 0x40d   :  { %2332 = vmatmul.mubr.bf16.gmra.mrb[144].mxu1 %v4711_v14  ;;  %v4150_v14 = vpack.c.bf16 %v2730_v12, %v2729_v11  ;;  %v4796_v11 = vld [vmem:[%s6137_s0 + $0x3ec] ss:$16 sps:$4 sm:$0xff]  }
 0x40e   :  { %2339 = vmatprep.mubr.bf16.mxu1 %v4712_v15  ;;  %v2731_v15 = vld [vmem:[%s6140_s4 + $0x70] sm:$0xff] }
 0x40f   :  { %4151 = vmatprep.subr.bf16.mxu0 %v4150_v14 }
 0x410   :  { %4153 = vmatpush3.bf16.msra.mxu0 %v4150_v14 }
 0x415   :  { %2340 = vmatmul.mubr.bf16.gmra.mrb[148].mxu1 %v4713_v16  ;;  %v2732_v16 = vld [vmem:[%s6140_s4 + $0x78] sm:$0xff] }
 0x416   :  { %2347 = vmatprep.mubr.bf16.mxu1 %v4714_v17  ;;  %v4755_v17 = vld [vmem:[%s6137_s0 + $0x148] ss:$16 sps:$4 sm:$0xff]  }
 0x41d   :  { %2348 = vmatmul.mubr.bf16.gmra.mrb[152].mxu1 %v4715_v18  ;;  %v4154_v18 = vpack.c.bf16 %v2732_v16, %v2731_v15  ;;  %v4797_v16 = vld [vmem:[%s6137_s0 + $0x3e8] ss:$16 sps:$4 sm:$0xff]  }
 0x41e   :  { %2355 = vmatprep.mubr.bf16.mxu1 %v4716_v19  ;;  %v4756_v19 = vld [vmem:[%s6137_s0 + $0x16c] ss:$16 sps:$4 sm:$0xff]  }
 0x41f   :  { %4155 = vmatprep.subr.bf16.mxu0 %v4154_v18 }
 0x420   :  { %4157 = vmatpush3.bf16.msra.mxu0 %v4154_v18 }
 0x425   :  { %2356 = vmatmul.mubr.bf16.gmra.mrb[156].mxu1 %v4717_v20  ;;  %v4757_v20 = vld [vmem:[%s6137_s0 + $0x168] ss:$16 sps:$4 sm:$0xff]  }
 0x426   :  { %2363 = vmatprep.mubr.bf16.mxu1 %v4718_v21  ;;  %v4758_v21 = vld [vmem:[%s6137_s0 + $0x18c] ss:$16 sps:$4 sm:$0xff]  }
 0x42d   :  { %2364 = vmatmul.mubr.bf16.gmra.mrb[160].mxu1 %v4719_v22  ;;  %v4759_v22 = vld [vmem:[%s6137_s0 + $0x188] ss:$16 sps:$4 sm:$0xff]  }
 0x42e   :  { %2371 = vmatprep.mubr.bf16.mxu1 %v4720_v23  ;;  %v4760_v23 = vld [vmem:[%s6137_s0 + $0x1ac] ss:$16 sps:$4 sm:$0xff]  }
 0x435   :  { %2372 = vmatmul.mubr.bf16.gmra.mrb[164].mxu1 %v4721_v24  ;;  %v4761_v24 = vld [vmem:[%s6137_s0 + $0x1a8] ss:$16 sps:$4 sm:$0xff]  }
 0x436   :  { %2379 = vmatprep.mubr.bf16.mxu1 %v4722_v25  ;;  %v4762_v25 = vld [vmem:[%s6137_s0 + $0x1cc] ss:$16 sps:$4 sm:$0xff]  }
 0x43d   :  { %2380 = vmatmul.mubr.bf16.gmra.mrb[168].mxu1 %v4723_v26  ;;  %v4763_v26 = vld [vmem:[%s6137_s0 + $0x1c8] ss:$16 sps:$4 sm:$0xff]  }
 0x43e   :  { %2387 = vmatprep.mubr.bf16.mxu1 %v4724_v27  ;;  %v4764_v27 = vld [vmem:[%s6137_s0 + $0x1ec] ss:$16 sps:$4 sm:$0xff]  }
 0x445   :  { %2388 = vmatmul.mubr.bf16.gmra.mrb[172].mxu1 %v4725_v28  ;;  %v4765_v28 = vld [vmem:[%s6137_s0 + $0x1e8] ss:$16 sps:$4 sm:$0xff]  }
 0x446   :  { %2395 = vmatprep.mubr.bf16.mxu1 %v4726_v29  ;;  %v4766_v29 = vld [vmem:[%s6137_s0 + $0x20c] ss:$16 sps:$4 sm:$0xff]  }
 0x44d   :  { %2396 = vmatmul.mubr.bf16.gmra.mrb[176].mxu1 %v4727_v30  ;;  %v4767_v30 = vld [vmem:[%s6137_s0 + $0x208] ss:$16 sps:$4 sm:$0xff]  }
 0x44e   :  { %2403 = vmatprep.mubr.bf16.mxu1 %v4728_v31  ;;  %v4768_v31 = vld [vmem:[%s6137_s0 + $0x22c] ss:$16 sps:$4 sm:$0xff]  }
 0x455   :  { %2404 = vmatmul.mubr.bf16.gmra.mrb[180].mxu1 %v4729_v32  ;;  %v4769_v32 = vld [vmem:[%s6137_s0 + $0x228] ss:$16 sps:$4 sm:$0xff]  }
 0x456   :  { %2411 = vmatprep.mubr.bf16.mxu1 %v4730_v33  ;;  %v4770_v33 = vld [vmem:[%s6137_s0 + $0x24c] ss:$16 sps:$4 sm:$0xff]  }
 0x45d   :  { %2412 = vmatmul.mubr.bf16.gmra.mrb[184].mxu1 %v4731_v34  ;;  %v4771_v34 = vld [vmem:[%s6137_s0 + $0x248] ss:$16 sps:$4 sm:$0xff]  }
 0x45e   :  { %2419 = vmatprep.mubr.bf16.mxu1 %v4732_v35  ;;  %v4772_v35 = vld [vmem:[%s6137_s0 + $0x26c] ss:$16 sps:$4 sm:$0xff]  }
 0x465   :  { %2420 = vmatmul.mubr.bf16.gmra.mrb[188].mxu1 %v4733_v36  ;;  %v4773_v36 = vld [vmem:[%s6137_s0 + $0x268] ss:$16 sps:$4 sm:$0xff]  }
 0x466   :  { %2460 = vmatprep.mubr.bf16.mxu1 %v4734_v37  ;;  %v4774_v37 = vld [vmem:[%s6137_s0 + $0x28c] ss:$16 sps:$4 sm:$0xff]  }
 0x46d   :  { %2461 = vmatmul.mubr.bf16.vlgmr.msra.gmra.mrb[64].mxu1 %v4735_v38  ;;  %v4775_v38 = vld [vmem:[%s6137_s0 + $0x288] ss:$16 sps:$4 sm:$0xff]  }
 0x46e   :  { %2468 = vmatprep.mubr.bf16.mxu1 %v4736_v39  ;;  %v4776_v39 = vld [vmem:[%s6137_s0 + $0x2ac] ss:$16 sps:$4 sm:$0xff]  }
 0x475   :  { %2469 = vmatmul.mubr.bf16.gmra.mrb[68].mxu1 %v4737_v40  ;;  %v4777_v40 = vld [vmem:[%s6137_s0 + $0x2a8] ss:$16 sps:$4 sm:$0xff]  }
 0x476   :  { %2476 = vmatprep.mubr.bf16.mxu1 %v4738_v42  ;;  %v4778_v42 = vld [vmem:[%s6137_s0 + $0x2cc] ss:$16 sps:$4 sm:$0xff]  }
 0x47d   :  { %2477 = vmatmul.mubr.bf16.gmra.mrb[72].mxu1 %v4739_v43  ;;  %v4779_v43 = vld [vmem:[%s6137_s0 + $0x2c8] ss:$16 sps:$4 sm:$0xff]  }
 0x47e   :  { %2484 = vmatprep.mubr.bf16.mxu1 %v4740_v44  ;;  %v4780_v44 = vld [vmem:[%s6137_s0 + $0x2ec] ss:$16 sps:$4 sm:$0xff]  }
 0x485   :  { %2485 = vmatmul.mubr.bf16.gmra.mrb[76].mxu1 %v4741_v48  ;;  %v4784_v48 = vld [vmem:[%s6137_s0 + $0x32c] ss:$16 sps:$4 sm:$0xff]  }
 0x486   :  { %2492 = vmatprep.mubr.bf16.mxu1 %v4742_v49  ;;  %v4785_v49 = vld [vmem:[%s6137_s0 + $0x328] ss:$16 sps:$4 sm:$0xff]  }
 0x48d   :  { %2493 = vmatmul.mubr.bf16.gmra.mrb[80].mxu1 %v4743_v50  ;;  %v4786_v50 = vld [vmem:[%s6137_s0 + $0x34c] ss:$16 sps:$4 sm:$0xff]  }
 0x48e   :  { %2500 = vmatprep.mubr.bf16.mxu1 %v4744_v51  ;;  %v4787_v51 = vld [vmem:[%s6137_s0 + $0x348] ss:$16 sps:$4 sm:$0xff]  }
 0x495   :  { %2501 = vmatmul.mubr.bf16.gmra.mrb[84].mxu1 %v4745_v52  ;;  %v4788_v52 = vld [vmem:[%s6137_s0 + $0x36c] ss:$16 sps:$4 sm:$0xff]  }
 0x496   :  { %2508 = vmatprep.mubr.bf16.mxu1 %v4746_v53 }
 0x49d   :  { %2509 = vmatmul.mubr.bf16.gmra.mrb[88].mxu1 %v4747_v54 }
 0x49e   :  { %2516 = vmatprep.mubr.bf16.mxu1 %v4748_v57  ;;  %v4789_v57 = vld [vmem:[%s6137_s0 + $0x368] ss:$16 sps:$4 sm:$0xff]  }
 0x4a5   :  { %2517 = vmatmul.mubr.bf16.gmra.mrb[92].mxu1 %v4749_v59 }
 0x4a6   :  { %2524 = vmatprep.mubr.bf16.mxu1 %v4750_v62 }
 0x4ad   :  { %2525 = vmatmul.mubr.bf16.gmra.mrb[96].mxu1 %v4751_v3 }
 0x4ae   :  { %2532 = vmatprep.mubr.bf16.mxu1 %v4752_v7  ;;  %v4794_v7 = vld [vmem:[%s6137_s0 + $0x3cc] ss:$16 sps:$4 sm:$0xff]  }
 0x4b5   :  { %2533 = vmatmul.mubr.bf16.gmra.mrb[100].mxu1 %v4753_v9 }
 0x4b6   :  { %2540 = vmatprep.mubr.bf16.mxu1 %v4754_v13 }
 0x4bd   :  { %2541 = vmatmul.mubr.bf16.gmra.mrb[104].mxu1 %v4755_v17 }
 0x4be   :  { %2548 = vmatprep.mubr.bf16.mxu1 %v4756_v19 }
 0x4c5   :  { %2549 = vmatmul.mubr.bf16.gmra.mrb[108].mxu1 %v4757_v20 }
 0x4c6   :  { %2556 = vmatprep.mubr.bf16.mxu1 %v4758_v21 }
 0x4cd   :  { %2557 = vmatmul.mubr.bf16.gmra.mrb[112].mxu1 %v4759_v22 }
 0x4ce   :  { %2564 = vmatprep.mubr.bf16.mxu1 %v4760_v23 }
 0x4d5   :  { %2565 = vmatmul.mubr.bf16.gmra.mrb[116].mxu1 %v4761_v24 }
 0x4d6   :  { %2572 = vmatprep.mubr.bf16.mxu1 %v4762_v25 }
 0x4dd   :  { %2573 = vmatmul.mubr.bf16.gmra.mrb[120].mxu1 %v4763_v26 }
 0x4de   :  { %2580 = vmatprep.mubr.bf16.mxu1 %v4764_v27 }
 0x4e5   :  { %2581 = vmatmul.mubr.bf16.gmra.mrb[124].mxu1 %v4765_v28 }
 0x4e6   :  { %2588 = vmatprep.mubr.bf16.mxu1 %v4766_v29 }
 0x4ed   :  { %2589 = vmatmul.mubr.bf16.gmra.mrb[128].mxu1 %v4767_v30 }
 0x4ee   :  { %2596 = vmatprep.mubr.bf16.mxu1 %v4768_v31 }
 0x4f5   :  { %2597 = vmatmul.mubr.bf16.gmra.mrb[132].mxu1 %v4769_v32 }
 0x4f6   :  { %2604 = vmatprep.mubr.bf16.mxu1 %v4770_v33 }
 0x4fd   :  { %2605 = vmatmul.mubr.bf16.gmra.mrb[136].mxu1 %v4771_v34 }
 0x4fe   :  { %2612 = vmatprep.mubr.bf16.mxu1 %v4772_v35 }
 0x505   :  { %2613 = vmatmul.mubr.bf16.gmra.mrb[140].mxu1 %v4773_v36 }
 0x506   :  { %2620 = vmatprep.mubr.bf16.mxu1 %v4774_v37 }
 0x50d   :  { %2621 = vmatmul.mubr.bf16.gmra.mrb[144].mxu1 %v4775_v38 }
 0x50e   :  { %2628 = vmatprep.mubr.bf16.mxu1 %v4776_v39 }
 0x515   :  { %2629 = vmatmul.mubr.bf16.gmra.mrb[148].mxu1 %v4777_v40 }
 0x516   :  { %2636 = vmatprep.mubr.bf16.mxu1 %v4778_v42 }
 0x51d   :  { %2637 = vmatmul.mubr.bf16.gmra.mrb[152].mxu1 %v4779_v43 }
 0x51e   :  { %2644 = vmatprep.mubr.bf16.mxu1 %v4780_v44 }
 0x525   :  { %2645 = vmatmul.mubr.bf16.gmra.mrb[156].mxu1 %v4781_v45 }
 0x526   :  { %2652 = vmatprep.mubr.bf16.mxu1 %v4782_v46 }
 0x52d   :  { %2653 = vmatmul.mubr.bf16.gmra.mrb[160].mxu1 %v4783_v47 }
 0x52e   :  { %2660 = vmatprep.mubr.bf16.mxu1 %v4784_v48 }
 0x535   :  { %2661 = vmatmul.mubr.bf16.gmra.mrb[164].mxu1 %v4785_v49 }
 0x536   :  { %2668 = vmatprep.mubr.bf16.mxu1 %v4786_v50 }
 0x53d   :  { %2669 = vmatmul.mubr.bf16.gmra.mrb[168].mxu1 %v4787_v51 }
 0x53e   :  { %2676 = vmatprep.mubr.bf16.mxu1 %v4788_v52 }
 0x540   :  { %v2462_v53 = vpop.f32.mrb[64].mxu1 }
 0x541   :  { %v2464_v54 = vpop.f32.mrb[65].mxu1  ;;  %3963 = vmatprep.mubr.f32.mxu0 %v2462_v53 }
 0x542   :  { %v2465_v55 = vpop.f32.mrb[66].mxu1 }
 0x543   :  { %v2467_v56 = vpop.f32.mrb[67].mxu1  ;;  %3964 = vmatmul.mubr.f32.vlgmr.msra.gmra.mrb[128].mxu0 %v2465_v55 }
 0x545   :  { %2677 = vmatmul.mubr.bf16.gmra.mrb[172].mxu1 %v4789_v57 }
 0x546   :  { %2684 = vmatprep.mubr.bf16.mxu1 %v4790_v58 }
 0x548   :  { %v2470_v59 = vpop.f32.mrb[68].mxu1 }
 0x549   :  { %v2472_v60 = vpop.f32.mrb[69].mxu1  ;;  %3966 = vmatprep.mubr.f32.mxu0 %v2470_v59 }
 0x54a   :  { %v2473_v61 = vpop.f32.mrb[70].mxu1 }
 0x54b   :  { %v2475_v62 = vpop.f32.mrb[71].mxu1  ;;  %3967 = vmatmul.mubr.f32.gmra.mrb[130].mxu0 %v2473_v61 }
 0x54d   :  { %2685 = vmatmul.mubr.bf16.gmra.mrb[176].mxu1 %v4791_v63 }
 0x54e   :  { %2692 = vmatprep.mubr.bf16.mxu1 %v4792_v1 }
 0x550   :  { %v2478_v2 = vpop.f32.mrb[72].mxu1 }
 0x551   :  { %v2480_v3 = vpop.f32.mrb[73].mxu1  ;;  %3969 = vmatprep.mubr.f32.mxu0 %v2478_v2 }
 0x552   :  { %v2481_v4 = vpop.f32.mrb[74].mxu1 }
 0x553   :  { %v2483_v5 = vpop.f32.mrb[75].mxu1  ;;  %3970 = vmatmul.mubr.f32.gmra.mrb[132].mxu0 %v2481_v4 }
 0x555   :  { %2693 = vmatmul.mubr.bf16.gmra.mrb[180].mxu1 %v4793_v6 }
 0x556   :  { %2700 = vmatprep.mubr.bf16.mxu1 %v4794_v7 }
 0x558   :  { %v2486_v0 = vpop.f32.mrb[76].mxu1 }
 0x559   :  { %v2488_v41 = vpop.f32.mrb[77].mxu1  ;;  %3972 = vmatprep.mubr.f32.mxu0 %v2486_v0 }
 0x55a   :  { %v2489_v8 = vpop.f32.mrb[78].mxu1 }
 0x55b   :  { %v2491_v9 = vpop.f32.mrb[79].mxu1  ;;  %3973 = vmatmul.mubr.f32.gmra.mrb[134].mxu0 %v2489_v8 }
 0x55d   :  { %2701 = vmatmul.mubr.bf16.gmra.mrb[184].mxu1 %v4795_v10 }
 0x55e   :  { %2708 = vmatprep.mubr.bf16.mxu1 %v4796_v11 }
 0x560   :  { %v2494_v12 = vpop.f32.mrb[80].mxu1 }
 0x561   :  { %v2496_v13 = vpop.f32.mrb[81].mxu1  ;;  %3975 = vmatprep.mubr.f32.mxu0 %v2494_v12 }
 0x562   :  { %v2497_v14 = vpop.f32.mrb[82].mxu1 }
 0x563   :  { %v2499_v15 = vpop.f32.mrb[83].mxu1  ;;  %3976 = vmatmul.mubr.f32.gmra.mrb[136].mxu0 %v2497_v14 }
 0x565   :  { %2709 = vmatmul.mubr.bf16.gmra.mrb[188].mxu1 %v4797_v16 }
 0x568   :  { %v2502_v17 = vpop.f32.mrb[84].mxu1 }
 0x569   :  { %v2504_v18 = vpop.f32.mrb[85].mxu1  ;;  %3978 = vmatprep.mubr.f32.mxu0 %v2502_v17 }
 0x56a   :  { %v2505_v19 = vpop.f32.mrb[86].mxu1 }
 0x56b   :  { %v2507_v20 = vpop.f32.mrb[87].mxu1  ;;  %3979 = vmatmul.mubr.f32.gmra.mrb[138].mxu0 %v2505_v19 }
 0x570   :  { %v2510_v21 = vpop.f32.mrb[88].mxu1 }
 0x571   :  { %v2512_v22 = vpop.f32.mrb[89].mxu1  ;;  %3981 = vmatprep.mubr.f32.mxu0 %v2510_v21 }
 0x572   :  { %v2513_v23 = vpop.f32.mrb[90].mxu1 }
 0x573   :  { %v2515_v24 = vpop.f32.mrb[91].mxu1  ;;  %3982 = vmatmul.mubr.f32.gmra.mrb[140].mxu0 %v2513_v23 }
 0x578   :  { %v2518_v25 = vpop.f32.mrb[92].mxu1 }
 0x579   :  { %v2520_v26 = vpop.f32.mrb[93].mxu1  ;;  %3984 = vmatprep.mubr.f32.mxu0 %v2518_v25 }
 0x57a   :  { %v2521_v27 = vpop.f32.mrb[94].mxu1 }
 0x57b   :  { %v2523_v28 = vpop.f32.mrb[95].mxu1  ;;  %3985 = vmatmul.mubr.f32.gmra.mrb[142].mxu0 %v2521_v27 }
 0x580   :  { %v2526_v29 = vpop.f32.mrb[96].mxu1 }
 0x581   :  { %v2528_v30 = vpop.f32.mrb[97].mxu1  ;;  %3987 = vmatprep.mubr.f32.mxu0 %v2526_v29 }
 0x582   :  { %v2529_v31 = vpop.f32.mrb[98].mxu1 }
 0x583   :  { %v2531_v32 = vpop.f32.mrb[99].mxu1  ;;  %3988 = vmatmul.mubr.f32.gmra.mrb[144].mxu0 %v2529_v31 }
 0x588   :  { %v2534_v33 = vpop.f32.mrb[100].mxu1 }
 0x589   :  { %v2536_v34 = vpop.f32.mrb[101].mxu1  ;;  %3990 = vmatprep.mubr.f32.mxu0 %v2534_v33 }
 0x58a   :  { %v2537_v35 = vpop.f32.mrb[102].mxu1 }
 0x58b   :  { %v2539_v36 = vpop.f32.mrb[103].mxu1  ;;  %3991 = vmatmul.mubr.f32.gmra.mrb[146].mxu0 %v2537_v35 }
 0x590   :  { %v2542_v37 = vpop.f32.mrb[104].mxu1 }
 0x591   :  { %v2544_v38 = vpop.f32.mrb[105].mxu1  ;;  %3993 = vmatprep.mubr.f32.mxu0 %v2542_v37 }
 0x592   :  { %v2545_v39 = vpop.f32.mrb[106].mxu1 }
 0x593   :  { %v2547_v40 = vpop.f32.mrb[107].mxu1  ;;  %3994 = vmatmul.mubr.f32.gmra.mrb[148].mxu0 %v2545_v39 }
 0x598   :  { %v2550_v42 = vpop.f32.mrb[108].mxu1 }
 0x599   :  { %v2552_v43 = vpop.f32.mrb[109].mxu1  ;;  %3996 = vmatprep.mubr.f32.mxu0 %v2550_v42  ;;  %v5948_v42 = vld [vmem:[%s6141_s5] ss:$0 sm:$0xff] }
 0x59a   :  { %v2553_v44 = vpop.f32.mrb[110].mxu1 }
 0x59b   :  { %v2555_v45 = vpop.f32.mrb[111].mxu1  ;;  %3997 = vmatmul.mubr.f32.gmra.mrb[150].mxu0 %v2553_v44 }
 0x5a0   :  { %v2558_v46 = vpop.f32.mrb[112].mxu1 }
 0x5a1   :  { %v2560_v47 = vpop.f32.mrb[113].mxu1  ;;  %3999 = vmatprep.mubr.f32.mxu0 %v2558_v46 }
 0x5a2   :  { %v2561_v48 = vpop.f32.mrb[114].mxu1 }
 0x5a3   :  { %v2563_v49 = vpop.f32.mrb[115].mxu1  ;;  %4000 = vmatmul.mubr.f32.gmra.mrb[152].mxu0 %v2561_v48 }
 0x5a8   :  { %v2566_v50 = vpop.f32.mrb[116].mxu1 }
 0x5a9   :  { %v2568_v51 = vpop.f32.mrb[117].mxu1  ;;  %4002 = vmatprep.mubr.f32.mxu0 %v2566_v50 }
 0x5aa   :  { %v2569_v52 = vpop.f32.mrb[118].mxu1 }
 0x5ab   :  { %v2571_v53 = vpop.f32.mrb[119].mxu1  ;;  %4003 = vmatmul.mubr.f32.gmra.mrb[154].mxu0 %v2569_v52 }
 0x5b0   :  { %v2574_v54 = vpop.f32.mrb[120].mxu1 }
 0x5b1   :  { %v2576_v55 = vpop.f32.mrb[121].mxu1  ;;  %4005 = vmatprep.mubr.f32.mxu0 %v2574_v54 }
 0x5b2   :  { %v2577_v56 = vpop.f32.mrb[122].mxu1 }
 0x5b3   :  { %v2579_v57 = vpop.f32.mrb[123].mxu1  ;;  %4006 = vmatmul.mubr.f32.gmra.mrb[156].mxu0 %v2577_v56 }
 0x5b8   :  { %v2582_v58 = vpop.f32.mrb[124].mxu1 }
 0x5b9   :  { %v2584_v59 = vpop.f32.mrb[125].mxu1  ;;  %4008 = vmatprep.mubr.f32.mxu0 %v2582_v58 }
 0x5ba   :  { %v2585_v60 = vpop.f32.mrb[126].mxu1 }
 0x5bb   :  { %v2587_v61 = vpop.f32.mrb[127].mxu1  ;;  %4009 = vmatmul.mubr.f32.gmra.mrb[158].mxu0 %v2585_v60 }
 0x5c0   :  { %v2590_v62 = vpop.f32.mrb[128].mxu1 }
 0x5c1   :  { %v2592_v63 = vpop.f32.mrb[129].mxu1  ;;  %4011 = vmatprep.mubr.f32.mxu0 %v2590_v62 }
 0x5c2   :  { %v2593_v1 = vpop.f32.mrb[130].mxu1 }
 0x5c3   :  { %v2595_v2 = vpop.f32.mrb[131].mxu1  ;;  %4012 = vmatmul.mubr.f32.gmra.mrb[160].mxu0 %v2593_v1 }
 0x5c8   :  { %v2598_v3 = vpop.f32.mrb[132].mxu1 }
 0x5c9   :  { %v2600_v4 = vpop.f32.mrb[133].mxu1  ;;  %4014 = vmatprep.mubr.f32.mxu0 %v2598_v3 }
 0x5ca   :  { %v2601_v5 = vpop.f32.mrb[134].mxu1 }
 0x5cb   :  { %v2603_v6 = vpop.f32.mrb[135].mxu1  ;;  %4015 = vmatmul.mubr.f32.gmra.mrb[162].mxu0 %v2601_v5 }
 0x5d0   :  { %v2606_v7 = vpop.f32.mrb[136].mxu1 }
 0x5d1   :  { %v2608_v0 = vpop.f32.mrb[137].mxu1  ;;  %4017 = vmatprep.mubr.f32.mxu0 %v2606_v7 }
 0x5d2   :  { %v2609_v41 = vpop.f32.mrb[138].mxu1 }
 0x5d3   :  { %v2611_v8 = vpop.f32.mrb[139].mxu1  ;;  %4018 = vmatmul.mubr.f32.gmra.mrb[164].mxu0 %v2609_v41 }
 0x5d8   :  { %v2614_v9 = vpop.f32.mrb[140].mxu1 }
 0x5d9   :  { %v2616_v10 = vpop.f32.mrb[141].mxu1  ;;  %4020 = vmatprep.mubr.f32.mxu0 %v2614_v9 }
 0x5da   :  { %v2617_v11 = vpop.f32.mrb[142].mxu1 }
 0x5db   :  { %v2619_v12 = vpop.f32.mrb[143].mxu1  ;;  %4021 = vmatmul.mubr.f32.gmra.mrb[166].mxu0 %v2617_v11 }
 0x5e0   :  { %v2622_v13 = vpop.f32.mrb[144].mxu1 }
 0x5e1   :  { %v2624_v14 = vpop.f32.mrb[145].mxu1  ;;  %4023 = vmatprep.mubr.f32.mxu0 %v2622_v13 }
 0x5e2   :  { %v2625_v15 = vpop.f32.mrb[146].mxu1 }
 0x5e3   :  { %v2627_v16 = vpop.f32.mrb[147].mxu1  ;;  %4024 = vmatmul.mubr.f32.gmra.mrb[168].mxu0 %v2625_v15 }
 0x5e8   :  { %v2630_v17 = vpop.f32.mrb[148].mxu1 }
 0x5e9   :  { %v2632_v18 = vpop.f32.mrb[149].mxu1  ;;  %4026 = vmatprep.mubr.f32.mxu0 %v2630_v17 }
 0x5ea   :  { %v2633_v19 = vpop.f32.mrb[150].mxu1 }
 0x5eb   :  { %v2635_v20 = vpop.f32.mrb[151].mxu1  ;;  %4027 = vmatmul.mubr.f32.gmra.mrb[170].mxu0 %v2633_v19 }
 0x5f0   :  { %v2638_v21 = vpop.f32.mrb[152].mxu1 }
 0x5f1   :  { %v2640_v22 = vpop.f32.mrb[153].mxu1  ;;  %4029 = vmatprep.mubr.f32.mxu0 %v2638_v21 }
 0x5f2   :  { %v2641_v23 = vpop.f32.mrb[154].mxu1 }
 0x5f3   :  { %v2643_v24 = vpop.f32.mrb[155].mxu1  ;;  %4030 = vmatmul.mubr.f32.gmra.mrb[172].mxu0 %v2641_v23 }
 0x5f8   :  { %v2646_v25 = vpop.f32.mrb[156].mxu1 }
 0x5f9   :  { %v2648_v26 = vpop.f32.mrb[157].mxu1  ;;  %4032 = vmatprep.mubr.f32.mxu0 %v2646_v25 }
 0x5fa   :  { %v2649_v27 = vpop.f32.mrb[158].mxu1 }
 0x5fb   :  { %v2651_v28 = vpop.f32.mrb[159].mxu1  ;;  %4033 = vmatmul.mubr.f32.gmra.mrb[174].mxu0 %v2649_v27 }
 0x600   :  { %v2654_v29 = vpop.f32.mrb[160].mxu1 }
 0x601   :  { %v2656_v30 = vpop.f32.mrb[161].mxu1  ;;  %4035 = vmatprep.mubr.f32.mxu0 %v2654_v29 }
 0x602   :  { %v2657_v31 = vpop.f32.mrb[162].mxu1 }
 0x603   :  { %v2659_v32 = vpop.f32.mrb[163].mxu1  ;;  %4036 = vmatmul.mubr.f32.gmra.mrb[176].mxu0 %v2657_v31 }
 0x608   :  { %v2662_v33 = vpop.f32.mrb[164].mxu1 }
 0x609   :  { %v2664_v34 = vpop.f32.mrb[165].mxu1  ;;  %4038 = vmatprep.mubr.f32.mxu0 %v2662_v33 }
 0x60a   :  { %v2665_v35 = vpop.f32.mrb[166].mxu1 }
 0x60b   :  { %v2667_v36 = vpop.f32.mrb[167].mxu1  ;;  %4039 = vmatmul.mubr.f32.gmra.mrb[178].mxu0 %v2665_v35 }
 0x610   :  { %v2670_v37 = vpop.f32.mrb[168].mxu1 }
 0x611   :  { %v2672_v38 = vpop.f32.mrb[169].mxu1  ;;  %4041 = vmatprep.mubr.f32.mxu0 %v2670_v37 }
 0x612   :  { %v2673_v39 = vpop.f32.mrb[170].mxu1 }
 0x613   :  { %v2675_v40 = vpop.f32.mrb[171].mxu1  ;;  %4042 = vmatmul.mubr.f32.gmra.mrb[180].mxu0 %v2673_v39 }
 0x616   :  { %v3965_v43 = vpop.f32.mrb[128].mxu0 }
 0x617   :  { %v2812_v44 = vadd.f32 %v3965_v43, %v5948_v42  ;;  %v2806_v45 = vpop.f32.mrb[129].mxu0 }
 0x618   :  { %v2807_v46 = vadd.f32 %v5948_v42, %v2806_v45  ;;  %v2678_v47 = vpop.f32.mrb[172].mxu1 }
 0x619   :  { %v3126_v48 = vmax.f32 %v2812_v44, 0.0  ;;  %v2680_v49 = vpop.f32.mrb[173].mxu1  ;;  %4044 = vmatprep.mubr.f32.mxu0 %v2678_v47 }
 0x61a   :  { %v3125_v50 = vmax.f32 %v2807_v46, 0.0  ;;  %v2681_v51 = vpop.f32.mrb[174].mxu1 }
 0x61b   :  { %v2683_v52 = vpop.f32.mrb[175].mxu1  ;;  %4045 = vmatmul.mubr.f32.gmra.mrb[182].mxu0 %v2681_v51 }
 0x61c   :  { %v5952_v53 = vpack.c.bf16 %v3126_v48, %v3125_v50 }
 0x61e   :  { %v3968_v54 = vpop.f32.mrb[130].mxu0 }
 0x61f   :  { %v2822_v55 = vadd.f32 %v3968_v54, %v5948_v42  ;;  %v2816_v56 = vpop.f32.mrb[131].mxu0 }
 0x620   :  { %v2817_v57 = vadd.f32 %v5948_v42, %v2816_v56  ;;  %v2686_v58 = vpop.f32.mrb[176].mxu1 }
 0x621   :  { %v3128_v59 = vmax.f32 %v2822_v55, 0.0  ;;  %v2688_v60 = vpop.f32.mrb[177].mxu1  ;;  %4047 = vmatprep.mubr.f32.mxu0 %v2686_v58 }
 0x622   :  { %v3127_v61 = vmax.f32 %v2817_v57, 0.0  ;;  %v2689_v62 = vpop.f32.mrb[178].mxu1 }
 0x623   :  { %v2691_v63 = vpop.f32.mrb[179].mxu1  ;;  %4048 = vmatmul.mubr.f32.gmra.mrb[184].mxu0 %v2689_v62 }
 0x624   :  { %v5956_v1 = vpack.c.bf16 %v3128_v59, %v3127_v61 }
 0x626   :  { %v3971_v2 = vpop.f32.mrb[132].mxu0 }
 0x627   :  { %v2832_v3 = vadd.f32 %v3971_v2, %v5948_v42  ;;  %v2826_v4 = vpop.f32.mrb[133].mxu0 }
 0x628   :  { %v2827_v5 = vadd.f32 %v5948_v42, %v2826_v4  ;;  %v2694_v6 = vpop.f32.mrb[180].mxu1 }
 0x629   :  { %v3130_v7 = vmax.f32 %v2832_v3, 0.0  ;;  %v2696_v0 = vpop.f32.mrb[181].mxu1  ;;  %4050 = vmatprep.mubr.f32.mxu0 %v2694_v6 }
 0x62a   :  { %v3129_v41 = vmax.f32 %v2827_v5, 0.0  ;;  %v2697_v8 = vpop.f32.mrb[182].mxu1 }
 0x62b   :  { %v2699_v9 = vpop.f32.mrb[183].mxu1  ;;  %4051 = vmatmul.mubr.f32.gmra.mrb[186].mxu0 %v2697_v8 }
 0x62c   :  { %v5960_v10 = vpack.c.bf16 %v3130_v7, %v3129_v41 }
 0x62e   :  { %v3974_v11 = vpop.f32.mrb[134].mxu0 }
 0x62f   :  { %v2842_v12 = vadd.f32 %v3974_v11, %v5948_v42  ;;  %v2836_v13 = vpop.f32.mrb[135].mxu0 }
 0x630   :  { %v2837_v14 = vadd.f32 %v5948_v42, %v2836_v13  ;;  %v2702_v15 = vpop.f32.mrb[184].mxu1 }
 0x631   :  { %v3132_v16 = vmax.f32 %v2842_v12, 0.0  ;;  %v2704_v17 = vpop.f32.mrb[185].mxu1  ;;  %4053 = vmatprep.mubr.f32.mxu0 %v2702_v15 }
 0x632   :  { %v3131_v18 = vmax.f32 %v2837_v14, 0.0  ;;  %v2705_v19 = vpop.f32.mrb[186].mxu1 }
 0x633   :  { %v2707_v20 = vpop.f32.mrb[187].mxu1  ;;  %4054 = vmatmul.mubr.f32.gmra.mrb[188].mxu0 %v2705_v19 }
 0x634   :  { %v5964_v21 = vpack.c.bf16 %v3132_v16, %v3131_v18 }
 0x636   :  { %v3977_v22 = vpop.f32.mrb[136].mxu0 }
 0x637   :  { %v2852_v23 = vadd.f32 %v3977_v22, %v5948_v42  ;;  %v2846_v24 = vpop.f32.mrb[137].mxu0 }
 0x638   :  { %v2847_v25 = vadd.f32 %v5948_v42, %v2846_v24  ;;  %v2710_v26 = vpop.f32.mrb[188].mxu1 }
 0x639   :  { %v3134_v27 = vmax.f32 %v2852_v23, 0.0  ;;  %v2712_v28 = vpop.f32.mrb[189].mxu1  ;;  %4056 = vmatprep.mubr.f32.mxu0 %v2710_v26 }
 0x63a   :  { %v3133_v29 = vmax.f32 %v2847_v25, 0.0  ;;  %v2713_v30 = vpop.f32.mrb[190].mxu1 }
 0x63b   :  { %v2715_v31 = vpop.f32.mrb[191].mxu1  ;;  %4057 = vmatmul.mubr.f32.gmra.mrb[190].mxu0 %v2713_v30 }
 0x63c   :  { %v5968_v32 = vpack.c.bf16 %v3134_v27, %v3133_v29 }
 0x63e   :  { %v3980_v33 = vpop.f32.mrb[138].mxu0 }
 0x63f   :  { %v2862_v34 = vadd.f32 %v3980_v33, %v5948_v42  ;;  %v2856_v35 = vpop.f32.mrb[139].mxu0 }
 0x640   :  { %v2857_v36 = vadd.f32 %v5948_v42, %v2856_v35 }
 0x641   :  { %v3136_v37 = vmax.f32 %v2862_v34, 0.0 }
 0x642   :  { %v3135_v38 = vmax.f32 %v2857_v36, 0.0 }
 0x644   :  { %v5972_v39 = vpack.c.bf16 %v3136_v37, %v3135_v38 }
 0x646   :  { %v3983_v40 = vpop.f32.mrb[140].mxu0 }
 0x647   :  { %v2872_v43 = vadd.f32 %v3983_v40, %v5948_v42  ;;  %v2866_v44 = vpop.f32.mrb[141].mxu0 }
 0x648   :  { %v2867_v45 = vadd.f32 %v5948_v42, %v2866_v44 }
 0x649   :  { %v3138_v46 = vmax.f32 %v2872_v43, 0.0 }
 0x64a   :  { %v3137_v47 = vmax.f32 %v2867_v45, 0.0 }
 0x64c   :  { %v5976_v48 = vpack.c.bf16 %v3138_v46, %v3137_v47 }
 0x64e   :  { %v3986_v49 = vpop.f32.mrb[142].mxu0 }
 0x64f   :  { %v2882_v50 = vadd.f32 %v3986_v49, %v5948_v42  ;;  %v2876_v51 = vpop.f32.mrb[143].mxu0 }
 0x650   :  { %v2877_v52 = vadd.f32 %v5948_v42, %v2876_v51 }
 0x651   :  { %v3140_v54 = vmax.f32 %v2882_v50, 0.0 }
 0x652   :  { %v3139_v55 = vmax.f32 %v2877_v52, 0.0 }
 0x654   :  { %v5980_v56 = vpack.c.bf16 %v3140_v54, %v3139_v55  ;;  %v6011_v55 = vld [vmem:[%s6142_s6 + $0x8] sm:$0xff] }
 0x656   :  { %v3989_v57 = vpop.f32.mrb[144].mxu0 }
 0x657   :  { %v2892_v58 = vadd.f32 %v3989_v57, %v5948_v42  ;;  %v2886_v59 = vpop.f32.mrb[145].mxu0 }
 0x658   :  { %v2887_v60 = vadd.f32 %v5948_v42, %v2886_v59 }
 0x659   :  { %v3142_v61 = vmax.f32 %v2892_v58, 0.0  ;;  %v3580_v58 = vcombine.high %v6011_v55, %v6011_v55 }
 0x65a   :  { %v3141_v62 = vmax.f32 %v2887_v60, 0.0 }
 0x65b   :  { %3309 = vmatprep.mubr.bf16.mxu0 %v3580_v58 }
 0x65c   :  { %v3197_v63 = vpack.c.bf16 %v3142_v61, %v3141_v62  ;;  %v4799_v62 = vmov 0.0|0.0  }
 0x65e   :  { %v3992_v2 = vpop.f32.mrb[146].mxu0  ;;  %3742 = vmatprep.subr.bf16.mxu1 %v3197_v63  ;;  %v3317_v63 = vld [vmem:[%s6143_s7] sm:$0xff] }
 0x65f   :  { %v2902_v3 = vadd.f32 %v3992_v2, %v5948_v42  ;;  %v2896_v4 = vpop.f32.mrb[147].mxu0  ;;  %3743 = vmatpush3.bf16.msra.mxu1 %v5952_v53  ;;  %v3319_v2 = vld [vmem:[%s6143_s7 + $0x10] sm:$0xff] }
 0x660   :  { %v2897_v5 = vadd.f32 %v5948_v42, %v2896_v4 }
 0x661   :  { %v3144_v6 = vmax.f32 %v2902_v3, 0.0 }
 0x662   :  { %v3143_v7 = vmax.f32 %v2897_v5, 0.0  ;;  %v3320_v5 = vld [vmem:[%s6143_s7 + $0x18] sm:$0xff] }
 0x664   :  { %v3198_v0 = vpack.c.bf16 %v3144_v6, %v3143_v7  ;;  %v4162_v7 = vpack.c.bf16 %v3320_v5, %v3319_v2 }
 0x666   :  { %v3995_v41 = vpop.f32.mrb[148].mxu0  ;;  %3744 = vmatprep.subr.bf16.mxu1 %v3198_v0 }
 0x667   :  { %v2912_v8 = vadd.f32 %v3995_v41, %v5948_v42  ;;  %v2906_v9 = vpop.f32.mrb[149].mxu0  ;;  %3745 = vmatpush3.bf16.msra.mxu1 %v5956_v1 }
 0x668   :  { %v2907_v11 = vadd.f32 %v5948_v42, %v2906_v9  ;;  %v3322_v9 = vld [vmem:[%s6143_s7 + $0x28] sm:$0xff] }
 0x669   :  { %v3146_v12 = vmax.f32 %v2912_v8, 0.0  ;;  %v3321_v8 = vld [vmem:[%s6143_s7 + $0x20] sm:$0xff] }
 0x66a   :  { %v3145_v13 = vmax.f32 %v2907_v11, 0.0 }
 0x66c   :  { %v3199_v14 = vpack.c.bf16 %v3146_v12, %v3145_v13 }
 0x66e   :  { %v3998_v15 = vpop.f32.mrb[150].mxu0  ;;  %3746 = vmatprep.subr.bf16.mxu1 %v3199_v14  ;;  %v4165_v14 = vpack.c.bf16 %v3322_v9, %v3321_v8 }
 0x66f   :  { %v2922_v53 = vadd.f32 %v3998_v15, %v5948_v42  ;;  %v2916_v16 = vpop.f32.mrb[151].mxu0  ;;  %3747 = vmatpush3.bf16.msra.mxu1 %v5960_v10  ;;  %v3323_v15 = vld [vmem:[%s6143_s7 + $0x30] sm:$0xff] }
 0x670   :  { %v2917_v17 = vadd.f32 %v5948_v42, %v2916_v16 }
 0x671   :  { %v3148_v18 = vmax.f32 %v2922_v53, 0.0  ;;  %v3324_v53 = vld [vmem:[%s6143_s7 + $0x38] sm:$0xff] }
 0x672   :  { %v3147_v19 = vmax.f32 %v2917_v17, 0.0 }
 0x674   :  { %v3200_v20 = vpack.c.bf16 %v3148_v18, %v3147_v19  ;;  %v4168_v18 = vpack.c.bf16 %v3324_v53, %v3323_v15 }
 0x676   :  { %v4001_v22 = vpop.f32.mrb[152].mxu0  ;;  %3748 = vmatprep.subr.bf16.mxu1 %v3200_v20 }
 0x677   :  { %v2932_v1 = vadd.f32 %v4001_v22, %v5948_v42  ;;  %v2926_v23 = vpop.f32.mrb[153].mxu0  ;;  %3749 = vmatpush3.bf16.msra.mxu1 %v5964_v21  ;;  %v3325_v22 = vld [vmem:[%s6143_s7 + $0x40] sm:$0xff] }
 0x678   :  { %v2927_v24 = vadd.f32 %v5948_v42, %v2926_v23 }
 0x679   :  { %v3150_v25 = vmax.f32 %v2932_v1, 0.0  ;;  %v3326_v1 = vld [vmem:[%s6143_s7 + $0x48] sm:$0xff] }
 0x67a   :  { %v3149_v26 = vmax.f32 %v2927_v24, 0.0 }
 0x67c   :  { %v3201_v27 = vpack.c.bf16 %v3150_v25, %v3149_v26  ;;  %v4171_v26 = vpack.c.bf16 %v3326_v1, %v3325_v22 }
 0x67e   :  { %v4004_v28 = vpop.f32.mrb[154].mxu0  ;;  %3750 = vmatprep.subr.bf16.mxu1 %v3201_v27  ;;  %v3327_v27 = vld [vmem:[%s6143_s7 + $0x50] sm:$0xff] }
 0x67f   :  { %v2942_v10 = vadd.f32 %v4004_v28, %v5948_v42  ;;  %v2936_v29 = vpop.f32.mrb[155].mxu0  ;;  %3751 = vmatpush3.bf16.msra.mxu1 %v5968_v32  ;;  %v3328_v28 = vld [vmem:[%s6143_s7 + $0x58] sm:$0xff] }
 0x680   :  { %v2937_v30 = vadd.f32 %v5948_v42, %v2936_v29 }
 0x681   :  { %v3152_v31 = vmax.f32 %v2942_v10, 0.0 }
 0x682   :  { %v3151_v33 = vmax.f32 %v2937_v30, 0.0  ;;  %v4174_v30 = vpack.c.bf16 %v3328_v28, %v3327_v27 }
 0x684   :  { %v3202_v34 = vpack.c.bf16 %v3152_v31, %v3151_v33 }
 0x686   :  { %v4007_v35 = vpop.f32.mrb[156].mxu0  ;;  %3752 = vmatprep.subr.bf16.mxu1 %v3202_v34 }
 0x687   :  { %v2952_v21 = vadd.f32 %v4007_v35, %v5948_v42  ;;  %v2946_v36 = vpop.f32.mrb[157].mxu0  ;;  %3753 = vmatpush3.bf16.msra.mxu1 %v5972_v39  ;;  %v3221_v39 = vld [vmem:[%s6142_s6] sm:$0xff] }
 0x688   :  { %v2947_v37 = vadd.f32 %v5948_v42, %v2946_v36  ;;  %v3578_v51 = vcombine.high %v3221_v39, %v3221_v39  ;;  %v3577_v54 = vcombine.low %v3221_v39, %v3221_v39 }
 0x689   :  { %v3154_v38 = vmax.f32 %v2952_v21, 0.0 }
 0x68a   :  { %v3153_v40 = vmax.f32 %v2947_v37, 0.0  ;;  %3269 = vmatprep.mubr.bf16.mxu1 %v3578_v51 }
 0x68c   :  { %v3203_v43 = vpack.c.bf16 %v3154_v38, %v3153_v40 }
 0x68e   :  { %v4010_v44 = vpop.f32.mrb[158].mxu0  ;;  %3754 = vmatprep.subr.bf16.mxu1 %v3203_v43 }
 0x68f   :  { %v2962_v32 = vadd.f32 %v4010_v44, %v5948_v42  ;;  %v2956_v45 = vpop.f32.mrb[159].mxu0  ;;  %3755 = vmatpush3.bf16.msra.mxu1 %v5976_v48 }
 0x690   :  { %v2957_v46 = vadd.f32 %v5948_v42, %v2956_v45 }
 0x691   :  { %v3156_v47 = vmax.f32 %v2962_v32, 0.0 }
 0x692   :  { %v3155_v49 = vmax.f32 %v2957_v46, 0.0 }
 0x694   :  { %v3204_v50 = vpack.c.bf16 %v3156_v47, %v3155_v49 }
 0x696   :  { %v4013_v52 = vpop.f32.mrb[160].mxu0  ;;  %3756 = vmatprep.subr.bf16.mxu1 %v3204_v50 }
 0x697   :  { %v2972_v48 = vadd.f32 %v4013_v52, %v5948_v42  ;;  %v2966_v57 = vpop.f32.mrb[161].mxu0  ;;  %3757 = vmatpush3.bf16.msra.mxu1 %v5980_v56  ;;  %v3318_v56 = vld [vmem:[%s6143_s7 + $0x8] sm:$0xff] }
 0x698   :  { %v2967_v59 = vadd.f32 %v5948_v42, %v2966_v57  ;;  %4158 = vmatprep.subr.bf16.mxu1 %v4799_v62  ;;  %v4159_v4 = vpack.c.bf16 %v3318_v56, %v3317_v63 }
 0x699   :  { %v3158_v60 = vmax.f32 %v2972_v48, 0.0 }
 0x69a   :  { %v3157_v61 = vmax.f32 %v2967_v59, 0.0  ;;  %3270 = vmatmul.mubr.bf16.vlgmr.msra.gmra.mrb[192].mxu1 %v3577_v54 }
 0x69b   :  { %4160 = vmatpush3.bf16.msra.mxu1 %v4159_v4 }
 0x69c   :  { %v6028_v3 = vpack.c.bf16 %v3158_v60, %v3157_v61  ;;  %4161 = vmatprep.subr.bf16.mxu1 %v4799_v62 }
 0x69e   :  { %v4016_v6 = vpop.f32.mrb[162].mxu0 }
 0x69f   :  { %v2982_v0 = vadd.f32 %v4016_v6, %v5948_v42  ;;  %v2976_v41 = vpop.f32.mrb[163].mxu0  ;;  %4163 = vmatpush3.bf16.msra.mxu1 %v4162_v7 }
 0x6a0   :  { %v2977_v11 = vadd.f32 %v5948_v42, %v2976_v41  ;;  %4164 = vmatprep.subr.bf16.mxu1 %v4799_v62 }
 0x6a1   :  { %v3160_v12 = vmax.f32 %v2982_v0, 0.0 }
 0x6a2   :  { %v3159_v13 = vmax.f32 %v2977_v11, 0.0 }
 0x6a3   :  { %4166 = vmatpush3.bf16.msra.mxu1 %v4165_v14 }
 0x6a4   :  { %v6049_v16 = vpack.c.bf16 %v3160_v12, %v3159_v13  ;;  %4167 = vmatprep.subr.bf16.mxu1 %v4799_v62 }
 0x6a6   :  { %v4019_v17 = vpop.f32.mrb[164].mxu0 }
 0x6a7   :  { %v2992_v19 = vadd.f32 %v4019_v17, %v5948_v42  ;;  %v2986_v20 = vpop.f32.mrb[165].mxu0  ;;  %4169 = vmatpush3.bf16.msra.mxu1 %v4168_v18 }
 0x6a8   :  { %v2987_v23 = vadd.f32 %v5948_v42, %v2986_v20  ;;  %4170 = vmatprep.subr.bf16.mxu1 %v4799_v62 }
 0x6a9   :  { %v3162_v24 = vmax.f32 %v2992_v19, 0.0 }
 0x6aa   :  { %v3161_v25 = vmax.f32 %v2987_v23, 0.0 }
 0x6ab   :  { %4172 = vmatpush3.bf16.msra.mxu1 %v4171_v26 }
 0x6ac   :  { %v6067_v10 = vpack.c.bf16 %v3162_v24, %v3161_v25  ;;  %4173 = vmatprep.subr.bf16.mxu1 %v4799_v62 }
 0x6ae   :  { %v4022_v29 = vpop.f32.mrb[166].mxu0 }
 0x6af   :  { %v3002_v31 = vadd.f32 %v4022_v29, %v5948_v42  ;;  %v2996_v33 = vpop.f32.mrb[167].mxu0  ;;  %4175 = vmatpush3.bf16.msra.mxu1 %v4174_v30 }
 0x6b0   :  { %v2997_v34 = vadd.f32 %v5948_v42, %v2996_v33  ;;  %4176 = vmatprep.subr.bf16.mxu1 %v4799_v62 }
 0x6b1   :  { %v3164_v35 = vmax.f32 %v3002_v31, 0.0 }
 0x6b2   :  { %v3163_v21 = vmax.f32 %v2997_v34, 0.0 }
 0x6b4   :  { %v6073_v36 = vpack.c.bf16 %v3164_v35, %v3163_v21 }
 0x6b6   :  { %v4025_v37 = vpop.f32.mrb[168].mxu0 }
 0x6b7   :  { %v3012_v38 = vadd.f32 %v4025_v37, %v5948_v42  ;;  %v3006_v40 = vpop.f32.mrb[169].mxu0 }
 0x6b8   :  { %v3007_v43 = vadd.f32 %v5948_v42, %v3006_v40 }
 0x6b9   :  { %v3166_v44 = vmax.f32 %v3012_v38, 0.0 }
 0x6ba   :  { %v3165_v32 = vmax.f32 %v3007_v43, 0.0 }
 0x6bc   :  { %v6077_v45 = vpack.c.bf16 %v3166_v44, %v3165_v32 }
 0x6be   :  { %v4028_v46 = vpop.f32.mrb[170].mxu0 }
 0x6bf   :  { %v3022_v47 = vadd.f32 %v4028_v46, %v5948_v42  ;;  %v3016_v49 = vpop.f32.mrb[171].mxu0 }
 0x6c0   :  { %v3017_v39 = vadd.f32 %v5948_v42, %v3016_v49 }
 0x6c1   :  { %v3168_v50 = vmax.f32 %v3022_v47, 0.0 }
 0x6c2   :  { %v3167_v51 = vmax.f32 %v3017_v39, 0.0 }
 0x6c4   :  { %v6081_v52 = vpack.c.bf16 %v3168_v50, %v3167_v51 }
 0x6c6   :  { %v4031_v54 = vpop.f32.mrb[172].mxu0 }
 0x6c7   :  { %v3032_v48 = vadd.f32 %v4031_v54, %v5948_v42  ;;  %v3026_v57 = vpop.f32.mrb[173].mxu0 }
 0x6c8   :  { %v3027_v58 = vadd.f32 %v5948_v42, %v3026_v57 }
 0x6c9   :  { %v3170_v59 = vmax.f32 %v3032_v48, 0.0 }
 0x6ca   :  { %v3169_v60 = vmax.f32 %v3027_v58, 0.0 }
 0x6cc   :  { %v6085_v61 = vpack.c.bf16 %v3170_v59, %v3169_v60 }
 0x6ce   :  { %v4034_v63 = vpop.f32.mrb[174].mxu0 }
 0x6cf   :  { %v3042_v56 = vadd.f32 %v4034_v63, %v5948_v42  ;;  %v3036_v2 = vpop.f32.mrb[175].mxu0 }
 0x6d0   :  { %v3037_v4 = vadd.f32 %v5948_v42, %v3036_v2 }
 0x6d1   :  { %v3172_v5 = vmax.f32 %v3042_v56, 0.0 }
 0x6d2   :  { %v3171_v6 = vmax.f32 %v3037_v4, 0.0 }
 0x6d4   :  { %v6089_v7 = vpack.c.bf16 %v3172_v5, %v3171_v6  ;;  %v3329_v5 = vld [vmem:[%s6143_s7 + $0x60] sm:$0xff] }
 0x6d6   :  { %v4037_v0 = vpop.f32.mrb[176].mxu0 }
 0x6d7   :  { %v3052_v41 = vadd.f32 %v4037_v0, %v5948_v42  ;;  %v3046_v8 = vpop.f32.mrb[177].mxu0 }
 0x6d8   :  { %v3047_v9 = vadd.f32 %v5948_v42, %v3046_v8 }
 0x6d9   :  { %v3174_v11 = vmax.f32 %v3052_v41, 0.0 }
 0x6da   :  { %v3173_v12 = vmax.f32 %v3047_v9, 0.0 }
 0x6dc   :  { %v3213_v13 = vpack.c.bf16 %v3174_v11, %v3173_v12  ;;  %v4801_v12 = vmov 0.0  }
 0x6dd   :  { %4091 = vmatprep.mubr.msk.f32.mxu1 %vm4800_vm0, %v4801_v12 }
 0x6de   :  { %v4040_v14 = vpop.f32.mrb[178].mxu0  ;;  %3764 = vmatprep.subr.bf16.mxu0 %v3213_v13 }
 0x6df   :  { %v3062_v15 = vadd.f32 %v4040_v14, %v5948_v42  ;;  %v3056_v53 = vpop.f32.mrb[179].mxu0  ;;  %3765 = vmatpush3.bf16.msra.mxu0 %v6028_v3 }
 0x6e0   :  { %v3057_v17 = vadd.f32 %v5948_v42, %v3056_v53 }
 0x6e1   :  { %v3176_v18 = vmax.f32 %v3062_v15, 0.0 }
 0x6e2   :  { %v3175_v19 = vmax.f32 %v3057_v17, 0.0 }
 0x6e4   :  { %v3214_v20 = vpack.c.bf16 %v3176_v18, %v3175_v19  ;;  %v3581_v18 = vld [vmem:[%s6144_s8] ss:$0 sm:$0xff] }
 0x6e6   :  { %v4043_v22 = vpop.f32.mrb[180].mxu0  ;;  %3766 = vmatprep.subr.bf16.mxu0 %v3214_v20 }
 0x6e7   :  { %v3072_v1 = vadd.f32 %v4043_v22, %v5948_v42  ;;  %v3066_v23 = vpop.f32.mrb[181].mxu0  ;;  %3767 = vmatpush3.bf16.msra.mxu0 %v6049_v16 }
 0x6e8   :  { %v3067_v24 = vadd.f32 %v5948_v42, %v3066_v23 }
 0x6e9   :  { %v3178_v25 = vmax.f32 %v3072_v1, 0.0 }
 0x6ea   :  { %v3177_v26 = vmax.f32 %v3067_v24, 0.0 }
 0x6ec   :  { %v3215_v27 = vpack.c.bf16 %v3178_v25, %v3177_v26 }
 0x6ee   :  { %v4046_v28 = vpop.f32.mrb[182].mxu0  ;;  %3768 = vmatprep.subr.bf16.mxu0 %v3215_v27 }
 0x6ef   :  { %v3082_v3 = vadd.f32 %v4046_v28, %v5948_v42  ;;  %v3076_v29 = vpop.f32.mrb[183].mxu0  ;;  %3769 = vmatpush3.bf16.msra.mxu0 %v6067_v10 }
 0x6f0   :  { %v3077_v30 = vadd.f32 %v5948_v42, %v3076_v29 }
 0x6f1   :  { %v3180_v31 = vmax.f32 %v3082_v3, 0.0 }
 0x6f2   :  { %v3179_v33 = vmax.f32 %v3077_v30, 0.0 }
 0x6f4   :  { %v3216_v34 = vpack.c.bf16 %v3180_v31, %v3179_v33 }
 0x6f6   :  { %v4049_v35 = vpop.f32.mrb[184].mxu0  ;;  %3770 = vmatprep.subr.bf16.mxu0 %v3216_v34 }
 0x6f7   :  { %v3092_v16 = vadd.f32 %v4049_v35, %v5948_v42  ;;  %v3086_v21 = vpop.f32.mrb[185].mxu0  ;;  %3771 = vmatpush3.bf16.msra.mxu0 %v6073_v36 }
 0x6f8   :  { %v3087_v37 = vadd.f32 %v5948_v42, %v3086_v21 }
 0x6f9   :  { %v3182_v38 = vmax.f32 %v3092_v16, 0.0 }
 0x6fa   :  { %v3181_v40 = vmax.f32 %v3087_v37, 0.0 }
 0x6fc   :  { %v3217_v43 = vpack.c.bf16 %v3182_v38, %v3181_v40 }
 0x6fe   :  { %v4052_v44 = vpop.f32.mrb[186].mxu0  ;;  %3772 = vmatprep.subr.bf16.mxu0 %v3217_v43 }
 0x6ff   :  { %v3102_v10 = vadd.f32 %v4052_v44, %v5948_v42  ;;  %v3096_v32 = vpop.f32.mrb[187].mxu0  ;;  %3773 = vmatpush3.bf16.msra.mxu0 %v6077_v45 }
 0x700   :  { %v3097_v46 = vadd.f32 %v5948_v42, %v3096_v32 }
 0x701   :  { %v3184_v47 = vmax.f32 %v3102_v10, 0.0 }
 0x702   :  { %v3183_v49 = vmax.f32 %v3097_v46, 0.0 }
 0x704   :  { %v3218_v39 = vpack.c.bf16 %v3184_v47, %v3183_v49 }
 0x706   :  { %v4055_v50 = vpop.f32.mrb[188].mxu0  ;;  %3774 = vmatprep.subr.bf16.mxu0 %v3218_v39 }
 0x707   :  { %v3112_v36 = vadd.f32 %v4055_v50, %v5948_v42  ;;  %v3106_v51 = vpop.f32.mrb[189].mxu0  ;;  %3775 = vmatpush3.bf16.msra.mxu0 %v6081_v52  ;;  %v3579_v52 = vcombine.low %v6011_v55, %v6011_v55  ;;  %v3331_v55 = vld [vmem:[%s6143_s7 + $0x70] sm:$0xff] }
 0x708   :  { %v3107_v54 = vadd.f32 %v5948_v42, %v3106_v51 }
 0x709   :  { %v3186_v48 = vmax.f32 %v3112_v36, 0.0 }
 0x70a   :  { %v3185_v57 = vmax.f32 %v3107_v54, 0.0 }
 0x70c   :  { %v3219_v58 = vpack.c.bf16 %v3186_v48, %v3185_v57 }
 0x70e   :  { %v4058_v59 = vpop.f32.mrb[190].mxu0  ;;  %3776 = vmatprep.subr.bf16.mxu0 %v3219_v58 }
 0x70f   :  { %v3122_v45 = vadd.f32 %v4058_v59, %v5948_v42  ;;  %v3116_v60 = vpop.f32.mrb[191].mxu0  ;;  %3777 = vmatpush3.bf16.msra.mxu0 %v6085_v61  ;;  %v3330_v61 = vld [vmem:[%s6143_s7 + $0x68] sm:$0xff] }
 0x710   :  { %v3117_v63 = vadd.f32 %v5948_v42, %v3116_v60  ;;  %v4177_v6 = vpack.c.bf16 %v3330_v61, %v3329_v5 }
 0x711   :  { %v3188_v56 = vmax.f32 %v3122_v45, 0.0 }
 0x712   :  { %v3187_v2 = vmax.f32 %v3117_v63, 0.0  ;;  %4178 = vmatpush3.bf16.msra.mxu1 %v4177_v6 }
 0x713   :  { %4179 = vmatprep.subr.bf16.mxu1 %v4799_v62 }
 0x714   :  { %v3220_v4 = vpack.c.bf16 %v3188_v56, %v3187_v2 }
 0x716   :  { %3778 = vmatprep.subr.bf16.mxu0 %v3220_v4 }
 0x717   :  { %3779 = vmatpush3.bf16.msra.mxu0 %v6089_v7  ;;  %v3332_v7 = vld [vmem:[%s6143_s7 + $0x78] sm:$0xff] }
 0x718   :  { %v4180_v41 = vpack.c.bf16 %v3332_v7, %v3331_v55 }
 0x71a   :  { %3310 = vmatmul.mubr.bf16.vlgmr.msra.gmra.mrb[192].mxu0 %v3579_v52  ;;  %4181 = vmatpush3.bf16.msra.mxu1 %v4180_v41 }
 0x76d   :  { %v3758_v42 = vpop.f32.mrb[192].mxu1 }
 0x76e   :  { %v3759_v0 = vpop.f32.mrb[193].mxu1 }
 0x76f   :  { %v3760_v8 = vadd.f32 %v3759_v0, %v3758_v42  ;;  %v3761_v9 = vpop.f32.mrb[194].mxu1 }
 0x770   :  { %v3762_v11 = vpop.f32.mrb[195].mxu1 }
 0x7ed   :  { %v3780_v13 = vpop.f32.mrb[192].mxu0 }
 0x7ee   :  { %v3781_v14 = vpop.f32.mrb[193].mxu0 }
 0x7ef   :  { %v3782_v62 = vadd.f32 %v3781_v14, %v3780_v13  ;;  %v3783_v15 = vpop.f32.mrb[194].mxu0 }
 0x7f0   :  { %v3784_v53 = vpop.f32.mrb[195].mxu0 }
 0x7f1   :  { %v3312_v17 = vadd.f32 %v3782_v62, %v3760_v8 }
 0x7f3   :  { %4092 = vmatmul.mubr.f32.vlgmr.msra.gmra.mrb[196].mxu1 %v3312_v17 }
 0x8c6   :  { %v3406_v19 = vpop.f32.mrb[196].mxu1 }
 0x8c7   :  { %v3407_v20 = vadd.f32 %v3581_v18, %v3406_v19  ;;  %v4093_v22 = vpop.f32.mrb[197].mxu1 }
 0x8c9   :  { %3410 = vst [vmem:[%s6145_s9] sm:$0xff] %v3407_v20 }

</bundles_post_ra>
